<compile_context>
chip_gen: v7x
topology: tpu7x:2x2x1
jax: 0.10.0
libtpu: 0.0.40
codegen_flags: <defaults>
</compile_context>

<pallas_src>
import functools

import jax
import jax.numpy as jnp
from jax.experimental import pallas as pl
from jax.experimental.pallas import tpu as pltpu

BN_EPS = 1e-5


def _elu(x):
    # F.elu with alpha=1.0 (input is f32)
    return jnp.where(x > 0, x, jnp.exp(jnp.minimum(x, 0.0)) - 1.0)


def _round_up(x, m):
    return (x + m - 1) // m * m


def _cdiv(a, b):
    return (a + b - 1) // b


def _vmem_budget(block_bytes, live_bytes=0):
    # double-buffered blocks + in-kernel live values + headroom; stays well
    # inside the smallest per-core VMEM across generations (64 MiB on v7x).
    need = 2 * int(block_bytes) + int(live_bytes) + (4 << 20)
    return int(min(max(need, 8 << 20), 40 << 20))


# ---------------------------------------------------------------------------
# Kernel A (encoder): conv1('same') -> ELU -> BN1 -> AvgPool(1,C) ->
# conv2(centre tap) -> ELU -> BN2, for one tile of (b, t) rows, as two dense
# matmuls (Toeplitz conv1 weights; pool/BN1 folded into the second weight).
# ---------------------------------------------------------------------------
def _encoder_kernel(xpad_ref, w1_ref, b1_ref, w2_ref, enc2_ref, h2_ref):
    hw = jnp.dot(xpad_ref[...], w1_ref[...],
                 preferred_element_type=jnp.float32) + b1_ref[...]
    hw = _elu(hw)                                   # (TM, CF1_pad), f32
    b2 = enc2_ref[0:1, :]
    s2 = enc2_ref[1:2, :]
    t2 = enc2_ref[2:3, :]
    h2 = jnp.dot(hw.astype(w2_ref.dtype), w2_ref[...],
                 preferred_element_type=jnp.float32) + b2
    h2 = _elu(h2) * s2 + t2                         # padded lanes stay exact 0
    h2_ref[...] = h2.astype(h2_ref.dtype)


# ---------------------------------------------------------------------------
# Kernel B (head): fc_latent -> {classifier | fc_decoder+upsample+1x1 conv},
# the latter pre-folded into one (L -> T) map and packed with the classifier
# into a single lane-dense matmul.
# ---------------------------------------------------------------------------
def _head_kernel(xflat_ref, wlat_ref, blat_ref, whead_ref, bhead_ref,
                 lat_ref, head_ref):
    lat = jnp.dot(xflat_ref[...], wlat_ref[...],
                  preferred_element_type=jnp.float32) + blat_ref[...]
    lat_ref[...] = lat
    head_ref[...] = jnp.dot(lat.astype(whead_ref.dtype), whead_ref[...],
                            preferred_element_type=jnp.float32) + bhead_ref[...]


# ---------------------------------------------------------------------------
# Forward wrapper: trace-time weight folding / permutation + two pallas_calls.
# ---------------------------------------------------------------------------
@functools.partial(jax.jit, static_argnames=("compute_dtype", "row_tile"))
def min2net_forward(x, params, *, compute_dtype=jnp.bfloat16, row_tile=512):
    f32 = jnp.float32
    cdt = jnp.dtype(compute_dtype)
    B, D, T, C = x.shape
    if D != 1:
        # TODO(synk): input depth D > 1 not supported (module default is D=1).
        raise NotImplementedError("MIN2Net Pallas port assumes D == 1.")

    F1, _, _, K1 = params["conv1_w"].shape
    F2, _, _, K2 = params["conv2_w"].shape
    L = params["fc_latent_w"].shape[0]
    NC = params["cls_w"].shape[0]

    # ------------------ static padded sizes ---------------------------------
    left1 = (K1 - 1) // 2                   # PyTorch 'same': left = (K-1)//2
    Cpad = C + K1 - 1
    Cpad_al = _round_up(Cpad, 128)
    CF1 = C * F1
    CF1_pad = _round_up(CF1, 128)
    F2pad = _round_up(F2, 128)
    TF2 = T * F2
    TF2p = _round_up(TF2, 128)
    Lpad = _round_up(L, 128)
    Nh = _round_up(NC + T, 128)

    # ------------------ trace-time parameter folding (exact, free) ----------
    # conv1 as a Toeplitz-expanded matmul weight: W1_toe[r, w*F1+f] = w1[r-w,f]
    w1_kf = params["conv1_w"].reshape(F1, K1).T                      # (K1, F1)
    r = jnp.arange(Cpad_al)[:, None]
    w = jnp.arange(C)[None, :]
    k_idx = r - w                                                    # (Cpad_al, C)
    valid = (k_idx >= 0) & (k_idx < K1)
    toe = jnp.where(valid[:, :, None],
                    w1_kf[jnp.clip(k_idx, 0, K1 - 1)], 0.0)          # (Cpad_al, C, F1)
    w1_toe = jnp.pad(toe.reshape(Cpad_al, CF1),
                     ((0, 0), (0, CF1_pad - CF1))).astype(cdt)
    b1_rep = jnp.pad(jnp.tile(params["conv1_b"], C),
                     (0, CF1_pad - CF1)).reshape(1, CF1_pad).astype(f32)

    # BN1 (inference) + 1/C average pool folded into conv2's centre tap;
    # BN2 as affine rows.  (conv1 -> ELU -> BN1 -> pool order of the module.)
    # TODO(synk): train-mode BatchNorm (batch statistics) not implemented.
    scale1 = params["bn1_gamma"] * jax.lax.rsqrt(params["bn1_var"] + BN_EPS)
    shift1 = params["bn1_beta"] - params["bn1_mean"] * scale1
    tap = (K2 - 1) // 2                     # only conv2 tap that sees real data
    w2_tap = params["conv2_w"][:, :, 0, tap].T                       # (F1, F2)
    w2_fold = scale1[:, None] * w2_tap
    w2_big = jnp.pad(jnp.tile(w2_fold * (1.0 / C), (C, 1)),
                     ((0, CF1_pad - CF1), (0, F2pad - F2))).astype(cdt)
    b2 = params["conv2_b"] + shift1 @ w2_tap
    scale2 = params["bn2_gamma"] * jax.lax.rsqrt(params["bn2_var"] + BN_EPS)
    shift2 = params["bn2_beta"] - params["bn2_mean"] * scale2
    enc2 = jnp.pad(jnp.stack([b2, scale2, shift2]),
                   ((0, 0), (0, F2pad - F2))).astype(f32)            # (3, F2pad)

    # fc_latent rows permuted from PyTorch flatten order (f*T + t) to the
    # encoder's native (t*F2 + f) order; zero-padded lane-dense.
    wlat = (params["fc_latent_w"].T.reshape(F2, T, L)
            .transpose(1, 0, 2).reshape(TF2, L))
    wlat = jnp.pad(wlat, ((0, TF2p - TF2), (0, Lpad - L))).astype(cdt)
    blat = jnp.pad(params["fc_latent_b"],
                   (0, Lpad - L)).reshape(1, Lpad).astype(f32)

    # fc_decoder -> (upsample == broadcast along C) -> 1x1 reconstruct conv
    # folded into one (L -> T) map; packed with the classifier into one weight.
    wr = params["rec_w"].reshape(F2)                                 # D == 1
    wrec = jnp.einsum("ftl,f->lt",
                      params["fc_decoder_w"].reshape(F2, T, L), wr)  # (L, T)
    brec = (jnp.einsum("ft,f->t", params["fc_decoder_b"].reshape(F2, T), wr)
            + params["rec_b"][0])                                    # (T,)
    wcls = params["cls_w"].T                                         # (L, NC)
    whead = jnp.pad(jnp.concatenate([wcls, wrec], axis=1),
                    ((0, Lpad - L), (0, Nh - (NC + T)))).astype(cdt)
    bhead = jnp.pad(jnp.concatenate([params["cls_b"], brec]),
                    (0, Nh - (NC + T))).reshape(1, Nh).astype(f32)

    # ------------------ kernel A: encoder over (b, t)-row tiles -------------
    BT = B * T
    nblk = _cdiv(BT, int(row_tile))
    if nblk == 1 and BT >= 512:
        nblk = 2            # keep both v7x TensorCores busy when there's work
    TM = max(8, _round_up(_cdiv(BT, nblk), 8))
    BT_pad = _round_up(BT, TM)

    xrows = x.reshape(BT, C)
    xrows = jnp.pad(xrows, ((0, BT_pad - BT),
                            (left1, Cpad_al - C - left1))).astype(cdt)

    it = cdt.itemsize
    blkA = (TM * Cpad_al * it + Cpad_al * CF1_pad * it + CF1_pad * 4
            + CF1_pad * F2pad * it + 3 * F2pad * 4 + TM * F2pad * it)
    liveA = TM * CF1_pad * (4 + it)
    enc_cost = pl.CostEstimate(
        flops=int(2 * BT_pad * (Cpad_al * CF1_pad + CF1_pad * F2pad)),
        transcendentals=int(BT_pad * (CF1_pad + F2pad)),
        bytes_accessed=int(BT_pad * (Cpad_al + F2pad) * it
                           + (Cpad_al * CF1_pad + CF1_pad * F2pad) * it
                           + (CF1_pad + 3 * F2pad) * 4),
    )
    h2 = pl.pallas_call(
        _encoder_kernel,
        grid=(BT_pad // TM,),
        in_specs=[
            pl.BlockSpec((TM, Cpad_al), lambda i: (i, 0)),
            pl.BlockSpec((Cpad_al, CF1_pad), lambda i: (0, 0)),
            pl.BlockSpec((1, CF1_pad), lambda i: (0, 0)),
            pl.BlockSpec((CF1_pad, F2pad), lambda i: (0, 0)),
            pl.BlockSpec((3, F2pad), lambda i: (0, 0)),
        ],
        out_specs=pl.BlockSpec((TM, F2pad), lambda i: (i, 0)),
        out_shape=jax.ShapeDtypeStruct((BT_pad, F2pad), cdt),
        compiler_params=pltpu.CompilerParams(
            dimension_semantics=("parallel",),
            vmem_limit_bytes=_vmem_budget(blkA, liveA),
        ),
        cost_estimate=enc_cost,
    )(xrows, w1_toe, b1_rep, w2_big, enc2)

    # Rows are already (b, t)-major: the narrow-F2 slice + flatten is one tiny
    # XLA copy (the kernel store itself stayed lane-dense at 128 lanes).
    xflat = h2[:BT].reshape(B, T, F2pad)[:, :, :F2].reshape(B, TF2)

    # ------------------ kernel B: latent / {classifier | reconstruct} -------
    B8 = _round_up(B, 8)
    TB = min(B8, 256)
    B_pad = _round_up(B8, TB)
    if B_pad != B or TF2p != TF2:
        xflat = jnp.pad(xflat, ((0, B_pad - B), (0, TF2p - TF2)))

    blkB = (TB * TF2p * it + TF2p * Lpad * it + Lpad * 4
            + Lpad * Nh * it + Nh * 4 + TB * (Lpad + Nh) * 4)
    head_cost = pl.CostEstimate(
        flops=int(2 * B_pad * (TF2p * Lpad + Lpad * Nh)),
        transcendentals=0,
        bytes_accessed=int(B_pad * TF2p * it
                           + (TF2p * Lpad + Lpad * Nh) * it
                           + B_pad * (Lpad + Nh) * 4 + (Lpad + Nh) * 4),
    )
    lat_out, head_out = pl.pallas_call(
        _head_kernel,
        grid=(B_pad // TB,),
        in_specs=[
            pl.BlockSpec((TB, TF2p), lambda i: (i, 0)),
            pl.BlockSpec((TF2p, Lpad), lambda i: (0, 0)),
            pl.BlockSpec((1, Lpad), lambda i: (0, 0)),
            pl.BlockSpec((Lpad, Nh), lambda i: (0, 0)),
            pl.BlockSpec((1, Nh), lambda i: (0, 0)),
        ],
        out_specs=[
            pl.BlockSpec((TB, Lpad), lambda i: (i, 0)),
            pl.BlockSpec((TB, Nh), lambda i: (i, 0)),
        ],
        out_shape=(
            jax.ShapeDtypeStruct((B_pad, Lpad), f32),
            jax.ShapeDtypeStruct((B_pad, Nh), f32),
        ),
        compiler_params=pltpu.CompilerParams(
            dimension_semantics=("parallel",),
            vmem_limit_bytes=_vmem_budget(blkB, 0),
        ),
        cost_estimate=head_cost,
    )(xflat, wlat, blat, whead, bhead)

    latent = lat_out[:B, :L]
    logits = head_out[:B, :NC]
    rec_val = head_out[:B, NC:NC + T]
    # Folded bilinear upsample == pure replication of the per-(b, t) value
    # along C (zero FLOPs); done at the XLA boundary so the kernel store
    # stays lane-dense.
    rec = jnp.broadcast_to(rec_val[:, None, :, None], (B, D, T, C))
    return rec, latent, logits


# ---------------------------------------------------------------------------
# Deterministic parameter init (PyTorch-native shapes)
# ---------------------------------------------------------------------------
def init_params(key, *, D, T, C, F1, F2, K1, K2, L, NC):
    ks = jax.random.split(key, 20)

    def n(i, shape, scale=0.1):
        return (scale * jax.random.normal(ks[i], shape)).astype(jnp.float32)

    return {
        "conv1_w": n(0, (F1, D, 1, K1)),
        "conv1_b": n(1, (F1,)),
        # BatchNorm2d in inference mode with (mildly non-trivial) running stats
        "bn1_gamma": 1.0 + n(2, (F1,)),
        "bn1_beta": n(3, (F1,)),
        "bn1_mean": n(4, (F1,)),
        "bn1_var": 1.0 + jnp.abs(n(5, (F1,))),
        "conv2_w": n(6, (F2, F1, 1, K2)),
        "conv2_b": n(7, (F2,)),
        "bn2_gamma": 1.0 + n(8, (F2,)),
        "bn2_beta": n(9, (F2,)),
        "bn2_mean": n(10, (F2,)),
        "bn2_var": 1.0 + jnp.abs(n(11, (F2,))),
        "fc_latent_w": n(12, (L, F2 * T)),
        "fc_latent_b": n(13, (L,)),
        "fc_decoder_w": n(14, (F2 * T, L)),
        "fc_decoder_b": n(15, (F2 * T,)),
        "rec_w": n(16, (D, F2, 1, 1)),
        "rec_b": n(17, (D,)),
        "cls_w": n(18, (NC, L)),
        "cls_b": n(19, (NC,)),
    }


if __name__ == "__main__":
    # Small config consistent with the module:
    #   input_shape=(D=1, T=128, C=16), pool_size_1=(1, C), pool_size_2=(1, 1),
    #   filter_1=20, filter_2=10 (hard-coded in the module's decoder view),
    #   latent_dim=32, num_class=2, conv kernels (1,64) and (1,32).
    B, D, T, C = 4, 1, 128, 16
    F1, F2 = 20, 10
    K1, K2 = 64, 32
    L, NC = 32, 2

    root = jax.random.PRNGKey(0)
    kp, kx = jax.random.split(root)
    params = init_params(kp, D=D, T=T, C=C, F1=F1, F2=F2, K1=K1, K2=K2, L=L, NC=NC)
    x = jax.random.normal(kx, (B, D, T, C), dtype=jnp.float32)

    rec, latent, logits = min2net_forward(x, params)
    jax.block_until_ready((rec, latent, logits))

    assert rec.shape == (B, D, T, C)
    assert latent.shape == (B, L)
    assert logits.shape == (B, NC)
    assert bool(jnp.all(jnp.isfinite(rec)))
    assert bool(jnp.all(jnp.isfinite(latent)))
    assert bool(jnp.all(jnp.isfinite(logits)))
    print("KERNEL_OK")
</pallas_src>

<mosaic_0001>
module attributes {stable_mosaic.version = 11 : i64} {
  func.func @_encoder_kernel(%arg0: i32, %arg1: memref<256x128xbf16, #tpu.memory_space<vmem>>, %arg2: memref<128x384xbf16, #tpu.memory_space<vmem>>, %arg3: memref<1x384xf32, #tpu.memory_space<vmem>>, %arg4: memref<384x128xbf16, #tpu.memory_space<vmem>>, %arg5: memref<3x128xf32, #tpu.memory_space<vmem>>, %arg6: memref<256x128xbf16, #tpu.memory_space<vmem>>) attributes {dimension_semantics = [#tpu.dimension_semantics<parallel>], iteration_bounds = array<i64: 2>, scalar_prefetch = 0 : i64, scratch_operands = 0 : i64, tpu.core_type = #tpu.core_type<tc>, window_params = [{transform_indices = @transform_0, window_bounds = array<i64: 256, 128>}, {pipeline_mode = #tpu.pipeline_mode<synchronous>, transform_indices = @transform_1, window_bounds = array<i64: 128, 384>}, {pipeline_mode = #tpu.pipeline_mode<synchronous>, transform_indices = @transform_2, window_bounds = array<i64: 1, 384>}, {pipeline_mode = #tpu.pipeline_mode<synchronous>, transform_indices = @transform_3, window_bounds = array<i64: 384, 128>}, {pipeline_mode = #tpu.pipeline_mode<synchronous>, transform_indices = @transform_4, window_bounds = array<i64: 3, 128>}, {transform_indices = @transform_5, window_bounds = array<i64: 256, 128>}]} {
    %c0 = arith.constant 0 : index
    %c0_0 = arith.constant 0 : index
    %0 = vector.load %arg1[%c0, %c0_0] : memref<256x128xbf16, #tpu.memory_space<vmem>>, vector<256x128xbf16>
    %c0_1 = arith.constant 0 : index
    %c0_2 = arith.constant 0 : index
    %1 = vector.load %arg2[%c0_1, %c0_2] : memref<128x384xbf16, #tpu.memory_space<vmem>>, vector<128x384xbf16>
    %cst = arith.constant dense<0.000000e+00> : vector<256x384xf32>
    %2 = tpu.matmul %0, %1, %cst {dimension_numbers = #tpu.dot_dimension_numbers<[1], [0], [0], [1], [0, 0, 1, 1], [], []>} : vector<256x128xbf16>, vector<128x384xbf16>, vector<256x384xf32> -> vector<256x384xf32>
    %c0_3 = arith.constant 0 : index
    %c0_4 = arith.constant 0 : index
    %3 = vector.load %arg3[%c0_3, %c0_4] : memref<1x384xf32, #tpu.memory_space<vmem>>, vector<1x384xf32>
    %4 = vector.broadcast %3 : vector<1x384xf32> to vector<256x384xf32>
    %5 = arith.addf %2, %4 : vector<256x384xf32>
    %cst_5 = arith.constant 0.000000e+00 : f32
    %6 = vector.broadcast %cst_5 : f32 to vector<256x384xf32>
    %7 = arith.cmpf ogt, %5, %6 : vector<256x384xf32>
    %cst_6 = arith.constant 0.000000e+00 : f32
    %8 = vector.broadcast %cst_6 : f32 to vector<256x384xf32>
    %9 = arith.minimumf %5, %8 : vector<256x384xf32>
    %10 = math.exp %9 : vector<256x384xf32>
    %cst_7 = arith.constant 1.000000e+00 : f32
    %11 = vector.broadcast %cst_7 : f32 to vector<256x384xf32>
    %12 = arith.subf %10, %11 : vector<256x384xf32>
    %13 = arith.select %7, %5, %12 : vector<256x384xi1>, vector<256x384xf32>
    %c0_8 = arith.constant 0 : index
    %c0_9 = arith.constant 0 : index
    %14 = vector.load %arg5[%c0_8, %c0_9] : memref<3x128xf32, #tpu.memory_space<vmem>>, vector<1x128xf32>
    %c1 = arith.constant 1 : index
    %c0_10 = arith.constant 0 : index
    %15 = vector.load %arg5[%c1, %c0_10] : memref<3x128xf32, #tpu.memory_space<vmem>>, vector<1x128xf32>
    %c2 = arith.constant 2 : index
    %c0_11 = arith.constant 0 : index
    %16 = vector.load %arg5[%c2, %c0_11] : memref<3x128xf32, #tpu.memory_space<vmem>>, vector<1x128xf32>
    %17 = arith.truncf %13 : vector<256x384xf32> to vector<256x384xbf16>
    %c0_12 = arith.constant 0 : index
    %c0_13 = arith.constant 0 : index
    %18 = vector.load %arg4[%c0_12, %c0_13] : memref<384x128xbf16, #tpu.memory_space<vmem>>, vector<384x128xbf16>
    %cst_14 = arith.constant dense<0.000000e+00> : vector<256x128xf32>
    %19 = tpu.matmul %17, %18, %cst_14 {dimension_numbers = #tpu.dot_dimension_numbers<[1], [0], [0], [1], [0, 0, 1, 1], [], []>} : vector<256x384xbf16>, vector<384x128xbf16>, vector<256x128xf32> -> vector<256x128xf32>
    %20 = vector.broadcast %14 : vector<1x128xf32> to vector<256x128xf32>
    %21 = arith.addf %19, %20 : vector<256x128xf32>
    %cst_15 = arith.constant 0.000000e+00 : f32
    %22 = vector.broadcast %cst_15 : f32 to vector<256x128xf32>
    %23 = arith.cmpf ogt, %21, %22 : vector<256x128xf32>
    %cst_16 = arith.constant 0.000000e+00 : f32
    %24 = vector.broadcast %cst_16 : f32 to vector<256x128xf32>
    %25 = arith.minimumf %21, %24 : vector<256x128xf32>
    %26 = math.exp %25 : vector<256x128xf32>
    %cst_17 = arith.constant 1.000000e+00 : f32
    %27 = vector.broadcast %cst_17 : f32 to vector<256x128xf32>
    %28 = arith.subf %26, %27 : vector<256x128xf32>
    %29 = arith.select %23, %21, %28 : vector<256x128xi1>, vector<256x128xf32>
    %30 = vector.broadcast %15 : vector<1x128xf32> to vector<256x128xf32>
    %31 = arith.mulf %29, %30 : vector<256x128xf32>
    %32 = vector.broadcast %16 : vector<1x128xf32> to vector<256x128xf32>
    %33 = arith.addf %31, %32 : vector<256x128xf32>
    %34 = arith.truncf %33 : vector<256x128xf32> to vector<256x128xbf16>
    %c0_18 = arith.constant 0 : index
    %c0_19 = arith.constant 0 : index
    %35 = vector.load %arg6[%c0_18, %c0_19] : memref<256x128xbf16, #tpu.memory_space<vmem>>, vector<256x128xbf16>
    tpu.vector_store %arg6[%c0_18, %c0_19], %34 {strides = array<i32>} : memref<256x128xbf16, #tpu.memory_space<vmem>>, vector<256x128xbf16>,
    return
  }
  func.func @transform_0(%arg0: i32) -> (i32, i32) {
    %c0_i32 = arith.constant 0 : i32
    %c0_i32_0 = arith.constant 0 : i32
    return %arg0, %c0_i32 : i32, i32
  }
  func.func @transform_1(%arg0: i32) -> (i32, i32) {
    %c0_i32 = arith.constant 0 : i32
    %c0_i32_0 = arith.constant 0 : i32
    %c0_i32_1 = arith.constant 0 : i32
    return %c0_i32, %c0_i32_0 : i32, i32
  }
  func.func @transform_2(%arg0: i32) -> (i32, i32) {
    %c0_i32 = arith.constant 0 : i32
    %c0_i32_0 = arith.constant 0 : i32
    %c0_i32_1 = arith.constant 0 : i32
    return %c0_i32, %c0_i32_0 : i32, i32
  }
  func.func @transform_3(%arg0: i32) -> (i32, i32) {
    %c0_i32 = arith.constant 0 : i32
    %c0_i32_0 = arith.constant 0 : i32
    %c0_i32_1 = arith.constant 0 : i32
    return %c0_i32, %c0_i32_0 : i32, i32
  }
  func.func @transform_4(%arg0: i32) -> (i32, i32) {
    %c0_i32 = arith.constant 0 : i32
    %c0_i32_0 = arith.constant 0 : i32
    %c0_i32_1 = arith.constant 0 : i32
    return %c0_i32, %c0_i32_0 : i32, i32
  }
  func.func @transform_5(%arg0: i32) -> (i32, i32) {
    %c0_i32 = arith.constant 0 : i32
    %c0_i32_0 = arith.constant 0 : i32
    return %arg0, %c0_i32 : i32, i32
  }
}

module attributes {stable_mosaic.version = 11 : i64} {
  func.func @_head_kernel(%arg0: i32, %arg1: memref<8x1280xbf16, #tpu.memory_space<vmem>>, %arg2: memref<1280x128xbf16, #tpu.memory_space<vmem>>, %arg3: memref<1x128xf32, #tpu.memory_space<vmem>>, %arg4: memref<128x256xbf16, #tpu.memory_space<vmem>>, %arg5: memref<1x256xf32, #tpu.memory_space<vmem>>, %arg6: memref<8x128xf32, #tpu.memory_space<vmem>>, %arg7: memref<8x256xf32, #tpu.memory_space<vmem>>) attributes {dimension_semantics = [#tpu.dimension_semantics<parallel>], iteration_bounds = array<i64: 1>, scalar_prefetch = 0 : i64, scratch_operands = 0 : i64, tpu.core_type = #tpu.core_type<tc>, window_params = [{transform_indices = @transform_0, window_bounds = array<i64: 8, 1280>}, {pipeline_mode = #tpu.pipeline_mode<synchronous>, transform_indices = @transform_1, window_bounds = array<i64: 1280, 128>}, {pipeline_mode = #tpu.pipeline_mode<synchronous>, transform_indices = @transform_2, window_bounds = array<i64: 1, 128>}, {pipeline_mode = #tpu.pipeline_mode<synchronous>, transform_indices = @transform_3, window_bounds = array<i64: 128, 256>}, {pipeline_mode = #tpu.pipeline_mode<synchronous>, transform_indices = @transform_4, window_bounds = array<i64: 1, 256>}, {transform_indices = @transform_5, window_bounds = array<i64: 8, 128>}, {transform_indices = @transform_6, window_bounds = array<i64: 8, 256>}]} {
    %c0 = arith.constant 0 : index
    %c0_0 = arith.constant 0 : index
    %0 = vector.load %arg1[%c0, %c0_0] : memref<8x1280xbf16, #tpu.memory_space<vmem>>, vector<8x1280xbf16>
    %c0_1 = arith.constant 0 : index
    %c0_2 = arith.constant 0 : index
    %1 = vector.load %arg2[%c0_1, %c0_2] : memref<1280x128xbf16, #tpu.memory_space<vmem>>, vector<1280x128xbf16>
    %cst = arith.constant dense<0.000000e+00> : vector<8x128xf32>
    %2 = tpu.matmul %0, %1, %cst {dimension_numbers = #tpu.dot_dimension_numbers<[1], [0], [0], [1], [0, 0, 1, 1], [], []>} : vector<8x1280xbf16>, vector<1280x128xbf16>, vector<8x128xf32> -> vector<8x128xf32>
    %c0_3 = arith.constant 0 : index
    %c0_4 = arith.constant 0 : index
    %3 = vector.load %arg3[%c0_3, %c0_4] : memref<1x128xf32, #tpu.memory_space<vmem>>, vector<1x128xf32>
    %4 = vector.broadcast %3 : vector<1x128xf32> to vector<8x128xf32>
    %5 = arith.addf %2, %4 : vector<8x128xf32>
    %c0_5 = arith.constant 0 : index
    %c0_6 = arith.constant 0 : index
    %6 = vector.load %arg6[%c0_5, %c0_6] : memref<8x128xf32, #tpu.memory_space<vmem>>, vector<8x128xf32>
    tpu.vector_store %arg6[%c0_5, %c0_6], %5 {strides = array<i32>} : memref<8x128xf32, #tpu.memory_space<vmem>>, vector<8x128xf32>,
    %7 = arith.truncf %5 : vector<8x128xf32> to vector<8x128xbf16>
    %c0_7 = arith.constant 0 : index
    %c0_8 = arith.constant 0 : index
    %8 = vector.load %arg4[%c0_7, %c0_8] : memref<128x256xbf16, #tpu.memory_space<vmem>>, vector<128x256xbf16>
    %cst_9 = arith.constant dense<0.000000e+00> : vector<8x256xf32>
    %9 = tpu.matmul %7, %8, %cst_9 {dimension_numbers = #tpu.dot_dimension_numbers<[1], [0], [0], [1], [0, 0, 1, 1], [], []>} : vector<8x128xbf16>, vector<128x256xbf16>, vector<8x256xf32> -> vector<8x256xf32>
    %c0_10 = arith.constant 0 : index
    %c0_11 = arith.constant 0 : index
    %10 = vector.load %arg5[%c0_10, %c0_11] : memref<1x256xf32, #tpu.memory_space<vmem>>, vector<1x256xf32>
    %11 = vector.broadcast %10 : vector<1x256xf32> to vector<8x256xf32>
    %12 = arith.addf %9, %11 : vector<8x256xf32>
    %c0_12 = arith.constant 0 : index
    %c0_13 = arith.constant 0 : index
    %13 = vector.load %arg7[%c0_12, %c0_13] : memref<8x256xf32, #tpu.memory_space<vmem>>, vector<8x256xf32>
    tpu.vector_store %arg7[%c0_12, %c0_13], %12 {strides = array<i32>} : memref<8x256xf32, #tpu.memory_space<vmem>>, vector<8x256xf32>,
    return
  }
  func.func @transform_0(%arg0: i32) -> (i32, i32) {
    %c0_i32 = arith.constant 0 : i32
    %c0_i32_0 = arith.constant 0 : i32
    return %arg0, %c0_i32 : i32, i32
  }
  func.func @transform_1(%arg0: i32) -> (i32, i32) {
    %c0_i32 = arith.constant 0 : i32
    %c0_i32_0 = arith.constant 0 : i32
    %c0_i32_1 = arith.constant 0 : i32
    return %c0_i32, %c0_i32_0 : i32, i32
  }
  func.func @transform_2(%arg0: i32) -> (i32, i32) {
    %c0_i32 = arith.constant 0 : i32
    %c0_i32_0 = arith.constant 0 : i32
    %c0_i32_1 = arith.constant 0 : i32
    return %c0_i32, %c0_i32_0 : i32, i32
  }
  func.func @transform_3(%arg0: i32) -> (i32, i32) {
    %c0_i32 = arith.constant 0 : i32
    %c0_i32_0 = arith.constant 0 : i32
    %c0_i32_1 = arith.constant 0 : i32
    return %c0_i32, %c0_i32_0 : i32, i32
  }
  func.func @transform_4(%arg0: i32) -> (i32, i32) {
    %c0_i32 = arith.constant 0 : i32
    %c0_i32_0 = arith.constant 0 : i32
    %c0_i32_1 = arith.constant 0 : i32
    return %c0_i32, %c0_i32_0 : i32, i32
  }
  func.func @transform_5(%arg0: i32) -> (i32, i32) {
    %c0_i32 = arith.constant 0 : i32
    %c0_i32_0 = arith.constant 0 : i32
    return %arg0, %c0_i32 : i32, i32
  }
  func.func @transform_6(%arg0: i32) -> (i32, i32) {
    %c0_i32 = arith.constant 0 : i32
    %c0_i32_0 = arith.constant 0 : i32
    return %arg0, %c0_i32 : i32, i32
  }
}

</mosaic_0001>

<bundles_post_ra>
// kernel: tile.13
= control target key start
LH: loop header
LB: loop body
LE: loop exit
PB: predicated region body
PF: predicated region fallthrough
CT: control target
= control target key end

     0   :  { %s28_s0 = inlined_call_operand.vmem [shape: f32[20], index: 0, kind: input, shape index: {}]   ;;  %s29_s1 = inlined_call_operand.vmem [shape: f32[16,20], index: 1, kind: output, shape index: {}]  }
   0x1   :  { %v4_v0 = vld [vmem:[%s28_s0] ss:$0 sm:$0xff] }
   0x2   :  { %5 = vst [vmem:[%s29_s1] sm:$0xff] %v4_v0  ;;  %8 = vst [vmem:[%s29_s1 + $0x8] sm:$0xff] %v4_v0 }

// kernel: tile.14
= control target key start
LH: loop header
LB: loop body
LE: loop exit
PB: predicated region body
PF: predicated region fallthrough
CT: control target
= control target key end

     0   :  { %vm9_vm0 = vcmask 64512   ;;  %vm22_vm1 = vcmask 130048   ;;  %s156_s14 = smov 120   ;;  %s157_s15 = smov 100   ;;  %vm3_vm2 = vcmask 162816   ;;  %vm13_vm3 = vcmask 97280   ;;  %s238_s0 = inlined_call_operand.vmem [shape: f32[16,20], index: 0, kind: input, shape index: {}]   ;;  %s239_s1 = inlined_call_operand.vmem [shape: f32[320], index: 1, kind: output, shape index: {}]  }
   0x1   :  { %v124_v0 = vld [vmem:[%s238_s0 + $0x6] sm:$0x1]   ;;  %v128_v3 = vld [vmem:[%s238_s0 + $0x5] sm:$0x1]   ;;  %v126_v4 = vld [vmem:[%s238_s0 + $0xc] sm:$0x1]  }
   0x2   :  { %v125_v1 = vld [vmem:[%s238_s0 + $0x6] sm:$0x1]   ;;  %34 = vrot.lane.b32.xlu1 %v128_v3, %s157_s15  ;;  %v127_v5 = vld [vmem:[%s238_s0 + $0xc] sm:$0x1]   ;;  %v129_v7 = vld [vmem:[%s238_s0 + $0xb] sm:$0x1]  }
   0x3   :  { %v10_v2 = vsel %vm9_vm0, %v125_v1, %v124_v0  ;;  %v23_v6 = vsel %vm22_vm1, %v127_v5, %v126_v4  ;;  %s158_s20 = smov 112   ;;  %s159_s21 = smov 92   ;;  %v130_v8 = vld [vmem:[%s238_s0 + $0x4] sm:$0x1]   ;;  %v131_v9 = vld [vmem:[%s238_s0 + $0xa] sm:$0x1]  }
   0x4   :  { %11 = vrot.lane.b32.xlu0 %v10_v2, %s156_s14  ;;  %v2_v10 = vld [vmem:[%s238_s0] sm:$0x1]   ;;  %s160_s28 = smov 80   ;;  %s161_s29 = smov 72   ;;  %v132_v11 = vld [vmem:[%s238_s0 + $0x3] sm:$0x1]  }
   0x5   :  { %4 = vst.msk [vmem:[#allocation0] sm:$0x1] %vm3_vm2, %v2_v10   ;;  %v133_v12 = vld [vmem:[%s238_s0 + $0x9] sm:$0x1]   ;;  %s162_s5 = smov 60   ;;  %s163_s6 = smov 52  }
   0x6   :  { %40 = vrot.lane.b32.xlu1 %v129_v7, %s159_s21  ;;  %v134_v13 = vld [vmem:[%s238_s0 + $0xf] sm:$0x1]   ;;  %v135_v14 = vld [vmem:[%s238_s0 + $0x2] sm:$0x1]   ;;  %s164_s11 = smov 44   ;;  %s165_s12 = smov 40  }
   0x7   :  { %v136_v15 = vld [vmem:[%s238_s0 + $0x8] sm:$0x1]   ;;  %v137_v16 = vld [vmem:[%s238_s0 + $0xe] sm:$0x1]   ;;  %s166_s17 = smov 32   ;;  %s167_s18 = smov 24  }
   0x8   :  { %24 = vrot.lane.b32.xlu0 %v23_v6, %s158_s20  ;;  %v138_v17 = vld [vmem:[%s238_s0 + $0x1] sm:$0x1]   ;;  %v139_v18 = vld [vmem:[%s238_s0 + $0x7] sm:$0x1]   ;;  %s168_s23 = smov 20   ;;  %s169_s24 = smov 12  }
   0x9   :  { %v140_v19 = vld [vmem:[%s238_s0 + $0xd] sm:$0x1]   ;;  %s170_s0 = smov 4   ;;  %vm16_vm4 = vcmask 1048512   ;;  %vm36_vm5 = vcmask 982816   ;;  %vm26_vm6 = vcmask 31744  }
   0xa   :  { %53 = vrot.lane.b32.xlu1 %v131_v9, %s161_s29  ;;  %vm29_vm7 = vcmask 1048448   ;;  %vm42_vm8 = vcmask 917216   ;;  %vm49_vm9 = vcmask 818816   ;;  %vm55_vm10 = vcmask 753216  }
   0xb   :  { %vm62_vm11 = vcmask 654816   ;;  %vm68_vm12 = vcmask 589216   ;;  %vm75_vm13 = vcmask 523616   ;;  %vm82_vm14 = vcmask 490816  }
   0xc   :  { %47 = vrot.lane.b32.xlu0 %v130_v8, %s160_s28  ;;  %vm88_vm15 = vcmask 425216   ;;  %vm95_vm0 = vcmask 359616   ;;  %vm102_vm1 = vcmask 326816   ;;  %vm108_vm2 = vcmask 261216  }
   0xe   :  { %66 = vrot.lane.b32.xlu1 %v133_v12, %s163_s6 }
  0x10   :  { %60 = vrot.lane.b32.xlu0 %v132_v11, %s162_s5 }
  0x12   :  { %80 = vrot.lane.b32.xlu1 %v135_v14, %s165_s12 }
  0x14   :  { %73 = vrot.lane.b32.xlu0 %v134_v13, %s164_s11 }
  0x16   :  { %93 = vrot.lane.b32.xlu1 %v137_v16, %s167_s18 }
  0x18   :  { %86 = vrot.lane.b32.xlu0 %v136_v15, %s166_s17 }
  0x1a   :  { %106 = vrot.lane.b32.xlu1 %v139_v18, %s169_s24 }
  0x1c   :  { %100 = vrot.lane.b32.xlu0 %v138_v17, %s168_s23 }
  0x20   :  { %113 = vrot.lane.b32.xlu0 %v140_v19, %s170_s0 }
  0x74   :  { %v35_v21 = vpop.permute.xlu1 %34  }
  0x76   :  { %v12_v20 = vpop.permute.xlu0 %11  }
  0x77   :  { %15 = vst.msk [vmem:[#allocation0 + $0x1] sm:$0x1] %vm13_vm3, %v12_v20   ;;  %vm115_vm3 = vcmask 195616  }
  0x78   :  { %17 = vst.msk [vmem:[#allocation0] sm:$0x1] %vm16_vm4, %v12_v20   ;;  %v41_v23 = vpop.permute.xlu1 %40  }
  0x79   :  { %37 = vst.msk [vmem:[#allocation0] sm:$0x1] %vm36_vm5, %v35_v21  }
  0x7a   :  { %v25_v22 = vpop.permute.xlu0 %24  }
  0x7b   :  { %28 = vst.msk [vmem:[#allocation0 + $0x2] sm:$0x1] %vm26_vm6, %v25_v22  }
  0x7c   :  { %31 = vst.msk [vmem:[#allocation0 + $0x1] sm:$0x1] %vm29_vm7, %v25_v22   ;;  %v54_v25 = vpop.permute.xlu1 %53  }
  0x7d   :  { %44 = vst.msk [vmem:[#allocation0 + $0x1] sm:$0x1] %vm42_vm8, %v41_v23  }
  0x7e   :  { %v48_v24 = vpop.permute.xlu0 %47   ;;  %57 = vst.msk [vmem:[#allocation0 + $0x1] sm:$0x1] %vm55_vm10, %v54_v25  }
  0x7f   :  { %50 = vst.msk [vmem:[#allocation0] sm:$0x1] %vm49_vm9, %v48_v24  }
  0x80   :  { %v67_v27 = vpop.permute.xlu1 %66  }
  0x81   :  { %70 = vst.msk [vmem:[#allocation0 + $0x1] sm:$0x1] %vm68_vm12, %v67_v27  }
  0x82   :  { %v61_v26 = vpop.permute.xlu0 %60  }
  0x83   :  { %63 = vst.msk [vmem:[#allocation0] sm:$0x1] %vm62_vm11, %v61_v26  }
  0x84   :  { %v81_v29 = vpop.permute.xlu1 %80  }
  0x85   :  { %83 = vst.msk [vmem:[#allocation0] sm:$0x1] %vm82_vm14, %v81_v29  }
  0x86   :  { %v74_v28 = vpop.permute.xlu0 %73  }
  0x87   :  { %77 = vst.msk [vmem:[#allocation0 + $0x2] sm:$0x1] %vm75_vm13, %v74_v28  }
  0x88   :  { %v94_v31 = vpop.permute.xlu1 %93  }
  0x89   :  { %97 = vst.msk [vmem:[#allocation0 + $0x2] sm:$0x1] %vm95_vm0, %v94_v31  }
  0x8a   :  { %v87_v30 = vpop.permute.xlu0 %86  }
  0x8b   :  { %90 = vst.msk [vmem:[#allocation0 + $0x1] sm:$0x1] %vm88_vm15, %v87_v30  }
  0x8c   :  { %v107_v33 = vpop.permute.xlu1 %106  }
  0x8d   :  { %110 = vst.msk [vmem:[#allocation0 + $0x1] sm:$0x1] %vm108_vm2, %v107_v33  }
  0x8e   :  { %v101_v32 = vpop.permute.xlu0 %100  }
  0x8f   :  { %103 = vst.msk [vmem:[#allocation0] sm:$0x1] %vm102_vm1, %v101_v32  }
  0x92   :  { %v114_v34 = vpop.permute.xlu0 %113  }
  0x93   :  { %117 = vst.msk [vmem:[#allocation0 + $0x2] sm:$0x1] %vm115_vm3, %v114_v34  }
  0x9a   :  { %v121_v35 = vld [vmem:[#allocation0] sm:$0xf] }
  0x9b   :  { %123 = vst [vmem:[%s239_s1] sm:$0xf] %v121_v35 }

// kernel: tile.0
= control target key start
LH: loop header
LB: loop body
LE: loop exit
PB: predicated region body
PF: predicated region fallthrough
CT: control target
= control target key end

     0   :  { %s1089_s12 = smov 3  ;;  %s1100_s19 = smov 3  ;;  %vm379_vm0 = vcmask 64512   ;;  %vm325_vm1 = vcmask 1043458   ;;  %vm329_vm2 = vcmask 1045508   ;;  %vm333_vm3 = vcmask 1047558   ;;  %s1234_s0 = inlined_call_operand.vmem [shape: bf16[16,20,10], index: 0, kind: input, shape index: {}]   ;;  %s1235_s1 = inlined_call_operand.vmem [shape: bf16[320,10], index: 1, kind: output, shape index: {}]  }
   0x1   :  { %v1029_v0 = vld [vmem:[%s1234_s0 + $0x48] sm:$0xff]   ;;  %v1030_v1 = vld [vmem:[%s1234_s0 + $0x40] sm:$0xff]   ;;  %v1031_v2 = vld [vmem:[%s1234_s0 + $0x38] sm:$0xff]   ;;  %s1111_s26 = smov 3  ;;  %s1118_s29 = smov 3  ;;  %vm442_vm4 = vcmask 130048  }
   0x2   :  { %v976_v3 = vunpack.c.l.bf16 %v1029_v0  ;;  %v980_v4 = vunpack.c.l.bf16 %v1030_v1  ;;  %v984_v5 = vunpack.c.l.bf16 %v1031_v2  ;;  %v1032_v6 = vld [vmem:[%s1234_s0 + $0x30] sm:$0xff]   ;;  %v977_v7 = vunpack.c.h.bf16 %v1029_v0  ;;  %v1033_v8 = vld [vmem:[%s1234_s0 + $0x28] sm:$0xff]   ;;  %v1034_v9 = vld [vmem:[%s1234_s0 + $0x20] sm:$0xff]   ;;  %s1120_s30 = smov 12  ;;  %s1122_s2 = smov 48 }
   0x3   :  { %v988_v10 = vunpack.c.l.bf16 %v1032_v6  ;;  %v981_v11 = vunpack.c.h.bf16 %v1030_v1  ;;  %v985_v12 = vunpack.c.h.bf16 %v1031_v2  ;;  %v989_v13 = vunpack.c.h.bf16 %v1032_v6  ;;  %v1035_v14 = vld [vmem:[%s1234_s0 + $0x18] sm:$0xff]   ;;  %v1036_v15 = vld [vmem:[%s1234_s0 + $0x10] sm:$0xff]   ;;  %v1037_v16 = vld [vmem:[%s1234_s0 + $0x8] sm:$0xff]   ;;  %s1124_s3 = smov 192  ;;  %s457_s4 = smov 3 }
   0x4   :  { %36 = vst [vmem:[#allocation1 + $0x90] sm:$0xff] %v976_v3  ;;  %68 = vst [vmem:[#allocation1 + $0x80] sm:$0xff] %v980_v4  ;;  %v992_v17 = vunpack.c.l.bf16 %v1033_v8  ;;  %v996_v18 = vunpack.c.l.bf16 %v1034_v9  ;;  %v1000_v19 = vunpack.c.l.bf16 %v1035_v14  ;;  %v1004_v20 = vunpack.c.l.bf16 %v1036_v15  ;;  %v1011_v21 = vld [vmem:[%s1234_s0] sm:$0xff]   ;;  %s1116_s0 = smov 3  ;;  %s460_s5 = smov 3 }
   0x5   :  { %100 = vst [vmem:[#allocation1 + $0x70] sm:$0xff] %v984_v5  ;;  %20 = vst [vmem:[#allocation1 + $0x98] sm:$0xff] %v977_v7  ;;  %v1008_v22 = vunpack.c.l.bf16 %v1037_v16  ;;  %v1012_v23 = vunpack.c.l.bf16 %v1011_v21  ;;  %v993_v24 = vunpack.c.h.bf16 %v1033_v8  ;;  %v997_v25 = vunpack.c.h.bf16 %v1034_v9  ;;  %s503_s6 = smov 3  ;;  %s1126_s7 = smov 12 }
   0x6   :  { %132 = vst [vmem:[#allocation1 + $0x60] sm:$0xff] %v988_v10  ;;  %52 = vst [vmem:[#allocation1 + $0x88] sm:$0xff] %v981_v11  ;;  %v1001_v26 = vunpack.c.h.bf16 %v1035_v14  ;;  %v1005_v27 = vunpack.c.h.bf16 %v1036_v15  ;;  %v1009_v28 = vunpack.c.h.bf16 %v1037_v16  ;;  %v1013_v29 = vunpack.c.h.bf16 %v1011_v21  ;;  %s1128_s8 = smov 48  ;;  %s1130_s9 = smov 192 }
   0x7   :  { %84 = vst [vmem:[#allocation1 + $0x78] sm:$0xff] %v985_v12  ;;  %116 = vst [vmem:[#allocation1 + $0x68] sm:$0xff] %v989_v13  ;;  %s407_s10 = smov 3  ;;  %s410_s11 = smov 12  ;;  %vm335_vm5 = vcmask 162816   ;;  %vm383_vm6 = vcmask 97280  }
   0x8   :  { %164 = vst [vmem:[#allocation1 + $0x50] sm:$0xff] %v992_v17  ;;  %196 = vst [vmem:[#allocation1 + $0x40] sm:$0xff] %v996_v18  ;;  %s415_s13 = smov 48  ;;  %s420_s14 = smov 192  ;;  %vm388_vm7 = vcmask 1048512   ;;  %vm492_vm8 = vcmask 982816  }
   0x9   :  { %228 = vst [vmem:[#allocation1 + $0x30] sm:$0xff] %v1000_v19  ;;  %260 = vst [vmem:[#allocation1 + $0x20] sm:$0xff] %v1004_v20  ;;  %s1056_s15 = smov 120   ;;  %s425_s16 = smov 3  ;;  %vm446_vm9 = vcmask 31744   ;;  %vm451_vm10 = vcmask 1048448  }
   0xa   :  { %292 = vst [vmem:[#allocation1 + $0x10] sm:$0xff] %v1008_v22  ;;  %320 = vst [vmem:[#allocation1] sm:$0xff] %v1012_v23  ;;  %s428_s17 = smov 12  ;;  %s1057_s18 = smov 92   ;;  %vm522_vm11 = vcmask 917216   ;;  %vm555_vm12 = vcmask 818816  }
   0xb   :  { %148 = vst [vmem:[#allocation1 + $0x58] sm:$0xff] %v993_v24  ;;  %180 = vst [vmem:[#allocation1 + $0x48] sm:$0xff] %v997_v25  ;;  %v496_v30 = vld [vmem:[#allocation1 + $0x85] ss:$16 sm:%s1089_s12]   ;;  %v395_v31 = vld [vmem:[#allocation1 + $0x86] ss:$16 sm:%s1111_s26]  }
   0xc   :  { %212 = vst [vmem:[#allocation1 + $0x38] sm:$0xff] %v1001_v26  ;;  %244 = vst [vmem:[#allocation1 + $0x28] sm:$0xff] %v1005_v27  ;;  %s1055_s12 = smov 100   ;;  %s438_s20 = smov 192  ;;  %vm585_vm13 = vcmask 753216   ;;  %vm618_vm14 = vcmask 654816  }
   0xd   :  { %276 = vst [vmem:[#allocation1 + $0x18] sm:$0xff] %v1009_v28  ;;  %307 = vst [vmem:[#allocation1 + $0x8] sm:$0xff] %v1013_v29  ;;  %497 = vrot.lane.b32.xlu1 %v496_v30, %s1055_s12  ;;  %v392_v32 = vld [vmem:[#allocation1 + $0x66] ss:$16 sm:%s1100_s19]   ;;  %v504_v37 = vld [vmem:[#allocation1 + $0x8b] ss:$16 sm:%s503_s6]  }
   0xe   :  { %v529_v33 = vld [vmem:[#allocation1 + $0x6b] ss:$16 sm:%s1116_s0]   ;;  %v397_v34 = vsel %vm379_vm0, %v395_v31, %v392_v32  ;;  %v458_v35 = vld [vmem:[#allocation1 + $0x6c] ss:$16 sm:%s457_s4]   ;;  %s433_s19 = smov 48  ;;  %s344_s21 = smov 3 }
   0xf   :  { %v461_v36 = vld [vmem:[#allocation1 + $0x6c] ss:$16 sm:%s460_s5]   ;;  %398 = vrot.lane.b32.xlu0 %v397_v34, %s1056_s15  ;;  %s347_s22 = smov 12  ;;  %s1058_s23 = smov 112   ;;  %v345_v1 = vld [vmem:[#allocation1 + $0x86] ss:$16 sm:%s344_s21]  }
  0x10   :  { %v408_v43 = vld [vmem:[#allocation1 + $0x8c] ss:$16 sm:%s407_s10]   ;;  %v463_v49 = vsel %vm442_vm4, %v461_v36, %v458_v35  ;;  %s352_s24 = smov 48  ;;  %s357_s25 = smov 192  ;;  %vm648_vm15 = vcmask 589216  }
  0x11   :  { %v474_v38 = vld [vmem:[#allocation1 + $0x5] ss:$16 sm:%s1118_s29]   ;;  %530 = vrot.lane.b32.xlu1 %v529_v33, %s1057_s18  ;;  %v426_v56 = vld [vmem:[#allocation1 + $0x8c] ss:$16 sm:%s425_s16]   ;;  %v348_v2 = vld [vmem:[#allocation1 - $0x1a] ss:$16 sm:%s347_s22]  }
  0x12   :  { %v477_v39 = vld [vmem:[#allocation1 + $0x5] ss:$16 sm:%s1120_s30]   ;;  %v350_v4 = vsel %vm325_vm1, %v348_v2, %v345_v1  ;;  %v353_v5 = vld [vmem:[#allocation1 - $0x1a] ss:$16 sm:%s352_s24]   ;;  %s362_s26 = smov 3  ;;  %s365_s27 = smov 12 }
  0x13   :  { %v482_v40 = vld [vmem:[#allocation1 + $0x5] ss:$16 sm:%s1122_s2]   ;;  %v479_v41 = vsel %vm325_vm1, %v477_v39, %v474_v38  ;;  %v358_v6 = vld [vmem:[#allocation1 - $0x1a] ss:$16 sm:%s357_s25]   ;;  %v355_v8 = vsel %vm329_vm2, %v353_v5, %v350_v4  ;;  %s370_s28 = smov 48  ;;  %s375_s0 = smov 192 }
  0x14   :  { %v487_v42 = vld [vmem:[#allocation1 + $0x5] ss:$16 sm:%s1124_s3]   ;;  %v484_v44 = vsel %vm329_vm2, %v482_v40, %v479_v41  ;;  %v507_v45 = vld [vmem:[#allocation1 - $0x15] ss:$16 sm:%s1126_s7]   ;;  %v411_v51 = vld [vmem:[#allocation1 - $0x14] ss:$16 sm:%s410_s11]   ;;  %v360_v11 = vsel %vm333_vm3, %v358_v6, %v355_v8 }
  0x15   :  { %v512_v46 = vld [vmem:[#allocation1 - $0x15] ss:$16 sm:%s1128_s8]   ;;  %v489_v48 = vsel %vm333_vm3, %v487_v42, %v484_v44  ;;  %v509_v50 = vsel %vm325_vm1, %v507_v45, %v504_v37  ;;  %v416_v52 = vld [vmem:[#allocation1 - $0x14] ss:$16 sm:%s415_s13]   ;;  %v413_v55 = vsel %vm325_vm1, %v411_v51, %v408_v43  ;;  %464 = vrot.lane.b32.xlu1 %v463_v49, %s1058_s23  ;;  %v363_v9 = vld [vmem:[#allocation1 + $0x6] ss:$16 sm:%s362_s26]  }
  0x16   :  { %v517_v47 = vld [vmem:[#allocation1 - $0x15] ss:$16 sm:%s1130_s9]   ;;  %v421_v53 = vld [vmem:[#allocation1 - $0x14] ss:$16 sm:%s420_s14]   ;;  %490 = vrot.lane.b32.xlu0 %v489_v48, %s1055_s12  ;;  %v514_v54 = vsel %vm329_vm2, %v512_v46, %v509_v50  ;;  %v418_v59 = vsel %vm329_vm2, %v416_v52, %v413_v55  ;;  %v366_v10 = vld [vmem:[#allocation1 + $0x6] ss:$16 sm:%s365_s27]  }
  0x17   :  { %v429_v57 = vld [vmem:[#allocation1 - $0x14] ss:$16 sm:%s428_s17]   ;;  %v519_v58 = vsel %vm333_vm3, %v517_v47, %v514_v54  ;;  %v423_v63 = vsel %vm333_vm3, %v421_v53, %v418_v59  ;;  %v368_v12 = vsel %vm325_vm1, %v366_v10, %v363_v9  ;;  %v371_v13 = vld [vmem:[#allocation1 + $0x6] ss:$16 sm:%s370_s28]   ;;  %s558_s29 = smov 3  ;;  %s536_s30 = smov 3 }
  0x18   :  { %v431_v60 = vsel %vm325_vm1, %v429_v57, %v426_v56  ;;  %v434_v61 = vld [vmem:[#allocation1 - $0x14] ss:$16 sm:%s433_s19]   ;;  %v376_v14 = vld [vmem:[#allocation1 + $0x6] ss:$16 sm:%s375_s0]   ;;  %v373_v15 = vsel %vm329_vm2, %v371_v13, %v368_v12  ;;  %v559_v16 = vld [vmem:[#allocation1 + $0x84] ss:$16 sm:%s558_s29]  }
  0x19   :  { %v439_v62 = vld [vmem:[#allocation1 - $0x14] ss:$16 sm:%s438_s20]   ;;  %v436_v0 = vsel %vm329_vm2, %v434_v61, %v431_v60  ;;  %s539_s2 = smov 12  ;;  %v378_v17 = vsel %vm333_vm3, %v376_v14, %v373_v15  ;;  %v537_v18 = vld [vmem:[#allocation1 + $0x4] ss:$16 sm:%s536_s30]   ;;  %s544_s3 = smov 48 }
  0x1a   :  { %v441_v3 = vsel %vm333_vm3, %v439_v62, %v436_v0  ;;  %520 = vrot.lane.b32.xlu0 %v519_v58, %s1057_s18  ;;  %v540_v19 = vld [vmem:[#allocation1 + $0x4] ss:$16 sm:%s539_s2]   ;;  %s549_s4 = smov 192  ;;  %v380_v20 = vsel %vm379_vm0, %v378_v17, %v360_v11  ;;  %s591_s5 = smov 3  ;;  %vm681_vm0 = vcmask 523616  }
  0x1b   :  { %v443_v7 = vsel %vm442_vm4, %v441_v3, %v423_v63  ;;  %v542_v21 = vsel %vm325_vm1, %v540_v19, %v537_v18  ;;  %v545_v22 = vld [vmem:[#allocation1 + $0x4] ss:$16 sm:%s544_s3]   ;;  %v592_v25 = vld [vmem:[#allocation1 + $0x6a] ss:$16 sm:%s591_s5]   ;;  %s566_s6 = smov 3  ;;  %s569_s7 = smov 12 }
  0x1c   :  { %444 = vrot.lane.b32.xlu1 %v443_v7, %s1058_s23  ;;  %v550_v23 = vld [vmem:[#allocation1 + $0x4] ss:$16 sm:%s549_s4]   ;;  %v547_v24 = vsel %vm329_vm2, %v545_v22, %v542_v21  ;;  %s1059_s8 = smov 80   ;;  %v567_v27 = vld [vmem:[#allocation1 + $0x8a] ss:$16 sm:%s566_s6]   ;;  %s574_s9 = smov 48 }
  0x1d   :  { %v552_v26 = vsel %vm333_vm3, %v550_v23, %v547_v24  ;;  %v570_v28 = vld [vmem:[#allocation1 - $0x16] ss:$16 sm:%s569_s7]   ;;  %s579_s10 = smov 192  ;;  %s621_s11 = smov 3  ;;  %vm810_vm4 = vcmask 326816  }
  0x1e   :  { %381 = vrot.lane.b32.xlu0 %v380_v20, %s1056_s15  ;;  %v572_v29 = vsel %vm325_vm1, %v570_v28, %v567_v27  ;;  %v575_v30 = vld [vmem:[#allocation1 - $0x16] ss:$16 sm:%s574_s9]   ;;  %s599_s12 = smov 3  ;;  %s602_s13 = smov 12  ;;  %v622_v38 = vld [vmem:[#allocation1 + $0x83] ss:$16 sm:%s621_s11]  }
  0x1f   :  { %v580_v31 = vld [vmem:[#allocation1 - $0x16] ss:$16 sm:%s579_s10]   ;;  %v577_v32 = vsel %vm329_vm2, %v575_v30, %v572_v29  ;;  %v600_v33 = vld [vmem:[#allocation1 + $0x3] ss:$16 sm:%s599_s12]   ;;  %s607_s14 = smov 48  ;;  %s612_s15 = smov 192 }
  0x20   :  { %560 = vrot.lane.b32.xlu1 %v559_v16, %s1059_s8  ;;  %v603_v34 = vld [vmem:[#allocation1 + $0x3] ss:$16 sm:%s602_s13]   ;;  %s1060_s16 = smov 72   ;;  %v582_v35 = vsel %vm333_vm3, %v580_v31, %v577_v32  ;;  %s654_s17 = smov 3 }
  0x21   :  { %v605_v36 = vsel %vm325_vm1, %v603_v34, %v600_v33  ;;  %v608_v37 = vld [vmem:[#allocation1 + $0x3] ss:$16 sm:%s607_s14]   ;;  %s629_s18 = smov 3  ;;  %s632_s19 = smov 12  ;;  %v655_v46 = vld [vmem:[#allocation1 + $0x69] ss:$16 sm:%s654_s17]  }
  0x22   :  { %553 = vrot.lane.b32.xlu0 %v552_v26, %s1059_s8  ;;  %v610_v39 = vsel %vm329_vm2, %v608_v37, %v605_v36  ;;  %v613_v40 = vld [vmem:[#allocation1 + $0x3] ss:$16 sm:%s612_s15]   ;;  %v630_v41 = vld [vmem:[#allocation1 + $0x89] ss:$16 sm:%s629_s18]   ;;  %s637_s20 = smov 48  ;;  %s642_s21 = smov 192 }
  0x23   :  { %v633_v42 = vld [vmem:[#allocation1 - $0x17] ss:$16 sm:%s632_s19]   ;;  %s1061_s22 = smov 60   ;;  %v615_v45 = vsel %vm333_vm3, %v613_v40, %v610_v39  ;;  %s662_s23 = smov 3 }
  0x24   :  { %593 = vrot.lane.b32.xlu1 %v592_v25, %s1060_s16  ;;  %v635_v43 = vsel %vm325_vm1, %v633_v42, %v630_v41  ;;  %v638_v44 = vld [vmem:[#allocation1 - $0x17] ss:$16 sm:%s637_s20]   ;;  %s665_s24 = smov 12  ;;  %v663_v49 = vld [vmem:[#allocation1 + $0x8f] ss:$16 sm:%s662_s23]   ;;  %s670_s25 = smov 48 }
  0x25   :  { %v643_v47 = vld [vmem:[#allocation1 - $0x17] ss:$16 sm:%s642_s21]   ;;  %v640_v48 = vsel %vm329_vm2, %v638_v44, %v635_v43  ;;  %v666_v50 = vld [vmem:[#allocation1 - $0x11] ss:$16 sm:%s665_s24]   ;;  %s687_s26 = smov 3  ;;  %s675_s27 = smov 192 }
  0x26   :  { %583 = vrot.lane.b32.xlu0 %v582_v35, %s1060_s16  ;;  %v668_v51 = vsel %vm325_vm1, %v666_v50, %v663_v49  ;;  %v671_v52 = vld [vmem:[#allocation1 - $0x11] ss:$16 sm:%s670_s25]   ;;  %s695_s28 = smov 3  ;;  %s698_s0 = smov 12  ;;  %v645_v53 = vsel %vm333_vm3, %v643_v47, %v640_v48 }
  0x27   :  { %s1062_s29 = smov 52   ;;  %v696_v54 = vld [vmem:[#allocation1 + $0x2] ss:$16 sm:%s695_s28]   ;;  %s703_s30 = smov 48  ;;  %v688_v56 = vld [vmem:[#allocation1 + $0x6f] ss:$16 sm:%s687_s26]   ;;  %v673_v57 = vsel %vm329_vm2, %v671_v52, %v668_v51 }
  0x28   :  { %623 = vrot.lane.b32.xlu1 %v622_v38, %s1061_s22  ;;  %v699_v55 = vld [vmem:[#allocation1 + $0x2] ss:$16 sm:%s698_s0]   ;;  %v676_v58 = vld [vmem:[#allocation1 - $0x11] ss:$16 sm:%s675_s27]   ;;  %s717_s2 = smov 3  ;;  %s708_s3 = smov 192 }
  0x29   :  { %v701_v59 = vsel %vm325_vm1, %v699_v55, %v696_v54  ;;  %v704_v60 = vld [vmem:[#allocation1 + $0x2] ss:$16 sm:%s703_s30]   ;;  %s725_s4 = smov 3  ;;  %s728_s5 = smov 12  ;;  %v678_v63 = vsel %vm333_vm3, %v676_v58, %v673_v57 }
  0x2a   :  { %616 = vrot.lane.b32.xlu0 %v615_v45, %s1061_s22  ;;  %v726_v61 = vld [vmem:[#allocation1 + $0x88] ss:$16 sm:%s725_s4]   ;;  %s733_s6 = smov 48  ;;  %s1063_s7 = smov 44   ;;  %v718_v0 = vld [vmem:[#allocation1 + $0x82] ss:$16 sm:%s717_s2]   ;;  %v706_v1 = vsel %vm329_vm2, %v704_v60, %v701_v59 }
  0x2b   :  { %v729_v62 = vld [vmem:[#allocation1 - $0x18] ss:$16 sm:%s728_s5]   ;;  %v709_v2 = vld [vmem:[#allocation1 + $0x2] ss:$16 sm:%s708_s3]   ;;  %s758_s8 = smov 3  ;;  %s761_s9 = smov 12 }
  0x2c   :  { %656 = vrot.lane.b32.xlu1 %v655_v46, %s1062_s29  ;;  %s750_s10 = smov 3  ;;  %v731_v3 = vsel %vm325_vm1, %v729_v62, %v726_v61  ;;  %v734_v4 = vld [vmem:[#allocation1 - $0x18] ss:$16 sm:%s733_s6]   ;;  %s738_s11 = smov 192  ;;  %v759_v5 = vld [vmem:[#allocation1 + $0x8e] ss:$16 sm:%s758_s8]   ;;  %v711_v7 = vsel %vm333_vm3, %v709_v2, %v706_v1 }
  0x2d   :  { %v762_v6 = vld [vmem:[#allocation1 - $0x12] ss:$16 sm:%s761_s9]   ;;  %s766_s12 = smov 48  ;;  %s1064_s13 = smov 40   ;;  %v751_v8 = vld [vmem:[#allocation1 + $0x68] ss:$16 sm:%s750_s10]   ;;  %v736_v9 = vsel %vm329_vm2, %v734_v4, %v731_v3 }
  0x2e   :  { %646 = vrot.lane.b32.xlu0 %v645_v53, %s1062_s29  ;;  %s791_s14 = smov 3  ;;  %s794_s15 = smov 12  ;;  %v739_v10 = vld [vmem:[#allocation1 - $0x18] ss:$16 sm:%s738_s11]   ;;  %v764_v11 = vsel %vm325_vm1, %v762_v6, %v759_v5  ;;  %v767_v12 = vld [vmem:[#allocation1 - $0x12] ss:$16 sm:%s766_s12]  }
  0x2f   :  { %s783_s16 = smov 3  ;;  %s771_s17 = smov 192  ;;  %v792_v13 = vld [vmem:[#allocation1 + $0x1] ss:$16 sm:%s791_s14]   ;;  %v741_v15 = vsel %vm333_vm3, %v739_v10, %v736_v9  ;;  %v769_v17 = vsel %vm329_vm2, %v767_v12, %v764_v11 }
  0x30   :  { %689 = vrot.lane.b32.xlu1 %v688_v56, %s1063_s7  ;;  %s813_s18 = smov 3  ;;  %v795_v14 = vld [vmem:[#allocation1 + $0x1] ss:$16 sm:%s794_s15]   ;;  %s799_s19 = smov 48  ;;  %v784_v16 = vld [vmem:[#allocation1 + $0x6e] ss:$16 sm:%s783_s16]  }
  0x31   :  { %s1065_s20 = smov 32   ;;  %s821_s21 = smov 3  ;;  %v772_v18 = vld [vmem:[#allocation1 - $0x12] ss:$16 sm:%s771_s17]   ;;  %v797_v19 = vsel %vm325_vm1, %v795_v14, %v792_v13  ;;  %v800_v20 = vld [vmem:[#allocation1 + $0x1] ss:$16 sm:%s799_s19]  }
  0x32   :  { %679 = vrot.lane.b32.xlu0 %v678_v63, %s1063_s7  ;;  %s824_s22 = smov 12  ;;  %s804_s23 = smov 192  ;;  %v814_v21 = vld [vmem:[#allocation1 + $0x81] ss:$16 sm:%s813_s18]   ;;  %v822_v22 = vld [vmem:[#allocation1 + $0x87] ss:$16 sm:%s821_s21]   ;;  %v774_v24 = vsel %vm333_vm3, %v772_v18, %v769_v17  ;;  %v802_v27 = vsel %vm329_vm2, %v800_v20, %v797_v19 }
  0x33   :  { %s829_s24 = smov 48  ;;  %s854_s25 = smov 3  ;;  %v825_v23 = vld [vmem:[#allocation1 - $0x19] ss:$16 sm:%s824_s22]   ;;  %v805_v25 = vld [vmem:[#allocation1 + $0x1] ss:$16 sm:%s804_s23]  }
  0x34   :  { %719 = vrot.lane.b32.xlu1 %v718_v0, %s1064_s13  ;;  %s1195_s26 = smov 3  ;;  %s857_s27 = smov 12  ;;  %v830_v26 = vld [vmem:[#allocation1 - $0x19] ss:$16 sm:%s829_s24]   ;;  %v855_v28 = vld [vmem:[#allocation1 + $0x8d] ss:$16 sm:%s854_s25]   ;;  %v827_v31 = vsel %vm325_vm1, %v825_v23, %v822_v22  ;;  %v807_v37 = vsel %vm333_vm3, %v805_v25, %v802_v27 }
  0x35   :  { %s1066_s28 = smov 24   ;;  %s338_s0 = smov 3  ;;  %v858_v34 = vld [vmem:[#allocation1 - $0x13] ss:$16 sm:%s857_s27]   ;;  %v847_v39 = vld [vmem:[#allocation1 + $0x67] ss:$16 sm:%s1195_s26]   ;;  %v832_v40 = vsel %vm329_vm2, %v830_v26, %v827_v31 }
  0x36   :  { %712 = vrot.lane.b32.xlu0 %v711_v7, %s1064_s13  ;;  %s321_s29 = smov 3  ;;  %v339_v29 = vld [vmem:[#allocation1 + $0x80] ss:$16 sm:%s338_s0]   ;;  %s323_s30 = smov 12  ;;  %v860_v43 = vsel %vm325_vm1, %v858_v34, %v855_v28 }
  0x37   :  { %v322_v30 = vld [vmem:[#allocation1] ss:$16 sm:%s321_s29]   ;;  %s327_s2 = smov 48  ;;  %s834_s3 = smov 192  ;;  %342 = vst.msk [vmem:[#allocation0 + $0x18] sm:$0x3] %vm335_vm5, %v339_v29  }
  0x38   :  { %752 = vrot.lane.b32.xlu1 %v751_v8, %s1065_s20  ;;  %v324_v32 = vld [vmem:[#allocation1] ss:$16 sm:%s323_s30]   ;;  %s331_s4 = smov 192  ;;  %s862_s5 = smov 48  ;;  %v835_v41 = vld [vmem:[#allocation1 - $0x19] ss:$16 sm:%s834_s3]  }
  0x39   :  { %v328_v33 = vld [vmem:[#allocation1] ss:$16 sm:%s327_s2]   ;;  %v326_v35 = vsel %vm325_vm1, %v324_v32, %v322_v30  ;;  %s1067_s6 = smov 20   ;;  %s879_s7 = smov 3  ;;  %v863_v44 = vld [vmem:[#allocation1 - $0x13] ss:$16 sm:%s862_s5]   ;;  %v837_v45 = vsel %vm333_vm3, %v835_v41, %v832_v40 }
  0x3a   :  { %742 = vrot.lane.b32.xlu0 %v741_v15, %s1065_s20  ;;  %v332_v36 = vld [vmem:[#allocation1] ss:$16 sm:%s331_s4]   ;;  %v330_v38 = vsel %vm329_vm2, %v328_v33, %v326_v35  ;;  %s867_s8 = smov 192  ;;  %s1068_s9 = smov 12   ;;  %v880_v46 = vld [vmem:[#allocation1 + $0x6d] ss:$16 sm:%s879_s7]   ;;  %v865_v47 = vsel %vm329_vm2, %v863_v44, %v860_v43 }
  0x3b   :  { %v334_v42 = vsel %vm333_vm3, %v332_v36, %v330_v38  ;;  %v868_v48 = vld [vmem:[#allocation1 - $0x13] ss:$16 sm:%s867_s8]   ;;  %s1069_s10 = smov 4   ;;  %vm714_vm1 = vcmask 490816   ;;  %vm744_vm2 = vcmask 425216  }
  0x3c   :  { %785 = vrot.lane.b32.xlu1 %v784_v16, %s1066_s28  ;;  %336 = vst.msk [vmem:[#allocation0] sm:$0xff] %vm335_vm5, %v334_v42   ;;  %v870_v49 = vsel %vm333_vm3, %v868_v48, %v865_v47  ;;  %vm777_vm3 = vcmask 359616   ;;  %vm840_vm5 = vcmask 261216  }
  0x3e   :  { %775 = vrot.lane.b32.xlu0 %v774_v24, %s1066_s28 }
  0x40   :  { %815 = vrot.lane.b32.xlu1 %v814_v21, %s1067_s6 }
  0x42   :  { %808 = vrot.lane.b32.xlu0 %v807_v37, %s1067_s6 }
  0x44   :  { %848 = vrot.lane.b32.xlu1 %v847_v39, %s1068_s9 }
  0x46   :  { %838 = vrot.lane.b32.xlu0 %v837_v45, %s1068_s9 }
  0x48   :  { %881 = vrot.lane.b32.xlu1 %v880_v46, %s1069_s10 }
  0x4a   :  { %871 = vrot.lane.b32.xlu0 %v870_v49, %s1069_s10 }
  0x7f   :  { %v498_v50 = vpop.permute.xlu1 %497  }
  0x81   :  { %v399_v51 = vpop.permute.xlu0 %398  }
  0x82   :  { %402 = vst.msk [vmem:[#allocation0 + $0xe] sm:$0x3] %vm383_vm6, %v399_v51  }
  0x83   :  { %405 = vst.msk [vmem:[#allocation0 + $0x18] sm:$0x3] %vm388_vm7, %v399_v51   ;;  %v531_v52 = vpop.permute.xlu1 %530  }
  0x84   :  { %501 = vst.msk [vmem:[#allocation0 + $0x18] sm:$0x3] %vm492_vm8, %v498_v50  }
  0x87   :  { %v465_v54 = vpop.permute.xlu1 %464  }
  0x88   :  { %v491_v53 = vpop.permute.xlu0 %490   ;;  %468 = vst.msk [vmem:[#allocation0 + $0x16] sm:$0x3] %vm446_vm9, %v465_v54  }
  0x89   :  { %471 = vst.msk [vmem:[#allocation0 + $0xe] sm:$0x3] %vm451_vm10, %v465_v54  }
  0x8a   :  { %534 = vst.msk [vmem:[#allocation0 + $0xe] sm:$0x3] %vm522_vm11, %v531_v52  }
  0x8c   :  { %v521_v55 = vpop.permute.xlu0 %520  }
  0x8e   :  { %v445_v56 = vpop.permute.xlu1 %444  }
  0x8f   :  { %448 = vst.msk [vmem:[#allocation0 + $0x28] sm:$0x3] %vm446_vm9, %v445_v56   ;;  %450 = vst.msk [vmem:[#allocation0 + $0xe] sm:$0xfc] %vm446_vm9, %v445_v56  }
  0x90   :  { %v382_v57 = vpop.permute.xlu0 %381  }
  0x91   :  { %385 = vst.msk [vmem:[#allocation0 + $0x20] sm:$0x3] %vm383_vm6, %v382_v57   ;;  %387 = vst.msk [vmem:[#allocation0 + $0x6] sm:$0xfc] %vm383_vm6, %v382_v57   ;;  %vm873_vm6 = vcmask 195616  }
  0x92   :  { %389 = vst.msk [vmem:[#allocation0] sm:$0xff] %vm388_vm7, %v382_v57   ;;  %v561_v58 = vpop.permute.xlu1 %560  }
  0x93   :  { %453 = vst.msk [vmem:[#allocation0 + $0x20] sm:$0x3] %vm451_vm10, %v445_v56   ;;  %455 = vst.msk [vmem:[#allocation0 + $0x6] sm:$0xfc] %vm451_vm10, %v445_v56  }
  0x94   :  { %493 = vst.msk [vmem:[#allocation0] sm:$0xff] %vm492_vm8, %v491_v53   ;;  %v554_v59 = vpop.permute.xlu0 %553  }
  0x95   :  { %564 = vst.msk [vmem:[#allocation0 + $0x18] sm:$0x3] %vm555_vm12, %v561_v58   ;;  %556 = vst.msk [vmem:[#allocation0] sm:$0xff] %vm555_vm12, %v554_v59  }
  0x96   :  { %524 = vst.msk [vmem:[#allocation0 + $0x20] sm:$0x3] %vm522_vm11, %v521_v55   ;;  %526 = vst.msk [vmem:[#allocation0 + $0x6] sm:$0xfc] %vm522_vm11, %v521_v55   ;;  %v594_v60 = vpop.permute.xlu1 %593  }
  0x97   :  { %597 = vst.msk [vmem:[#allocation0 + $0xe] sm:$0x3] %vm585_vm13, %v594_v60  }
  0x98   :  { %v584_v61 = vpop.permute.xlu0 %583  }
  0x99   :  { %587 = vst.msk [vmem:[#allocation0 + $0x20] sm:$0x3] %vm585_vm13, %v584_v61   ;;  %589 = vst.msk [vmem:[#allocation0 + $0x6] sm:$0xfc] %vm585_vm13, %v584_v61  }
  0x9a   :  { %v624_v62 = vpop.permute.xlu1 %623  }
  0x9b   :  { %627 = vst.msk [vmem:[#allocation0 + $0x18] sm:$0x3] %vm618_vm14, %v624_v62  }
  0x9c   :  { %v617_v63 = vpop.permute.xlu0 %616  }
  0x9d   :  { %619 = vst.msk [vmem:[#allocation0] sm:$0xff] %vm618_vm14, %v617_v63  }
  0x9e   :  { %v657_v0 = vpop.permute.xlu1 %656  }
  0x9f   :  { %660 = vst.msk [vmem:[#allocation0 + $0xe] sm:$0x3] %vm648_vm15, %v657_v0  }
  0xa0   :  { %v647_v1 = vpop.permute.xlu0 %646  }
  0xa1   :  { %650 = vst.msk [vmem:[#allocation0 + $0x20] sm:$0x3] %vm648_vm15, %v647_v1   ;;  %652 = vst.msk [vmem:[#allocation0 + $0x6] sm:$0xfc] %vm648_vm15, %v647_v1  }
  0xa2   :  { %v690_v2 = vpop.permute.xlu1 %689  }
  0xa3   :  { %693 = vst.msk [vmem:[#allocation0 + $0x16] sm:$0x3] %vm681_vm0, %v690_v2  }
  0xa4   :  { %v680_v3 = vpop.permute.xlu0 %679  }
  0xa5   :  { %683 = vst.msk [vmem:[#allocation0 + $0x28] sm:$0x3] %vm681_vm0, %v680_v3   ;;  %685 = vst.msk [vmem:[#allocation0 + $0xe] sm:$0xfc] %vm681_vm0, %v680_v3  }
  0xa6   :  { %v720_v4 = vpop.permute.xlu1 %719  }
  0xa7   :  { %723 = vst.msk [vmem:[#allocation0 + $0x18] sm:$0x3] %vm714_vm1, %v720_v4  }
  0xa8   :  { %v713_v5 = vpop.permute.xlu0 %712  }
  0xa9   :  { %715 = vst.msk [vmem:[#allocation0] sm:$0xff] %vm714_vm1, %v713_v5  }
  0xaa   :  { %v753_v6 = vpop.permute.xlu1 %752  }
  0xab   :  { %756 = vst.msk [vmem:[#allocation0 + $0xe] sm:$0x3] %vm744_vm2, %v753_v6  }
  0xac   :  { %v743_v7 = vpop.permute.xlu0 %742  }
  0xad   :  { %746 = vst.msk [vmem:[#allocation0 + $0x20] sm:$0x3] %vm744_vm2, %v743_v7   ;;  %748 = vst.msk [vmem:[#allocation0 + $0x6] sm:$0xfc] %vm744_vm2, %v743_v7  }
  0xae   :  { %v786_v8 = vpop.permute.xlu1 %785  }
  0xaf   :  { %789 = vst.msk [vmem:[#allocation0 + $0x16] sm:$0x3] %vm777_vm3, %v786_v8  }
  0xb0   :  { %v776_v9 = vpop.permute.xlu0 %775  }
  0xb1   :  { %779 = vst.msk [vmem:[#allocation0 + $0x28] sm:$0x3] %vm777_vm3, %v776_v9   ;;  %781 = vst.msk [vmem:[#allocation0 + $0xe] sm:$0xfc] %vm777_vm3, %v776_v9  }
  0xb2   :  { %v816_v10 = vpop.permute.xlu1 %815  }
  0xb3   :  { %819 = vst.msk [vmem:[#allocation0 + $0x18] sm:$0x3] %vm810_vm4, %v816_v10  }
  0xb4   :  { %v809_v11 = vpop.permute.xlu0 %808  }
  0xb5   :  { %811 = vst.msk [vmem:[#allocation0] sm:$0xff] %vm810_vm4, %v809_v11  }
  0xb6   :  { %v849_v12 = vpop.permute.xlu1 %848  }
  0xb7   :  { %852 = vst.msk [vmem:[#allocation0 + $0xe] sm:$0x3] %vm840_vm5, %v849_v12  }
  0xb8   :  { %v839_v13 = vpop.permute.xlu0 %838  }
  0xb9   :  { %842 = vst.msk [vmem:[#allocation0 + $0x20] sm:$0x3] %vm840_vm5, %v839_v13   ;;  %844 = vst.msk [vmem:[#allocation0 + $0x6] sm:$0xfc] %vm840_vm5, %v839_v13  }
  0xba   :  { %v882_v14 = vpop.permute.xlu1 %881   ;;  %v908_v19 = vld [vmem:[#allocation0 + $0x18] sm:$0xff] }
  0xbb   :  { %885 = vst.msk [vmem:[#allocation0 + $0x16] sm:$0x3] %vm873_vm6, %v882_v14  }
  0xbc   :  { %v872_v15 = vpop.permute.xlu0 %871   ;;  %v890_v16 = vld [vmem:[#allocation0] sm:$0xff] }
  0xbd   :  { %875 = vst.msk [vmem:[#allocation0 + $0x28] sm:$0x3] %vm873_vm6, %v872_v15   ;;  %877 = vst.msk [vmem:[#allocation0 + $0xe] sm:$0xfc] %vm873_vm6, %v872_v15  }
  0xc0   :  { %v895_v17 = vld [vmem:[#allocation0 + $0x8] sm:$0xff]  ;;  %v915_v20 = vld [vmem:[#allocation0 + $0x20] sm:$0xff] }
  0xc1   :  { %v1017_v18 = vpack.c.bf16 %v895_v17, %v890_v16 }
  0xc3   :  { %1018 = vst [vmem:[%s1235_s1] sm:$0xff] %v1017_v18  }
  0xc4   :  { %v922_v21 = vld [vmem:[#allocation0 + $0x28] sm:$0xff]  ;;  %v901_v22 = vld [vmem:[#allocation0 + $0x10] sm:$0xff] }
  0xc5   :  { %v1022_v23 = vpack.c.bf16 %v908_v19, %v901_v22  ;;  %v1027_v24 = vpack.c.bf16 %v922_v21, %v915_v20 }
  0xc7   :  { %1038 = vst [vmem:[%s1235_s1 + $0x8] sm:$0xff] %v1022_v23   ;;  %1039 = vst [vmem:[%s1235_s1 + $0x10] sm:$0xff] %v1027_v24  }

// kernel: min2net_forward.2
= control target key start
LH: loop header
LB: loop body
LE: loop exit
PB: predicated region body
PF: predicated region fallthrough
CT: control target
= control target key end

     0   :  { %s3510_s18 = smov 0   ;;  %s4909_s0 = inlined_call_operand.vmem [shape: bf16[512,128], index: 0, kind: input, shape index: {}]   ;;  %s4910_s1 = inlined_call_operand.vmem [shape: bf16[128,384], index: 1, kind: input, shape index: {}]   ;;  %s4911_s2 = inlined_call_operand.vmem [shape: f32[1,384], index: 2, kind: input, shape index: {}]   ;;  %s4912_s3 = inlined_call_operand.vmem [shape: bf16[384,128], index: 3, kind: input, shape index: {}]   ;;  %s4913_s4 = inlined_call_operand.vmem [shape: f32[3,128], index: 4, kind: input, shape index: {}]   ;;  %s4914_s5 = inlined_call_operand.vmem [shape: bf16[512,128], index: 5, kind: output, shape index: {}]  }
   0x1 LB: > { %s2513_s19 = sadd.s32 4294967295, %s3477_s18   ;;  %p2517_p0 = scmp.ge.s32.totalorder %s3477_s18, 1  ;;  %s3477_s18 = sphi %s3510_s18, %s15_s18  }
   0x2   : > { %p188_p1 = scmp.lt.s32.totalorder %s3477_s18, 3 }
   0x4   : > { %p189_p2 = pnand %p2517_p0, %p188_p1 }
   0x6   : > { %192 = sbr.rel (%p189_p2) target bundleno = 701 (0x2bd), region = 40 }
   0xd   : > { %v3143_v0 = vld [vmem:[%s4910_s1 + $0x4] ss:$12 sps:$4 sm:$0xff]   ;;  %v3145_v1 = vld [vmem:[%s4910_s1] ss:$12 sps:$4 sm:$0xff]   ;;  %v3479_v2 = vmov 0   ;;  %s2518_s24 = sshll.u32 %s2513_s19, 5 }
   0xe   : > { %566 = vmatprep.mubr.bf16.mxu0 %v3479_v2  ;;  %534 = vmatprep.subr.bf16.mxu0 %v3143_v0  ;;  %v3146_v3 = vld [vmem:[%s4910_s1 + $0x1c] ss:$12 sps:$4 sm:$0xff]   ;;  %v3149_v5 = vld [vmem:[%s4910_s1 + $0x18] ss:$12 sps:$4 sm:$0xff]   ;;  %v3150_v6 = vld [vmem:[%s4910_s1 + $0x34] ss:$12 sps:$4 sm:$0xff]  }
   0xf   : > { %535 = vmatpush1.bf16.msra.mxu0 %v3145_v1  ;;  %v3148_v4 = vld [vmem:[%s4910_s1 + $0x8] ss:$12 sps:$4 sm:$0xff]   ;;  %p217_p3 = scmp.lt.s32.totalorder %s2518_s24, 63  ;;  %v3152_v7 = vld [vmem:[%s4910_s1 + $0x20] ss:$12 sps:$4 sm:$0xff]   ;;  %v3199_v37 = vld [vmem:[%s4912_s3 + $0x58] sm:$0xff]   ;;  %v295_v1 = vlaneseq }
  0x10   : > { %536 = vmatprep.subr.bf16.mxu0 %v3146_v3  ;;  %3038 = vmatprep.subr.bf16.mxu1 %v3148_v4  ;;  %v3153_v8 = vld [vmem:[%s4910_s1 + $0x30] ss:$12 sps:$4 sm:$0xff]   ;;  %v3156_v9 = vld [vmem:[%s4910_s1 + $0x38] ss:$12 sps:$4 sm:$0xff]   ;;  %v3157_v11 = vld [vmem:[%s4910_s1 + $0x48] ss:$12 sps:$4 sm:$0xff]  }
  0x11   : > { %3039 = vmatpush3.bf16.msra.mxu1 %v3148_v4  ;;  %v3154_v10 = vld [vmem:[%s4910_s1 + $0x4c] ss:$12 sps:$4 sm:$0xff]   ;;  %s4942_s24 = smov (!%p217_p3, %s2518_s24), 63  ;;  %v3160_v12 = vld [vmem:[%s4910_s1 + $0x50] ss:$12 sps:$4 sm:$0xff]   ;;  %v3191_v28 = vld [vmem:[%s4912_s3 + $0x40] sm:$0xff]  }
  0x12   : > { %3040 = vmatprep.subr.bf16.mxu1 %v3152_v7  ;;  %v3158_v13 = vld [vmem:[%s4910_s1 + $0x64] ss:$12 sps:$4 sm:$0xff]   ;;  %s2519_s23 = sshll.u32 %s4942_s24, 2  ;;  %v3161_v14 = vld [vmem:[%s4910_s1 + $0x60] ss:$12 sps:$4 sm:$0xff]   ;;  %v3200_v39 = vld [vmem:[%s4912_s3 + $0x18] sm:$0xff]  }
  0x13   : > { %537 = vmatpush1.bf16.msra.mxu0 %v3149_v5  ;;  %v3164_v15 = vld [vmem:[%s4910_s1 + $0x68] ss:$12 sps:$4 sm:$0xff]   ;;  %s3572_s6 = scalar_lea.vmem %s4909_s0, %s2519_s23  ;;  %v3165_v17 = vld [vmem:[%s4910_s1 + $0x78] ss:$12 sps:$4 sm:$0xff]   ;;  %v3168_v19 = vld [vmem:[%s4910_s1 + $0x80] ss:$12 sps:$4 sm:$0xff]   ;;  %s4753_s19 = scalar_lea.vmem %s4914_s5, %s2519_s23 }
  0x14   : > { %538 = vmatprep.subr.bf16.mxu0 %v3150_v6  ;;  %v3162_v16 = vld [vmem:[%s4910_s1 + $0x7c] ss:$12 sps:$4 sm:$0xff]   ;;  %v3174_v18 = vld [vmem:[%s3572_s6] sm:$0xff]   ;;  %v3170_v23 = vld [vmem:[%s4910_s1 + $0xac] ss:$12 sps:$4 sm:$0xff]   ;;  %v296_v3 = vshrl.u32 %v295_v1, 7 }
  0x15   : > { %3041 = vmatpush3.bf16.msra.mxu1 %v3152_v7  ;;  %v3166_v20 = vld [vmem:[%s4910_s1 + $0x94] ss:$12 sps:$4 sm:$0xff]   ;;  %3054 = vmatprep.mubr.bf16.mxu1 %v3174_v18  ;;  %v3169_v21 = vld [vmem:[%s4910_s1 + $0x90] ss:$12 sps:$4 sm:$0xff]   ;;  %v3172_v22 = vld [vmem:[%s4910_s1 + $0x98] ss:$12 sps:$4 sm:$0xff]  }
  0x16   : > { %3042 = vmatprep.subr.bf16.mxu1 %v3156_v9  ;;  %v3173_v24 = vld [vmem:[%s4910_s1 + $0xa8] ss:$12 sps:$4 sm:$0xff]   ;;  %v3175_v25 = vld [vmem:[%s4910_s1 + $0xb0] ss:$12 sps:$4 sm:$0xff]   ;;  %v3192_v29 = vld [vmem:[%s4912_s3] sm:$0xff]   ;;  %v297_v4 = vsub.s32 0, %v296_v3 }
  0x17   : > { %539 = vmatpush1.bf16.msra.mxu0 %v3153_v8  ;;  %v3176_v26 = vld [vmem:[%s3572_s6 + $0x8] sm:$0xff]   ;;  %v3177_v27 = vld [vmem:[%s3572_s6 + $0x10] sm:$0xff]   ;;  %v3193_v30 = vld [vmem:[%s4912_s3 + $0x80] sm:$0xff]   ;;  %v305_v6 = vsub.s32 2, %v296_v3  ;;  %v301_v8 = vsub.s32 1, %v296_v3 }
  0x18   : > { %540 = vmatprep.subr.bf16.mxu0 %v3154_v10  ;;  %v3194_v31 = vld [vmem:[%s4912_s3 + $0x48] sm:$0xff]   ;;  %v3178_v32 = vld [vmem:[%s3572_s6 + $0x18] sm:$0xff]   ;;  %v3196_v34 = vld [vmem:[%s4912_s3 + $0x50] sm:$0xff]  }
  0x19   : > { %3043 = vmatpush3.bf16.msra.mxu1 %v3156_v9  ;;  %v3195_v33 = vld [vmem:[%s4912_s3 + $0x8] sm:$0xff]   ;;  %v3197_v35 = vld [vmem:[%s4912_s3 + $0x10] sm:$0xff]   ;;  %v3179_v38 = vld [vmem:[%s3572_s6 + $0x20] sm:$0xff]  }
  0x1a   : > { %3044 = vmatprep.subr.bf16.mxu1 %v3160_v12  ;;  %v3198_v36 = vld [vmem:[%s4912_s3 + $0x88] sm:$0xff]   ;;  %v3201_v41 = vld [vmem:[%s4912_s3 + $0x60] sm:$0xff]   ;;  %v3203_v42 = vld [vmem:[%s4912_s3 + $0x90] sm:$0xff]  }
  0x1b   : > { %541 = vmatpush1.bf16.msra.mxu0 %v3157_v11  ;;  %v3180_v40 = vld [vmem:[%s3572_s6 + $0x28] sm:$0xff]   ;;  %v3202_v43 = vld [vmem:[%s4912_s3 + $0x20] sm:$0xff]   ;;  %v3181_v44 = vld [vmem:[%s3572_s6 + $0x30] sm:$0xff]  }
  0x1c   : > { %542 = vmatprep.subr.bf16.mxu0 %v3158_v13  ;;  %v3182_v45 = vld [vmem:[%s3572_s6 + $0x38] sm:$0xff]   ;;  %v3183_v46 = vld [vmem:[%s3572_s6 + $0x40] sm:$0xff]   ;;  %v3184_v47 = vld [vmem:[%s3572_s6 + $0x48] sm:$0xff]  }
  0x1d   : > { %3045 = vmatpush3.bf16.msra.mxu1 %v3160_v12  ;;  %v3185_v48 = vld [vmem:[%s3572_s6 + $0x50] sm:$0xff]   ;;  %v3186_v49 = vld [vmem:[%s3572_s6 + $0x58] sm:$0xff]   ;;  %v3187_v50 = vld [vmem:[%s3572_s6 + $0x60] sm:$0xff]  }
  0x1e   : > { %3046 = vmatprep.subr.bf16.mxu1 %v3164_v15  ;;  %v3188_v51 = vld [vmem:[%s3572_s6 + $0x68] sm:$0xff]   ;;  %v3189_v52 = vld [vmem:[%s3572_s6 + $0x70] sm:$0xff]   ;;  %v3190_v53 = vld [vmem:[%s3572_s6 + $0x78] sm:$0xff]  }
  0x1f   : > { %543 = vmatpush1.bf16.msra.mxu0 %v3161_v14  ;;  %v3208_v54 = vld [vmem:[%s4912_s3 + $0x98] sm:$0xff]   ;;  %v3204_v55 = vld [vmem:[%s4912_s3 + $0x68] sm:$0xff]   ;;  %v3209_v57 = vld [vmem:[%s4912_s3 + $0xa0] sm:$0xff]  }
  0x20   : > { %544 = vmatprep.subr.bf16.mxu0 %v3162_v16  ;;  %v3205_v56 = vld [vmem:[%s4912_s3 + $0x28] sm:$0xff]   ;;  %v3206_v58 = vld [vmem:[%s4912_s3 + $0x70] sm:$0xff]   ;;  %v3210_v61 = vld [vmem:[%s4912_s3 + $0x78] sm:$0xff]  }
  0x21   : > { %3047 = vmatpush3.bf16.msra.mxu1 %v3164_v15  ;;  %v3207_v59 = vld [vmem:[%s4912_s3 + $0x30] sm:$0xff]   ;;  %v3212_v60 = vld [vmem:[%s4912_s3 + $0xa8] sm:$0xff]   ;;  %v3211_v62 = vld [vmem:[%s4912_s3 + $0x38] sm:$0xff]  }
  0x22   : > { %3048 = vmatprep.subr.bf16.mxu1 %v3168_v19  ;;  %v3213_v63 = vld [vmem:[%s4912_s3 + $0xb0] sm:$0xff]   ;;  %v3214_v0 = vld [vmem:[%s4912_s3 + $0xb8] sm:$0xff]   ;;  %v293_v5 = vld [vmem:[%s4911_s2] sm:$0x7] }
  0x23   : > { %545 = vmatpush1.bf16.msra.mxu0 %v3165_v17  ;;  %v3707_v7 = vrot.slane %v293_v5, %v297_v4  ;;  %v3714_v11 = vrot.slane %v293_v5, %v301_v8 }
  0x24   : > { %546 = vmatprep.subr.bf16.mxu0 %v3166_v20 }
  0x25   : > { %3049 = vmatpush3.bf16.msra.mxu1 %v3168_v19 }
  0x26   : > { %3050 = vmatprep.subr.bf16.mxu1 %v3172_v22 }
  0x27   : > { %547 = vmatpush1.bf16.msra.mxu0 %v3169_v21 }
  0x28   : > { %548 = vmatprep.subr.bf16.mxu0 %v3170_v23 }
  0x29   : > { %3051 = vmatpush3.bf16.msra.mxu1 %v3172_v22 }
  0x2a   : > { %3052 = vmatprep.subr.bf16.mxu1 %v3175_v25 }
  0x2b   : > { %549 = vmatpush1.bf16.msra.mxu0 %v3173_v24 }
  0x2c   : > { %3086 = vmatprep.subr.bf16.mxu0 %v3193_v30 }
  0x2d   : > { %3053 = vmatpush3.bf16.msra.mxu1 %v3175_v25 }
  0x2e   : > { %567 = vmatmul.mubr.bf16.vlgmr.msra.gmra.mrb[0].mxu0 %v3174_v18  ;;  %2902 = vmatprep.subr.bf16.mxu1 %v3191_v28 }
  0x2f   : > { %576 = vmatprep.mubr.bf16.mxu0 %v3479_v2  ;;  %3087 = vmatpush3.bf16.msra.mxu0 %v3193_v30 }
  0x30   : > { %3055 = vmatmul.mubr.bf16.vlgmr.msra.gmra.mrb[0].mxu1 %v3176_v26  ;;  %3088 = vmatprep.subr.bf16.mxu0 %v3198_v36 }
  0x31   : > { %3058 = vmatprep.mubr.bf16.mxu1 %v3177_v27  ;;  %2903 = vmatpush3.bf16.msra.mxu1 %v3192_v29 }
  0x32   : > { %2904 = vmatprep.subr.bf16.mxu1 %v3194_v31 }
  0x33   : > { %3089 = vmatpush3.bf16.msra.mxu0 %v3198_v36 }
  0x34   : > { %3090 = vmatprep.subr.bf16.mxu0 %v3203_v42 }
  0x35   : > { %2905 = vmatpush3.bf16.msra.mxu1 %v3195_v33 }
  0x36   : > { %577 = vmatmul.mubr.bf16.gmra.mrb[4].mxu0 %v3176_v26  ;;  %2906 = vmatprep.subr.bf16.mxu1 %v3196_v34 }
  0x37   : > { %586 = vmatprep.mubr.bf16.mxu0 %v3479_v2  ;;  %3091 = vmatpush3.bf16.msra.mxu0 %v3203_v42 }
  0x38   : > { %3059 = vmatmul.mubr.bf16.gmra.mrb[4].mxu1 %v3178_v32  ;;  %3092 = vmatprep.subr.bf16.mxu0 %v3208_v54 }
  0x39   : > { %3062 = vmatprep.mubr.bf16.mxu1 %v3179_v38  ;;  %2907 = vmatpush3.bf16.msra.mxu1 %v3197_v35 }
  0x3a   : > { %2908 = vmatprep.subr.bf16.mxu1 %v3199_v37 }
  0x3b   : > { %3093 = vmatpush3.bf16.msra.mxu0 %v3208_v54 }
  0x3c   : > { %3094 = vmatprep.subr.bf16.mxu0 %v3209_v57 }
  0x3d   : > { %2909 = vmatpush3.bf16.msra.mxu1 %v3200_v39 }
  0x3e   : > { %587 = vmatmul.mubr.bf16.gmra.mrb[8].mxu0 %v3177_v27  ;;  %2910 = vmatprep.subr.bf16.mxu1 %v3201_v41 }
  0x3f   : > { %596 = vmatprep.mubr.bf16.mxu0 %v3479_v2  ;;  %3095 = vmatpush3.bf16.msra.mxu0 %v3209_v57 }
  0x40   : > { %3063 = vmatmul.mubr.bf16.gmra.mrb[8].mxu1 %v3180_v40  ;;  %3096 = vmatprep.subr.bf16.mxu0 %v3212_v60 }
  0x41   : > { %3066 = vmatprep.mubr.bf16.mxu1 %v3181_v44  ;;  %2911 = vmatpush3.bf16.msra.mxu1 %v3202_v43 }
  0x42   : > { %2912 = vmatprep.subr.bf16.mxu1 %v3204_v55 }
  0x43   : > { %3097 = vmatpush3.bf16.msra.mxu0 %v3212_v60 }
  0x44   : > { %3098 = vmatprep.subr.bf16.mxu0 %v3213_v63 }
  0x45   : > { %2913 = vmatpush3.bf16.msra.mxu1 %v3205_v56 }
  0x46   : > { %597 = vmatmul.mubr.bf16.gmra.mrb[12].mxu0 %v3178_v32  ;;  %2914 = vmatprep.subr.bf16.mxu1 %v3206_v58 }
  0x47   : > { %606 = vmatprep.mubr.bf16.mxu0 %v3479_v2  ;;  %3099 = vmatpush3.bf16.msra.mxu0 %v3213_v63 }
  0x48   : > { %3067 = vmatmul.mubr.bf16.gmra.mrb[12].mxu1 %v3182_v45  ;;  %3100 = vmatprep.subr.bf16.mxu0 %v3214_v0 }
  0x49   : > { %3070 = vmatprep.mubr.bf16.mxu1 %v3183_v46  ;;  %2915 = vmatpush3.bf16.msra.mxu1 %v3207_v59 }
  0x4a   : > { %2916 = vmatprep.subr.bf16.mxu1 %v3210_v61 }
  0x4b   : > { %3101 = vmatpush3.bf16.msra.mxu0 %v3214_v0 }
  0x4d   : > { %2917 = vmatpush3.bf16.msra.mxu1 %v3211_v62 }
  0x4e   : > { %607 = vmatmul.mubr.bf16.gmra.mrb[16].mxu0 %v3179_v38 }
  0x4f   : > { %616 = vmatprep.mubr.bf16.mxu0 %v3479_v2 }
  0x50   : > { %3071 = vmatmul.mubr.bf16.gmra.mrb[16].mxu1 %v3184_v47 }
  0x51   : > { %3074 = vmatprep.mubr.bf16.mxu1 %v3185_v48 }
  0x56   : > { %617 = vmatmul.mubr.bf16.gmra.mrb[20].mxu0 %v3180_v40 }
  0x57   : > { %626 = vmatprep.mubr.bf16.mxu0 %v3479_v2 }
  0x58   : > { %3075 = vmatmul.mubr.bf16.gmra.mrb[20].mxu1 %v3186_v49 }
  0x59   : > { %3078 = vmatprep.mubr.bf16.mxu1 %v3187_v50 }
  0x5e   : > { %627 = vmatmul.mubr.bf16.gmra.mrb[24].mxu0 %v3181_v44 }
  0x5f   : > { %636 = vmatprep.mubr.bf16.mxu0 %v3479_v2 }
  0x60   : > { %3079 = vmatmul.mubr.bf16.gmra.mrb[24].mxu1 %v3188_v51 }
  0x61   : > { %3082 = vmatprep.mubr.bf16.mxu1 %v3189_v52 }
  0x66   : > { %637 = vmatmul.mubr.bf16.gmra.mrb[28].mxu0 %v3182_v45 }
  0x67   : > { %646 = vmatprep.mubr.bf16.mxu0 %v3479_v2 }
  0x68   : > { %3083 = vmatmul.mubr.bf16.gmra.mrb[28].mxu1 %v3190_v53 }
  0x6e   : > { %647 = vmatmul.mubr.bf16.gmra.mrb[32].mxu0 %v3183_v46 }
  0x6f   : > { %656 = vmatprep.mubr.bf16.mxu0 %v3479_v2 }
  0x76   : > { %657 = vmatmul.mubr.bf16.gmra.mrb[36].mxu0 %v3184_v47 }
  0x77   : > { %666 = vmatprep.mubr.bf16.mxu0 %v3479_v2 }
  0x7e   : > { %667 = vmatmul.mubr.bf16.gmra.mrb[40].mxu0 %v3185_v48 }
  0x7f   : > { %676 = vmatprep.mubr.bf16.mxu0 %v3479_v2 }
  0x86   : > { %677 = vmatmul.mubr.bf16.gmra.mrb[44].mxu0 %v3186_v49 }
  0x87   : > { %686 = vmatprep.mubr.bf16.mxu0 %v3479_v2 }
  0x8e   : > { %687 = vmatmul.mubr.bf16.gmra.mrb[48].mxu0 %v3187_v50 }
  0x8f   : > { %696 = vmatprep.mubr.bf16.mxu0 %v3479_v2 }
  0x96   : > { %697 = vmatmul.mubr.bf16.gmra.mrb[52].mxu0 %v3188_v51 }
  0x97   : > { %706 = vmatprep.mubr.bf16.mxu0 %v3479_v2 }
  0x9e   : > { %707 = vmatmul.mubr.bf16.gmra.mrb[56].mxu0 %v3189_v52 }
  0x9f   : > { %716 = vmatprep.mubr.bf16.mxu0 %v3479_v2  ;;  %v3709_v2 = vrot.slane %v293_v5, %v305_v6 }
  0xa6   : > { %717 = vmatmul.mubr.bf16.gmra.mrb[60].mxu0 %v3190_v53 }
 0x101   : > { %v568_v9 = vpop.f32.mrb[0].mxu0 }
 0x102   : > { %v3712_v10 = vadd.f32 %v568_v9, %v3707_v7  ;;  %v570_v12 = vpop.f32.mrb[1].mxu0 }
 0x103   : > { %v572_v13 = vpop.f32.mrb[2].mxu0  ;;  %v3056_v17 = vpop.f32.mrb[0].mxu1  ;;  %v3727_v22 = vadd.f32 %v570_v12, %v3714_v11 }
 0x104   : > { %v984_v14 = vmin.f32 %v3712_v10, 0.0  ;;  %v3718_v15 = vadd.f32 %v572_v13, %v3707_v7  ;;  %v574_v16 = vpop.f32.mrb[3].mxu0  ;;  %v3724_v19 = vadd.f32 %v3056_v17, %v3709_v2  ;;  %v761_v20 = vpop.f32.mrb[1].mxu1  ;;  %vm888_vm0 = vcmp.gt.f32.partialorder %v3712_v10, 0.0 }
 0x105   : > { %v3721_v18 = vadd.f32 %v574_v16, %v3714_v11  ;;  %v3057_v24 = vpop.f32.mrb[2].mxu1  ;;  %v3731_v25 = vadd.f32 %v761_v20, %v3709_v2  ;;  %v985_v32 = vmin.f32 %v3727_v22, 0.0  ;;  %vm889_vm4 = vcmp.gt.f32.partialorder %v3727_v22, 0.0 }
 0x106   : > { %v1080_v21 = vmul.f32 1.442695, %v984_v14  ;;  %v987_v23 = vmin.f32 %v3718_v15, 0.0  ;;  %v764_v26 = vpop.f32.mrb[3].mxu1  ;;  %v992_v29 = vmin.f32 %v3724_v19, 0.0  ;;  %v3736_v30 = vadd.f32 %v3057_v24, %v3709_v2 }
 0x107   : > { %v988_v28 = vmin.f32 %v3721_v18, 0.0  ;;  %v3740_v34 = vadd.f32 %v764_v26, %v3709_v2  ;;  %v986_v36 = vmin.f32 %v3731_v25, 0.0  ;;  %v1082_v46 = vmul.f32 1.442695, %v985_v32 }
 0x108   : > { %3215 = vpow2.f32 %v1080_v21  ;;  %v1086_v27 = vmul.f32 1.442695, %v987_v23  ;;  %v1096_v33 = vmul.f32 1.442695, %v992_v29  ;;  %v995_v37 = vmin.f32 %v3736_v30, 0.0 }
 0x109   : > { %v578_v31 = vpop.f32.mrb[4].mxu0  ;;  %v1088_v39 = vmul.f32 1.442695, %v988_v28  ;;  %v989_v40 = vmin.f32 %v3740_v34, 0.0  ;;  %v1084_v49 = vmul.f32 1.442695, %v986_v36 }
 0x10a   : > { %3217 = vpow2.f32 %v1086_v27  ;;  %v580_v35 = vpop.f32.mrb[5].mxu0  ;;  %v1102_v43 = vmul.f32 1.442695, %v995_v37  ;;  %v3758_v52 = vadd.f32 %v578_v31, %v3707_v7  ;;  %vm891_vm1 = vcmp.gt.f32.partialorder %v3718_v15, 0.0 }
 0x10b   : > { %v582_v38 = vpop.f32.mrb[6].mxu0  ;;  %3219 = vpow2.f32 %v1096_v33  ;;  %v3060_v42 = vpop.f32.mrb[4].mxu1  ;;  %v3746_v44 = vadd.f32 %v580_v35, %v3714_v11  ;;  %v1090_v51 = vmul.f32 1.442695, %v989_v40  ;;  %vm896_vm2 = vcmp.gt.f32.partialorder %v3724_v19, 0.0 }
 0x10c   : > { %v584_v41 = vpop.f32.mrb[7].mxu0  ;;  %v3748_v45 = vpop.f32.mrb[5].mxu1  ;;  %3221 = vpow2.f32 %v1102_v43  ;;  %v3762_v54 = vadd.f32 %v582_v38, %v3707_v7  ;;  %v990_v1 = vmin.f32 %v3758_v52, 0.0  ;;  %v3793_v23 = vadd.f32 %v3060_v42, %v3709_v2 }
 0x10d   : > { %v3751_v47 = vadd.f32 %v584_v41, %v3714_v11  ;;  %v3753_v48 = vpop.f32.mrb[6].mxu1  ;;  %3223 = vpow2.f32 %v1088_v39  ;;  %v991_v53 = vmin.f32 %v3746_v44, 0.0  ;;  %vm899_vm3 = vcmp.gt.f32.partialorder %v3736_v30, 0.0 }
 0x10e   : > { %v3755_v50 = vpop.f32.mrb[7].mxu1  ;;  %3225 = vpow2.f32 %v1082_v46  ;;  %v993_v4 = vmin.f32 %v3762_v54, 0.0  ;;  %v1004_v39 = vmin.f32 %v3793_v23, 0.0  ;;  %v3822_v40 = vadd.f32 %v3748_v45, %v3709_v2 }
 0x10f   : > { %v994_v57 = vmin.f32 %v3751_v47, 0.0  ;;  %3227 = vpow2.f32 %v1084_v49  ;;  %v1094_v3 = vmul.f32 1.442695, %v991_v53  ;;  %vm892_vm5 = vcmp.gt.f32.partialorder %v3721_v18, 0.0 }
 0x110   : > { %3229 = vpow2.f32 %v1090_v51  ;;  %v1098_v26 = vmul.f32 1.442695, %v993_v4  ;;  %v3830_v51 = vadd.f32 %v3753_v48, %v3709_v2  ;;  %vm890_vm6 = vcmp.gt.f32.partialorder %v3731_v25, 0.0 }
 0x111   : > { %v588_v55 = vpop.f32.mrb[8].mxu0  ;;  %v1100_v8 = vmul.f32 1.442695, %v994_v57  ;;  %3231 = vpow2.f32 %v1094_v3  ;;  %vm893_vm7 = vcmp.gt.f32.partialorder %v3740_v34, 0.0  ;;  %vm895_vm8 = vcmp.gt.f32.partialorder %v3746_v44, 0.0 }
 0x112   : > { %v3216_v56 = vpop.eup %3215  ;;  %v590_v58 = vpop.f32.mrb[9].mxu0  ;;  %v3775_v9 = vadd.f32 %v588_v55, %v3707_v7  ;;  %v1007_v3 = vmin.f32 %v3830_v51, 0.0  ;;  %vm898_vm9 = vcmp.gt.f32.partialorder %v3751_v47, 0.0  ;;  %vm894_vm10 = vcmp.gt.f32.partialorder %v3758_v52, 0.0 }
 0x113   : > { %v2562_v59 = vadd.f32 -1.0, %v3216_v56  ;;  %v592_v60 = vpop.f32.mrb[10].mxu0  ;;  %v3766_v63 = vpop.f32.mrb[8].mxu1  ;;  %v3786_v17 = vadd.f32 %v590_v58, %v3714_v11  ;;  %3233 = vpow2.f32 %v1100_v8  ;;  %v3837_v56 = vadd.f32 %v3755_v50, %v3709_v2 }
 0x114   : > { %v3218_v61 = vpop.eup %3217  ;;  %v594_v62 = vpop.f32.mrb[11].mxu0  ;;  %v996_v31 = vmin.f32 %v3775_v9, 0.0  ;;  %v3805_v32 = vadd.f32 %v592_v60, %v3707_v7  ;;  %vm897_vm11 = vcmp.gt.f32.partialorder %v3762_v54, 0.0  ;;  %vm900_vm14 = vcmp.gt.f32.partialorder %v3775_v9, 0.0 }
 0x115   : > { %v2565_v0 = vadd.f32 -1.0, %v3218_v61  ;;  %v3770_v5 = vpop.f32.mrb[9].mxu1  ;;  %v3220_v6 = vpop.eup %3219  ;;  %v3780_v13 = vsel %vm888_vm0, %v3712_v10, %v2562_v59  ;;  %v1092_v10 = vmul.f32 1.442695, %v990_v1  ;;  %v997_v35 = vmin.f32 %v3786_v17, 0.0 }
 0x116   : > { %v3777_v12 = vpop.f32.mrb[10].mxu1  ;;  %v2570_v16 = vadd.f32 -1.0, %v3220_v6  ;;  %v3222_v24 = vpop.eup %3221  ;;  %v3809_v36 = vadd.f32 %v594_v62, %v3714_v11  ;;  %v1104_v55 = vmul.f32 1.442695, %v996_v31  ;;  %v999_v45 = vmin.f32 %v3805_v32, 0.0 }
 0x117   : > { %v3783_v14 = vsel %vm891_vm1, %v3718_v15, %v2565_v0  ;;  %v3788_v20 = vpop.f32.mrb[11].mxu1  ;;  %v3224_v27 = vpop.eup %3223  ;;  %v2573_v29 = vadd.f32 -1.0, %v3222_v24  ;;  %3235 = vpow2.f32 %v1092_v10  ;;  %v1106_v59 = vmul.f32 1.442695, %v997_v35 }
 0x118   : > { %v1467_v21 = vpack.c.bf16 %v3783_v14, %v3780_v13  ;;  %v3801_v28 = vsel %vm896_vm2, %v3724_v19, %v2570_v16  ;;  %v3226_v38 = vpop.eup %3225  ;;  %v2566_v46 = vadd.f32 -1.0, %v3224_v27  ;;  %3237 = vpow2.f32 %v1098_v26 }
 0x119   : > { %v3796_v15 = vpop.f32.mrb[12].mxu0  ;;  %v3817_v19 = vsel %vm899_vm3, %v3736_v30, %v2573_v29  ;;  %v3228_v43 = vpop.eup %3227  ;;  %v2563_v58 = vadd.f32 -1.0, %v3226_v38  ;;  %v1000_v48 = vmin.f32 %v3809_v36, 0.0  ;;  %v1120_v61 = vmul.f32 1.442695, %v1004_v39 }
 0x11a   : > { %v600_v33 = vpop.f32.mrb[13].mxu0  ;;  %v1472_v49 = vpack.c.bf16 %v3817_v19, %v3801_v28  ;;  %v3230_v53 = vpop.eup %3229  ;;  %v998_v62 = vmin.f32 %v3822_v40, 0.0  ;;  %v2564_v50 = vadd.f32 -1.0, %v3228_v43  ;;  %v1372_v4 = vsel %vm892_vm5, %v3721_v18, %v2566_v46 }
 0x11b   : > { %v3811_v37 = vpop.f32.mrb[14].mxu0  ;;  %v3824_v42 = vpop.f32.mrb[12].mxu1  ;;  %v3848_v0 = vadd.f32 %v600_v33, %v3714_v11  ;;  %v2567_v1 = vadd.f32 -1.0, %v3230_v53  ;;  %3239 = vpow2.f32 %v1104_v55  ;;  %v1110_v8 = vmul.f32 1.442695, %v999_v45 }
 0x11c   : > { %v604_v41 = vpop.f32.mrb[15].mxu0  ;;  %v3832_v30 = vpop.f32.mrb[13].mxu1  ;;  %v1001_v16 = vmin.f32 %v3837_v56, 0.0  ;;  %3241 = vpow2.f32 %v1106_v59  ;;  %v1112_v26 = vmul.f32 1.442695, %v1000_v48  ;;  %v1369_v29 = vsel %vm889_vm4, %v3727_v22, %v2563_v58 }
 0x11d   : > { %v3839_v57 = vpop.f32.mrb[14].mxu1  ;;  %v3232_v10 = vpop.eup %3231  ;;  %v1003_v27 = vmin.f32 %v3848_v0, 0.0  ;;  %3243 = vpow2.f32 %v1120_v61  ;;  %v1108_v18 = vmul.f32 1.442695, %v998_v62  ;;  %v1468_v33 = vpack.c.bf16 %v1372_v4, %v1369_v29 }
 0x11e   : > { %v3843_v60 = vpop.f32.mrb[15].mxu1  ;;  %v3234_v39 = vpop.eup %3233  ;;  %v1126_v43 = vmul.f32 1.442695, %v1007_v3  ;;  %v3861_v46 = vadd.f32 %v604_v41, %v3714_v11  ;;  %v1370_v53 = vsel %vm890_vm6, %v3731_v25, %v2564_v50  ;;  %v1373_v22 = vsel %vm893_vm7, %v3740_v34, %v2567_v1 }
 0x11f   : > { %3245 = vpow2.f32 %v1110_v8  ;;  %v1114_v45 = vmul.f32 1.442695, %v1001_v16  ;;  %v3873_v58 = vadd.f32 %v3796_v15, %v3707_v7  ;;  %1743 = vmatprep.mubr.bf16.mxu1 %v1468_v33  ;;  %v1118_v48 = vmul.f32 1.442695, %v1003_v27 }
 0x120   : > { %3247 = vpow2.f32 %v1112_v26  ;;  %v3879_v25 = vadd.f32 %v3811_v37, %v3707_v7  ;;  %1744 = vmatmul.mubr.bf16.vlgmr.msra.gmra.mrb[32].mxu1 %v1467_v21  ;;  %v1469_v34 = vpack.c.bf16 %v1373_v22, %v1370_v53  ;;  %v2569_v15 = vadd.f32 -1.0, %v3232_v10 }
 0x121   : > { %v608_v6 = vpop.f32.mrb[16].mxu0  ;;  %v3236_v41 = vpop.eup %3235  ;;  %v2572_v50 = vadd.f32 -1.0, %v3234_v39  ;;  %3249 = vpow2.f32 %v1108_v18  ;;  %v1006_v1 = vmin.f32 %v3861_v46, 0.0  ;;  %v1002_v13 = vmin.f32 %v3873_v58, 0.0 }
 0x122   : > { %v610_v24 = vpop.f32.mrb[17].mxu0  ;;  %v3238_v62 = vpop.eup %3237  ;;  %3251 = vpow2.f32 %v1126_v43  ;;  %3102 = vmatprep.mubr.bf16.mxu0 %v1469_v34  ;;  %v2568_v3 = vadd.f32 -1.0, %v3236_v41  ;;  %v3896_v14 = vadd.f32 %v608_v6, %v3707_v7  ;;  %v1005_v8 = vmin.f32 %v3879_v25, 0.0 }
 0x123   : > { %v612_v31 = vpop.f32.mrb[18].mxu0  ;;  %v3858_v38 = vpop.f32.mrb[16].mxu1  ;;  %3253 = vpow2.f32 %v1114_v45  ;;  %3103 = vmatmul.mubr.bf16.vlgmr.msra.gmra.mrb[64].mxu0 %v1472_v49  ;;  %v2571_v4 = vadd.f32 -1.0, %v3238_v62  ;;  %v3902_v16 = vadd.f32 %v610_v24, %v3714_v11  ;;  %v1375_v28 = vsel %vm895_vm8, %v3746_v44, %v2569_v15 }
 0x124   : > { %v614_v35 = vpop.f32.mrb[19].mxu0  ;;  %v3869_v55 = vpop.f32.mrb[17].mxu1  ;;  %3255 = vpow2.f32 %v1118_v48  ;;  %v3907_v27 = vadd.f32 %v612_v31, %v3707_v7  ;;  %v1378_v19 = vsel %vm898_vm9, %v3751_v47, %v2572_v50  ;;  %v1124_v29 = vmul.f32 1.442695, %v1006_v1 }
 0x125   : > { %v3875_v59 = vpop.f32.mrb[18].mxu1  ;;  %v3240_v26 = vpop.eup %3239  ;;  %v1471_v18 = vpack.c.bf16 %v1378_v19, %v1375_v28  ;;  %v3920_v33 = vadd.f32 %v614_v35, %v3714_v11  ;;  %v1116_v44 = vmul.f32 1.442695, %v1002_v13  ;;  %v1008_v47 = vmin.f32 %v3896_v14, 0.0 }
 0x126   : > { %v3884_v61 = vpop.f32.mrb[19].mxu1  ;;  %v3242_v24 = vpop.eup %3241  ;;  %v1122_v53 = vmul.f32 1.442695, %v1005_v8  ;;  %v1009_v22 = vmin.f32 %v3902_v16, 0.0  ;;  %v1374_v45 = vsel %vm894_vm10, %v3758_v52, %v2568_v3  ;;  %v1377_v35 = vsel %vm897_vm11, %v3762_v54, %v2571_v4 }
 0x127   : > { %v3244_v39 = vpop.eup %3243  ;;  %1751 = vmatprep.mubr.bf16.mxu1 %v1471_v18  ;;  %v1011_v34 = vmin.f32 %v3907_v27, 0.0  ;;  %v1470_v62 = vpack.c.bf16 %v1377_v35, %v1374_v45  ;;  %v3937_v15 = vadd.f32 %v3766_v63, %v3709_v2  ;;  %vm901_vm12 = vcmp.gt.f32.partialorder %v3786_v17, 0.0 }
 0x128   : > { %vm904_vm13 = vcmp.gt.f32.partialorder %v3809_v36, 0.0  ;;  %3257 = vpow2.f32 %v1124_v29  ;;  %v1012_v52 = vmin.f32 %v3920_v33, 0.0  ;;  %vm903_vm15 = vcmp.gt.f32.partialorder %v3805_v32, 0.0 }
 0x129   : > { %v3889_v37 = vpop.f32.mrb[20].mxu0  ;;  %v3246_v48 = vpop.eup %3245  ;;  %vm908_vm0 = vcmp.gt.f32.partialorder %v3793_v23, 0.0  ;;  %vm902_vm1 = vcmp.gt.f32.partialorder %v3822_v40, 0.0  ;;  %3259 = vpow2.f32 %v1116_v44  ;;  %v1128_v63 = vmul.f32 1.442695, %v1008_v47  ;;  %1752 = vmatmul.mubr.bf16.gmra.mrb[36].mxu1 %v1470_v62 }
 0x12a   : > { %v3898_v21 = vpop.f32.mrb[21].mxu0  ;;  %v3248_v50 = vpop.eup %3247  ;;  %v3950_v3 = vadd.f32 %v3770_v5, %v3709_v2  ;;  %v2574_v8 = vadd.f32 -1.0, %v3240_v26  ;;  %vm911_vm2 = vcmp.gt.f32.partialorder %v3830_v51, 0.0  ;;  %vm905_vm3 = vcmp.gt.f32.partialorder %v3837_v56, 0.0 }
 0x12b   : > { %v3904_v10 = vpop.f32.mrb[22].mxu0  ;;  %v3917_v6 = vpop.f32.mrb[20].mxu1  ;;  %3261 = vpow2.f32 %v1122_v53  ;;  %v1130_v28 = vmul.f32 1.442695, %v1009_v22  ;;  %v2575_v18 = vadd.f32 -1.0, %v3242_v24  ;;  %v1016_v47 = vmin.f32 %v3937_v15, 0.0 }
 0x12c   : > { %v3915_v49 = vpop.f32.mrb[23].mxu0  ;;  %v3922_v31 = vpop.f32.mrb[21].mxu1  ;;  %v1134_v44 = vmul.f32 1.442695, %v1011_v34  ;;  %v3961_v5 = vadd.f32 %v3777_v12, %v3709_v2  ;;  %v2578_v62 = vadd.f32 -1.0, %v3248_v50  ;;  %v3969_v22 = vadd.f32 %v3788_v20, %v3709_v2 }
 0x12d   : > { %4915 = vst [vmem:[#allocation2_spill] sm:$0xff] %v3922_v31  ;;  %v3927_v43 = vpop.f32.mrb[22].mxu1  ;;  %v3250_v54 = vpop.eup %3249  ;;  %v1136_v53 = vmul.f32 1.442695, %v1012_v52  ;;  %v2577_v34 = vadd.f32 -1.0, %v3246_v48  ;;  %3263 = vpow2.f32 %v1128_v63  ;;  %v3976_v12 = vadd.f32 %v3898_v21, %v3714_v11 }
 0x12e   : > { %4916 = vst [vmem:[#allocation3_spill] sm:$0xff] %v3927_v43  ;;  %v3932_v41 = vpop.f32.mrb[23].mxu1  ;;  %v3252_v4 = vpop.eup %3251  ;;  %v1010_v43 = vmin.f32 %v3950_v3, 0.0  ;;  %3265 = vpow2.f32 %v1130_v28  ;;  %v1019_v48 = vmin.f32 %v3961_v5, 0.0  ;;  %vm907_vm4 = vcmp.gt.f32.partialorder %v3848_v0, 0.0 }
 0x12f   : > { %4917 = vst [vmem:[#allocation4_spill] sm:$0xff] %v3932_v41  ;;  %v3254_v29 = vpop.eup %3253  ;;  %v2582_v41 = vadd.f32 -1.0, %v3244_v39  ;;  %v2585_v50 = vadd.f32 -1.0, %v3252_v4  ;;  %3267 = vpow2.f32 %v1134_v44  ;;  %v1013_v21 = vmin.f32 %v3969_v22, 0.0 }
 0x130   : > { %v3256_v35 = vpop.eup %3255  ;;  %v2579_v39 = vadd.f32 -1.0, %v3254_v29  ;;  %3269 = vpow2.f32 %v1136_v53  ;;  %v1384_v63 = vsel %vm904_vm13, %v3809_v36, %v2578_v62  ;;  %v1132_v28 = vmul.f32 1.442695, %v1010_v43 }
 0x131   : > { %v3942_v1 = vpop.f32.mrb[24].mxu0  ;;  %v3982_v20 = vadd.f32 -1.0, %v3256_v35  ;;  %v1015_v29 = vmin.f32 %v3976_v12, 0.0  ;;  %vm906_vm5 = vcmp.gt.f32.partialorder %v3873_v58, 0.0  ;;  %v1380_v36 = vsel %vm900_vm14, %v3775_v9, %v2574_v8 }
 0x132   : > { %v3952_v13 = vpop.f32.mrb[25].mxu0  ;;  %v3258_v53 = vpop.eup %3257  ;;  %v1383_v43 = vsel %vm903_vm15, %v3805_v32, %v2577_v34  ;;  %v4025_v32 = vadd.f32 %v3904_v10, %v3707_v7  ;;  %vm910_vm6 = vcmp.gt.f32.partialorder %v3861_v46, 0.0  ;;  %vm909_vm7 = vcmp.gt.f32.partialorder %v3879_v25, 0.0 }
 0x133   : > { %v3956_v19 = vpop.f32.mrb[26].mxu0  ;;  %v3965_v26 = vpop.f32.mrb[24].mxu1  ;;  %v2584_v34 = vadd.f32 -1.0, %v3258_v53  ;;  %vm913_vm8 = vcmp.gt.f32.partialorder %v3902_v16, 0.0  ;;  %vm916_vm9 = vcmp.gt.f32.partialorder %v3920_v33, 0.0  ;;  %vm914_vm10 = vcmp.gt.f32.partialorder %v3950_v3, 0.0 }
 0x134   : > { %v3963_v45 = vpop.f32.mrb[27].mxu0  ;;  %4918 = vst [vmem:[#allocation5_spill] sm:$0xff] %v3965_v26  ;;  %v3971_v24 = vpop.f32.mrb[25].mxu1  ;;  %v2576_v26 = vadd.f32 -1.0, %v3250_v54  ;;  %v1381_v54 = vsel %vm901_vm12, %v3786_v17, %v2575_v18  ;;  %v4005_v17 = vadd.f32 %v3889_v37, %v3707_v7  ;;  %vm917_vm11 = vcmp.gt.f32.partialorder %v3969_v22, 0.0 }
 0x135   : > { %4919 = vst [vmem:[#allocation6_spill] sm:$0xff] %v3971_v24  ;;  %v3978_v31 = vpop.f32.mrb[26].mxu1  ;;  %v1144_v24 = vmul.f32 1.442695, %v1016_v47  ;;  %v1474_v44 = vpack.c.bf16 %v1384_v63, %v1381_v54  ;;  %v3998_v47 = vadd.f32 %v3915_v49, %v3714_v11  ;;  %v3260_v62 = vpop.eup %3259  ;;  %v1150_v54 = vmul.f32 1.442695, %v1019_v48 }
 0x136   : > { %4920 = vst [vmem:[#allocation7_spill] sm:$0xff] %v3978_v31  ;;  %v3980_v52 = vpop.f32.mrb[27].mxu1  ;;  %v1382_v49 = vsel %vm902_vm1, %v3822_v40, %v2576_v26  ;;  %v1473_v63 = vpack.c.bf16 %v1383_v43, %v1380_v36  ;;  %v3262_v8 = vpop.eup %3261  ;;  %v1138_v31 = vmul.f32 1.442695, %v1013_v21  ;;  %v1385_v40 = vsel %vm905_vm3, %v3837_v56, %v2579_v39 }
 0x137   : > { %4921 = vst [vmem:[#allocation8_spill] sm:$0xff] %v3980_v52  ;;  %3271 = vpow2.f32 %v1144_v24  ;;  %1759 = vmatprep.mubr.bf16.mxu1 %v1474_v44  ;;  %v1018_v37 = vmin.f32 %v3998_v47, 0.0  ;;  %v1388_v26 = vsel %vm908_vm0, %v3793_v23, %v2582_v41  ;;  %v1142_v48 = vmul.f32 1.442695, %v1015_v29  ;;  %v3264_v23 = vpop.eup %3263 }
 0x138   : > { %1760 = vmatmul.mubr.bf16.gmra.mrb[40].mxu1 %v1473_v63  ;;  %v1475_v44 = vpack.c.bf16 %v1385_v40, %v1382_v49  ;;  %v1391_v21 = vsel %vm911_vm2, %v3830_v51, %v2585_v50  ;;  %3273 = vpow2.f32 %v1132_v28  ;;  %v2580_v41 = vadd.f32 -1.0, %v3260_v62  ;;  %v3266_v53 = vpop.eup %3265 }
 0x139   : > { %v3993_v4 = vpop.f32.mrb[28].mxu0  ;;  %v1148_v56 = vmul.f32 1.442695, %v1018_v37  ;;  %v1478_v39 = vpack.c.bf16 %v1391_v21, %v1388_v26  ;;  %v2583_v43 = vadd.f32 -1.0, %v3262_v8  ;;  %3275 = vpow2.f32 %v1150_v54  ;;  %v3268_v62 = vpop.eup %3267 }
 0x13a   : > { %v4000_v35 = vpop.f32.mrb[29].mxu0  ;;  %3106 = vmatprep.mubr.bf16.mxu0 %v1475_v44  ;;  %v4045_v29 = vadd.f32 %v3942_v1, %v3707_v7  ;;  %3277 = vpow2.f32 %v1138_v31  ;;  %v1014_v51 = vmin.f32 %v4005_v17, 0.0  ;;  %v1017_v50 = vmin.f32 %v4025_v32, 0.0 }
 0x13b   : > { %v4016_v18 = vpop.f32.mrb[30].mxu0  ;;  %v4021_v9 = vpop.f32.mrb[28].mxu1  ;;  %3107 = vmatmul.mubr.bf16.gmra.mrb[68].mxu0 %v1478_v39  ;;  %v4051_v28 = vadd.f32 %v3952_v13, %v3714_v11  ;;  %3279 = vpow2.f32 %v1142_v48  ;;  %v4057_v54 = vadd.f32 %v3956_v19, %v3707_v7  ;;  %v1387_v31 = vsel %vm907_vm4, %v3848_v0, %v3982_v20 }
 0x13c   : > { %v4019_v52 = vpop.f32.mrb[31].mxu0  ;;  %4922 = vst [vmem:[#allocation9_spill] sm:$0xff] %v4021_v9  ;;  %v4033_v24 = vpop.f32.mrb[29].mxu1  ;;  %v1390_v1 = vsel %vm910_vm6, %v3861_v46, %v2584_v34  ;;  %3281 = vpow2.f32 %v1148_v56  ;;  %v4071_v19 = vadd.f32 %v3963_v45, %v3714_v11  ;;  %v1020_v40 = vmin.f32 %v4045_v29, 0.0 }
 0x13d   : > { %4923 = vst [vmem:[#allocation10_spill] sm:$0xff] %v4033_v24  ;;  %v4038_v10 = vpop.f32.mrb[30].mxu1  ;;  %v3270_v13 = vpop.eup %3269  ;;  %v1477_v63 = vpack.c.bf16 %v1390_v1, %v1387_v31  ;;  %v1386_v0 = vsel %vm906_vm5, %v3873_v58, %v2580_v41  ;;  %v1389_v46 = vsel %vm909_vm7, %v3879_v25, %v2583_v43  ;;  %v1140_v26 = vmul.f32 1.442695, %v1014_v51 }
 0x13e   : > { %4924 = vst [vmem:[#allocation11_spill] sm:$0xff] %v4038_v10  ;;  %v4041_v36 = vpop.f32.mrb[31].mxu1  ;;  %v1021_v34 = vmin.f32 %v4051_v28, 0.0  ;;  %v1476_v48 = vpack.c.bf16 %v1389_v46, %v1386_v0  ;;  %v1146_v45 = vmul.f32 1.442695, %v1017_v50  ;;  %v1023_v21 = vmin.f32 %v4057_v54, 0.0 }
 0x13f   : > { %4925 = vst [vmem:[#allocation12_spill] sm:$0xff] %v4041_v36  ;;  %1767 = vmatprep.mubr.bf16.mxu1 %v1477_v63  ;;  %v1024_v56 = vmin.f32 %v4071_v19, 0.0  ;;  %v1152_v58 = vmul.f32 1.442695, %v1020_v40  ;;  %v4091_v25 = vadd.f32 %v3824_v42, %v3709_v2  ;;  %vm912_vm12 = vcmp.gt.f32.partialorder %v3896_v14, 0.0 }
 0x140   : > { %1768 = vmatmul.mubr.bf16.gmra.mrb[44].mxu1 %v1476_v48  ;;  %v2586_v41 = vadd.f32 -1.0, %v3264_v23  ;;  %vm915_vm13 = vcmp.gt.f32.partialorder %v3907_v27, 0.0  ;;  %vm920_vm14 = vcmp.gt.f32.partialorder %v3937_v15, 0.0  ;;  %vm923_vm15 = vcmp.gt.f32.partialorder %v3961_v5, 0.0 }
 0x141   : > { %v4053_v49 = vpop.f32.mrb[32].mxu0  ;;  %v3272_v44 = vpop.eup %3271  ;;  %3283 = vpow2.f32 %v1140_v26  ;;  %v1154_v43 = vmul.f32 1.442695, %v1021_v34  ;;  %v4099_v51 = vadd.f32 %v3832_v30, %v3709_v2  ;;  %v2587_v31 = vadd.f32 -1.0, %v3266_v53 }
 0x142   : > { %v4066_v37 = vpop.f32.mrb[33].mxu0  ;;  %v3274_v39 = vpop.eup %3273  ;;  %v2590_v1 = vadd.f32 -1.0, %v3270_v13  ;;  %3285 = vpow2.f32 %v1146_v45  ;;  %v1158_v63 = vmul.f32 1.442695, %v1023_v21  ;;  %v2589_v0 = vadd.f32 -1.0, %v3268_v62 }
 0x143   : > { %v4073_v8 = vpop.f32.mrb[34].mxu0  ;;  %v3276_v42 = vpop.eup %3275  ;;  %v2594_v46 = vadd.f32 -1.0, %v3272_v44  ;;  %v1160_v48 = vmul.f32 1.442695, %v1024_v56  ;;  %v4107_v26 = vadd.f32 %v3839_v57, %v3709_v2  ;;  %v2588_v36 = vadd.f32 -1.0, %v3274_v39 }
 0x144   : > { %v4080_v20 = vpop.f32.mrb[35].mxu0  ;;  %v3278_v40 = vpop.eup %3277  ;;  %3287 = vpow2.f32 %v1152_v58  ;;  %v1028_v53 = vmin.f32 %v4091_v25, 0.0  ;;  %v4114_v13 = vadd.f32 %v3843_v60, %v3709_v2  ;;  %v1022_v44 = vmin.f32 %v4099_v51, 0.0 }
 0x145   : > { %v3280_v30 = vpop.eup %3279  ;;  %3289 = vpow2.f32 %v1154_v43  ;;  %v4121_v57 = vadd.f32 %v3993_v4, %v3707_v7  ;;  %v4125_v21 = vadd.f32 %v4000_v35, %v3714_v11  ;;  %v2597_v56 = vadd.f32 -1.0, %v3276_v42 }
 0x146   : > { %v3282_v62 = vpop.eup %3281  ;;  %v2591_v58 = vadd.f32 -1.0, %v3278_v40  ;;  %3291 = vpow2.f32 %v1158_v63  ;;  %v1396_v60 = vsel %vm916_vm9, %v3920_v33, %v2590_v1  ;;  %v2593_v39 = vadd.f32 -1.0, %v3280_v30 }
 0x147   : > { %3293 = vpow2.f32 %v1160_v48  ;;  %v1031_v43 = vmin.f32 %v4107_v26, 0.0  ;;  %v1393_v4 = vsel %vm913_vm8, %v3902_v16, %v2587_v31  ;;  %v2596_v10 = vadd.f32 -1.0, %v3282_v62 }
 0x148   : > { %v1168_v24 = vmul.f32 1.442695, %v1028_v53  ;;  %v1025_v35 = vmin.f32 %v4114_v13, 0.0  ;;  %v1480_v9 = vpack.c.bf16 %v1396_v60, %v1393_v4  ;;  %v1156_v42 = vmul.f32 1.442695, %v1022_v44 }
 0x149   : > { %v4101_v50 = vpop.f32.mrb[36].mxu0  ;;  %v1026_v63 = vmin.f32 %v4121_v57, 0.0  ;;  %v1027_v40 = vmin.f32 %v4125_v21, 0.0  ;;  %v4139_v33 = vadd.f32 %v4019_v52, %v3714_v11  ;;  %v1392_v16 = vsel %vm912_vm12, %v3896_v14, %v2586_v41 }
 0x14a   : > { %v4103_v23 = vpop.f32.mrb[37].mxu0  ;;  %1775 = vmatprep.mubr.bf16.mxu1 %v1480_v9  ;;  %v1395_v31 = vsel %vm915_vm13, %v3907_v27, %v2589_v0  ;;  %v1394_v48 = vsel %vm914_vm10, %v3950_v3, %v2588_v36  ;;  %v1397_v52 = vsel %vm917_vm11, %v3969_v22, %v2591_v58  ;;  %v1174_v9 = vmul.f32 1.442695, %v1031_v43 }
 0x14b   : > { %v4109_v34 = vpop.f32.mrb[38].mxu0  ;;  %v3284_v53 = vpop.eup %3283  ;;  %v4159_v62 = vadd.f32 %v4016_v18, %v3707_v7  ;;  %v1479_v14 = vpack.c.bf16 %v1395_v31, %v1392_v16  ;;  %v1481_v41 = vpack.c.bf16 %v1397_v52, %v1394_v48  ;;  %v1162_v0 = vmul.f32 1.442695, %v1025_v35 }
 0x14c   : > { %v4116_v45 = vpop.f32.mrb[39].mxu0  ;;  %v3286_v27 = vpop.eup %3285  ;;  %v1030_v3 = vmin.f32 %v4139_v33, 0.0  ;;  %v1400_v22 = vsel %vm920_vm14, %v3937_v15, %v2594_v46  ;;  %v1403_v36 = vsel %vm923_vm15, %v3961_v5, %v2597_v56  ;;  %vm922_vm0 = vcmp.gt.f32.partialorder %v3998_v47, 0.0 }
 0x14d   : > { %3295 = vpow2.f32 %v1168_v24  ;;  %v1164_v18 = vmul.f32 1.442695, %v1026_v63  ;;  %1776 = vmatmul.mubr.bf16.gmra.mrb[48].mxu1 %v1479_v14  ;;  %3110 = vmatprep.mubr.bf16.mxu0 %v1481_v41  ;;  %v1484_v60 = vpack.c.bf16 %v1403_v36, %v1400_v22  ;;  %vm919_vm1 = vcmp.gt.f32.partialorder %v3976_v12, 0.0 }
 0x14e   : > { %v3288_v43 = vpop.eup %3287  ;;  %3297 = vpow2.f32 %v1156_v42  ;;  %v1166_v4 = vmul.f32 1.442695, %v1027_v40  ;;  %v1402_v15 = vsel %vm922_vm0, %v3998_v47, %v2596_v10  ;;  %v2592_v35 = vadd.f32 -1.0, %v3284_v53 }
 0x14f   : > { %v3290_v46 = vpop.eup %3289  ;;  %v2595_v16 = vadd.f32 -1.0, %v3286_v27  ;;  %3299 = vpow2.f32 %v1174_v9  ;;  %v1029_v5 = vmin.f32 %v4159_v62, 0.0  ;;  %3111 = vmatmul.mubr.bf16.gmra.mrb[72].mxu0 %v1484_v60  ;;  %v1172_v24 = vmul.f32 1.442695, %v1030_v3 }
 0x150   : > { %v3292_v56 = vpop.eup %3291  ;;  %3301 = vpow2.f32 %v1162_v0  ;;  %v4178_v63 = vadd.f32 %v4053_v49, %v3707_v7  ;;  %v1399_v31 = vsel %vm919_vm1, %v3976_v12, %v2593_v39  ;;  %v4185_v10 = vadd.f32 %v4066_v37, %v3714_v11 }
 0x151   : > { %v4141_v1 = vpop.f32.mrb[40].mxu0  ;;  %v3294_v42 = vpop.eup %3293  ;;  %3303 = vpow2.f32 %v1164_v18  ;;  %v1483_v40 = vpack.c.bf16 %v1402_v15, %v1399_v31  ;;  %vm918_vm2 = vcmp.gt.f32.partialorder %v4005_v17, 0.0  ;;  %vm921_vm3 = vcmp.gt.f32.partialorder %v4025_v32, 0.0 }
 0x152   : > { %v4155_v30 = vpop.f32.mrb[41].mxu0  ;;  %3305 = vpow2.f32 %v1166_v4  ;;  %v1170_v49 = vmul.f32 1.442695, %v1029_v5  ;;  %v4193_v12 = vadd.f32 %v4080_v20, %v3714_v11  ;;  %v1032_v52 = vmin.f32 %v4178_v63, 0.0 }
 0x153   : > { %v4161_v44 = vpop.f32.mrb[42].mxu0  ;;  %1783 = vmatprep.mubr.bf16.mxu1 %v1483_v40  ;;  %3307 = vpow2.f32 %v1172_v24  ;;  %v1398_v37 = vsel %vm918_vm2, %v4005_v17, %v2592_v35  ;;  %v1401_v53 = vsel %vm921_vm3, %v4025_v32, %v2595_v16  ;;  %vm925_vm4 = vcmp.gt.f32.partialorder %v4051_v28, 0.0 }
 0x154   : > { %v4170_v58 = vpop.f32.mrb[43].mxu0  ;;  %v1482_v14 = vpack.c.bf16 %v1401_v53, %v1398_v37  ;;  %v1033_v41 = vmin.f32 %v4185_v10, 0.0  ;;  %vm927_vm5 = vcmp.gt.f32.partialorder %v4057_v54, 0.0  ;;  %vm928_vm6 = vcmp.gt.f32.partialorder %v4071_v19, 0.0 }
 0x155   : > { %v4208_v20 = vadd.f32 %v4073_v8, %v3707_v7  ;;  %v1036_v17 = vmin.f32 %v4193_v12, 0.0  ;;  %vm924_vm7 = vcmp.gt.f32.partialorder %v4045_v29, 0.0  ;;  %vm932_vm8 = vcmp.gt.f32.partialorder %v4091_v25, 0.0 }
 0x156   : > { %1784 = vmatmul.mubr.bf16.gmra.mrb[52].mxu1 %v1482_v14  ;;  %vm926_vm9 = vcmp.gt.f32.partialorder %v4099_v51, 0.0  ;;  %3309 = vpow2.f32 %v1170_v49  ;;  %v1176_v0 = vmul.f32 1.442695, %v1032_v52  ;;  %v2599_v22 = vadd.f32 -1.0, %v3290_v46 }
 0x157   : > { %v3296_v27 = vpop.eup %3295  ;;  %v2602_v36 = vadd.f32 -1.0, %v3294_v42  ;;  %vm935_vm10 = vcmp.gt.f32.partialorder %v4107_v26, 0.0  ;;  %v4217_v8 = vadd.f32 %v3858_v38, %v3709_v2  ;;  %v2598_v4 = vadd.f32 -1.0, %v3288_v43 }
 0x158   : > { %v3298_v32 = vpop.eup %3297  ;;  %v2601_v15 = vadd.f32 -1.0, %v3292_v56  ;;  %vm929_vm11 = vcmp.gt.f32.partialorder %v4114_v13, 0.0  ;;  %v1178_v35 = vmul.f32 1.442695, %v1033_v41  ;;  %v2606_v24 = vadd.f32 -1.0, %v3296_v27 }
 0x159   : > { %v4181_v47 = vpop.f32.mrb[44].mxu0  ;;  %v3300_v3 = vpop.eup %3299  ;;  %v2600_v46 = vadd.f32 -1.0, %v3298_v32  ;;  %v1035_v31 = vmin.f32 %v4208_v20, 0.0  ;;  %v1184_v42 = vmul.f32 1.442695, %v1036_v17  ;;  %vm934_vm12 = vcmp.gt.f32.partialorder %v4139_v33, 0.0 }
 0x15a   : > { %v4187_v48 = vpop.f32.mrb[45].mxu0  ;;  %v3302_v60 = vpop.eup %3301  ;;  %v2609_v49 = vadd.f32 -1.0, %v3300_v3  ;;  %3311 = vpow2.f32 %v1176_v0  ;;  %v4230_v43 = vadd.f32 %v3869_v55, %v3709_v2  ;;  %v4234_v56 = vadd.f32 %v3875_v59, %v3709_v2 }
 0x15b   : > { %v4195_v39 = vpop.f32.mrb[46].mxu0  ;;  %v3304_v5 = vpop.eup %3303  ;;  %vm931_vm13 = vcmp.gt.f32.partialorder %v4125_v21, 0.0  ;;  %v1040_v37 = vmin.f32 %v4217_v8, 0.0  ;;  %v4242_v53 = vadd.f32 %v3884_v61, %v3709_v2  ;;  %v1405_v14 = vsel %vm925_vm4, %v4051_v28, %v2599_v22 }
 0x15c   : > { %v4200_v9 = vpop.f32.mrb[47].mxu0  ;;  %v3306_v38 = vpop.eup %3305  ;;  %v1408_v55 = vsel %vm928_vm6, %v4071_v19, %v2602_v36  ;;  %v2603_v41 = vadd.f32 -1.0, %v3302_v60  ;;  %v4250_v27 = vadd.f32 -1.0, %v3304_v5  ;;  %3313 = vpow2.f32 %v1178_v35 }
 0x15d   : > { %v3308_v59 = vpop.eup %3307  ;;  %v1486_v17 = vpack.c.bf16 %v1408_v55, %v1405_v14  ;;  %v2605_v32 = vadd.f32 -1.0, %v3306_v38  ;;  %v1182_v0 = vmul.f32 1.442695, %v1035_v31  ;;  %3315 = vpow2.f32 %v1184_v42 }
 0x15e   : > { %v4254_v61 = vadd.f32 %v4101_v50, %v3707_v7  ;;  %v1034_v3 = vmin.f32 %v4230_v43, 0.0  ;;  %v1043_v28 = vmin.f32 %v4234_v56, 0.0  ;;  %v4260_v19 = vadd.f32 %v4103_v23, %v3714_v11 }
 0x15f   : > { %1791 = vmatprep.mubr.bf16.mxu1 %v1486_v17  ;;  %v1407_v22 = vsel %vm927_vm5, %v4057_v54, %v2601_v15  ;;  %v2608_v36 = vadd.f32 -1.0, %v3308_v59  ;;  %v1192_v60 = vmul.f32 1.442695, %v1040_v37  ;;  %v1037_v35 = vmin.f32 %v4242_v53, 0.0 }
 0x160   : > { %v1404_v50 = vsel %vm924_vm7, %v4045_v29, %v2598_v4  ;;  %v3310_v31 = vpop.eup %3309  ;;  %v1406_v23 = vsel %vm926_vm9, %v4099_v51, %v2600_v46  ;;  %v1409_v54 = vsel %vm929_vm11, %v4114_v13, %v2603_v41  ;;  %v1412_v15 = vsel %vm932_vm8, %v4091_v25, %v2606_v24 }
 0x161   : > { %v4219_v18 = vpop.f32.mrb[48].mxu0  ;;  %v1485_v42 = vpack.c.bf16 %v1407_v22, %v1404_v50  ;;  %v1038_v29 = vmin.f32 %v4254_v61, 0.0  ;;  %v4285_v4 = vadd.f32 %v4109_v34, %v3707_v7  ;;  %v1487_v37 = vpack.c.bf16 %v1409_v54, %v1406_v23 }
 0x162   : > { %v4222_v16 = vpop.f32.mrb[49].mxu0  ;;  %v1415_v51 = vsel %vm935_vm10, %v4107_v26, %v2609_v49  ;;  %3317 = vpow2.f32 %v1182_v0  ;;  %v1180_v13 = vmul.f32 1.442695, %v1034_v3  ;;  %v1039_v14 = vmin.f32 %v4260_v19, 0.0 }
 0x163   : > { %v4225_v40 = vpop.f32.mrb[50].mxu0  ;;  %1792 = vmatmul.mubr.bf16.gmra.mrb[56].mxu1 %v1485_v42  ;;  %v1490_v25 = vpack.c.bf16 %v1415_v51, %v1412_v15  ;;  %v2607_v55 = vadd.f32 -1.0, %v3310_v31  ;;  %v1198_v59 = vmul.f32 1.442695, %v1043_v28  ;;  %v4297_v34 = vadd.f32 %v4116_v45, %v3714_v11  ;;  %3114 = vmatprep.mubr.bf16.mxu0 %v1487_v37 }
 0x164   : > { %v4236_v52 = vpop.f32.mrb[51].mxu0  ;;  %v1414_v26 = vsel %vm934_vm12, %v4139_v33, %v2608_v36  ;;  %v3312_v49 = vpop.eup %3311  ;;  %3319 = vpow2.f32 %v1192_v60  ;;  %v1186_v41 = vmul.f32 1.442695, %v1037_v35  ;;  %v4304_v17 = vadd.f32 %v4141_v1, %v3707_v7 }
 0x165   : > { %3115 = vmatmul.mubr.bf16.gmra.mrb[76].mxu0 %v1490_v25  ;;  %v1411_v0 = vsel %vm931_vm13, %v4125_v21, %v2605_v32  ;;  %v1188_v3 = vmul.f32 1.442695, %v1038_v29  ;;  %v1041_v45 = vmin.f32 %v4285_v4, 0.0  ;;  %v4312_v28 = vadd.f32 %v4155_v30, %v3714_v11  ;;  %v4926_v25 = vld [vmem:[#allocation2_spill] sm:$0xff] }
 0x166   : > { %v1489_v33 = vpack.c.bf16 %v1414_v26, %v1411_v0  ;;  %v3314_v22 = vpop.eup %3313  ;;  %vm930_vm14 = vcmp.gt.f32.partialorder %v4121_v57, 0.0  ;;  %vm933_vm15 = vcmp.gt.f32.partialorder %v4159_v62, 0.0  ;;  %3321 = vpow2.f32 %v1180_v13 }
 0x167   : > { %v1190_v1 = vmul.f32 1.442695, %v1039_v14  ;;  %v3316_v36 = vpop.eup %3315  ;;  %3323 = vpow2.f32 %v1198_v59  ;;  %v1042_v60 = vmin.f32 %v4297_v34, 0.0  ;;  %v4319_v21 = vadd.f32 %v4161_v44, %v3707_v7 }
 0x168   : > { %1799 = vmatprep.mubr.bf16.mxu1 %v1489_v33  ;;  %v1413_v30 = vsel %vm933_vm15, %v4159_v62, %v2607_v55  ;;  %3325 = vpow2.f32 %v1186_v41  ;;  %v1044_v35 = vmin.f32 %v4304_v17, 0.0  ;;  %v4327_v50 = vadd.f32 %v4170_v58, %v3714_v11  ;;  %v4927_v41 = vld [vmem:[#allocation3_spill] sm:$0xff] }
 0x169   : > { %v4269_v5 = vpop.f32.mrb[52].mxu0  ;;  %v1410_v31 = vsel %vm930_vm14, %v4121_v57, %v4250_v27  ;;  %3327 = vpow2.f32 %v1188_v3  ;;  %v1194_v44 = vmul.f32 1.442695, %v1041_v45  ;;  %v1045_v23 = vmin.f32 %v4312_v28, 0.0 }
 0x16a   : > { %v4280_v38 = vpop.f32.mrb[53].mxu0  ;;  %v1488_v54 = vpack.c.bf16 %v1413_v30, %v1410_v31  ;;  %3329 = vpow2.f32 %v1190_v1  ;;  %vm937_vm0 = vcmp.gt.f32.partialorder %v4185_v10, 0.0  ;;  %v1196_v29 = vmul.f32 1.442695, %v1042_v60 }
 0x16b   : > { %v4290_v46 = vpop.f32.mrb[54].mxu0  ;;  %v1047_v58 = vmin.f32 %v4319_v21, 0.0  ;;  %vm936_vm1 = vcmp.gt.f32.partialorder %v4178_v63, 0.0  ;;  %vm939_vm2 = vcmp.gt.f32.partialorder %v4208_v20, 0.0  ;;  %v1200_v57 = vmul.f32 1.442695, %v1044_v35 }
 0x16c   : > { %v4293_v24 = vpop.f32.mrb[55].mxu0  ;;  %1800 = vmatmul.mubr.bf16.gmra.mrb[60].mxu1 %v1488_v54  ;;  %v3318_v37 = vpop.eup %3317  ;;  %v1048_v27 = vmin.f32 %v4327_v50, 0.0  ;;  %v4345_v51 = vadd.f32 %v3917_v6, %v3709_v2  ;;  %v2614_v13 = vadd.f32 -1.0, %v3316_v36  ;;  %3331 = vpow2.f32 %v1194_v44  ;;  %v4928_v36 = vld [vmem:[#allocation4_spill] sm:$0xff] }
 0x16d   : > { %v1202_v14 = vmul.f32 1.442695, %v1045_v23  ;;  %v4349_v55 = vadd.f32 %v4926_v25, %v3709_v2  ;;  %v2611_v26 = vadd.f32 -1.0, %v3314_v22  ;;  %vm940_vm3 = vcmp.gt.f32.partialorder %v4193_v12, 0.0 }
 0x16e   : > { %v3320_v59 = vpop.eup %3319  ;;  %vm938_vm4 = vcmp.gt.f32.partialorder %v4230_v43, 0.0  ;;  %v4355_v0 = vadd.f32 %v4927_v41, %v3709_v2  ;;  %v2610_v3 = vadd.f32 -1.0, %v3312_v49  ;;  %vm941_vm5 = vcmp.gt.f32.partialorder %v4242_v53, 0.0 }
 0x16f   : > { %3333 = vpow2.f32 %v1196_v29  ;;  %v1206_v6 = vmul.f32 1.442695, %v1047_v58  ;;  %vm944_vm6 = vcmp.gt.f32.partialorder %v4217_v8, 0.0  ;;  %v1208_v22 = vmul.f32 1.442695, %v1048_v27 }
 0x170   : > { %v3322_v33 = vpop.eup %3321  ;;  %3335 = vpow2.f32 %v1200_v57  ;;  %v1052_v1 = vmin.f32 %v4345_v51, 0.0  ;;  %v4364_v60 = vadd.f32 %v4928_v36, %v3709_v2  ;;  %v2613_v35 = vadd.f32 -1.0, %v3318_v37 }
 0x171   : > { %v4322_v32 = vpop.f32.mrb[56].mxu0  ;;  %v3324_v49 = vpop.eup %3323  ;;  %3337 = vpow2.f32 %v1202_v14  ;;  %v1046_v31 = vmin.f32 %v4349_v55, 0.0  ;;  %v1420_v44 = vsel %vm940_vm3, %v4193_v12, %v2614_v13  ;;  %vm947_vm7 = vcmp.gt.f32.partialorder %v4234_v56, 0.0 }
 0x172   : > { %v4331_v42 = vpop.f32.mrb[57].mxu0  ;;  %v3326_v54 = vpop.eup %3325  ;;  %v1055_v29 = vmin.f32 %v4355_v0, 0.0  ;;  %v4378_v58 = vadd.f32 %v4181_v47, %v3707_v7  ;;  %v4382_v37 = vadd.f32 %v4187_v48, %v3714_v11  ;;  %v1417_v57 = vsel %vm937_vm0, %v4185_v10, %v2611_v26 }
 0x173   : > { %v4334_v62 = vpop.f32.mrb[58].mxu0  ;;  %v3328_v27 = vpop.eup %3327  ;;  %v2618_v13 = vadd.f32 -1.0, %v3320_v59  ;;  %v2612_v14 = vadd.f32 -1.0, %v3322_v33  ;;  %3339 = vpow2.f32 %v1206_v6  ;;  %v1492_v25 = vpack.c.bf16 %v1420_v44, %v1417_v57 }
 0x174   : > { %v4336_v15 = vpop.f32.mrb[59].mxu0  ;;  %v3330_v41 = vpop.eup %3329  ;;  %3341 = vpow2.f32 %v1208_v22  ;;  %v1216_v36 = vmul.f32 1.442695, %v1052_v1  ;;  %v1049_v47 = vmin.f32 %v4364_v60, 0.0  ;;  %v4392_v48 = vadd.f32 %v4195_v39, %v3707_v7 }
 0x175   : > { %1807 = vmatprep.mubr.bf16.mxu1 %v1492_v25  ;;  %v1416_v10 = vsel %vm936_vm1, %v4178_v63, %v2610_v3  ;;  %v1419_v59 = vsel %vm939_vm2, %v4208_v20, %v2613_v35  ;;  %v1222_v26 = vmul.f32 1.442695, %v1055_v29  ;;  %v1050_v6 = vmin.f32 %v4378_v58, 0.0 }
 0x176   : > { %v1051_v33 = vmin.f32 %v4382_v37, 0.0  ;;  %v1491_v22 = vpack.c.bf16 %v1419_v59, %v1416_v10  ;;  %v3332_v1 = vpop.eup %3331  ;;  %v2621_v39 = vadd.f32 -1.0, %v3324_v49  ;;  %v4402_v44 = vadd.f32 -1.0, %v3328_v27  ;;  %v4931_v49 = vld [vmem:[#allocation5_spill] sm:$0xff] }
 0x177   : > { %3343 = vpow2.f32 %v1216_v36  ;;  %v1210_v63 = vmul.f32 1.442695, %v1049_v47  ;;  %v1053_v3 = vmin.f32 %v4392_v48, 0.0  ;;  %v1418_v20 = vsel %vm938_vm4, %v4230_v43, %v2612_v14  ;;  %v4933_v47 = vld [vmem:[#allocation7_spill] sm:$0xff] }
 0x178   : > { %1808 = vmatmul.mubr.bf16.gmra.mrb[64].mxu1 %v1491_v22  ;;  %vm943_vm8 = vcmp.gt.f32.partialorder %v4260_v19, 0.0  ;;  %vm946_vm9 = vcmp.gt.f32.partialorder %v4297_v34, 0.0  ;;  %v4416_v29 = vadd.f32 %v4931_v49, %v3709_v2  ;;  %v2619_v43 = vadd.f32 -1.0, %v3332_v1 }
 0x179   : > { %v4358_v45 = vpop.f32.mrb[60].mxu0  ;;  %v3334_v35 = vpop.eup %3333  ;;  %v1212_v14 = vmul.f32 1.442695, %v1050_v6  ;;  %vm942_vm10 = vcmp.gt.f32.partialorder %v4254_v61, 0.0  ;;  %vm945_vm11 = vcmp.gt.f32.partialorder %v4285_v4, 0.0  ;;  %v4430_v10 = vadd.f32 %v4933_v47, %v3709_v2  ;;  %v4934_v6 = vld [vmem:[#allocation8_spill] sm:$0xff] }
 0x17a   : > { %v4366_v30 = vpop.f32.mrb[61].mxu0  ;;  %v3336_v25 = vpop.eup %3335  ;;  %v1064_v1 = vmin.f32 %v4416_v29, 0.0  ;;  %vm952_vm12 = vcmp.gt.f32.partialorder %v4327_v50, 0.0  ;;  %vm949_vm13 = vcmp.gt.f32.partialorder %v4312_v28, 0.0  ;;  %vm950_vm14 = vcmp.gt.f32.partialorder %v4349_v55, 0.0 }
 0x17b   : > { %4929 = vst [vmem:[#allocation2_spill] sm:$0xff] %v4366_v30  ;;  %v4372_v23 = vpop.f32.mrb[62].mxu0  ;;  %v1204_v30 = vmul.f32 1.442695, %v1046_v31  ;;  %v2617_v31 = vadd.f32 -1.0, %v3330_v41  ;;  %v3338_v36 = vpop.eup %3337  ;;  %vm948_vm15 = vcmp.gt.f32.partialorder %v4304_v17, 0.0 }
 0x17c   : > { %4930 = vst [vmem:[#allocation3_spill] sm:$0xff] %v4372_v23  ;;  %v4387_v12 = vpop.f32.mrb[63].mxu0  ;;  %v2615_v23 = vadd.f32 -1.0, %v3326_v54  ;;  %v4406_v54 = vadd.f32 %v4200_v9, %v3714_v11  ;;  %v4932_v9 = vld [vmem:[#allocation6_spill] sm:$0xff]  ;;  %v1214_v41 = vmul.f32 1.442695, %v1051_v33  ;;  %v4437_v33 = vadd.f32 %v4934_v6, %v3709_v2 }
 0x17d   : > { %3345 = vpow2.f32 %v1204_v30  ;;  %v4420_v57 = vadd.f32 %v4932_v9, %v3709_v2  ;;  %v3340_v22 = vpop.eup %3339  ;;  %vm951_vm0 = vcmp.gt.f32.partialorder %v4319_v21, 0.0  ;;  %vm956_vm1 = vcmp.gt.f32.partialorder %v4345_v51, 0.0 }
 0x17e   : > { %v1421_v27 = vsel %vm941_vm5, %v4242_v53, %v2615_v23  ;;  %3347 = vpow2.f32 %v1222_v26  ;;  %v1054_v30 = vmin.f32 %v4406_v54, 0.0  ;;  %v1424_v53 = vsel %vm944_vm6, %v4217_v8, %v2618_v13  ;;  %v3342_v13 = vpop.eup %3341 }
 0x17f   : > { %v1493_v59 = vpack.c.bf16 %v1421_v27, %v1418_v20  ;;  %v2620_v23 = vadd.f32 -1.0, %v3334_v35  ;;  %3349 = vpow2.f32 %v1210_v63  ;;  %v1218_v26 = vmul.f32 1.442695, %v1053_v3 }
 0x180   : > { %v1058_v49 = vmin.f32 %v4420_v57, 0.0  ;;  %v1427_v20 = vsel %vm947_vm7, %v4234_v56, %v2621_v39  ;;  %v4446_v8 = vadd.f32 %v4219_v18, %v3707_v7  ;;  %v4448_v63 = vadd.f32 -1.0, %v3336_v25 }
 0x181   : > { %3118 = vmatprep.mubr.bf16.mxu0 %v1493_v59  ;;  %3351 = vpow2.f32 %v1212_v14  ;;  %v1496_v3 = vpack.c.bf16 %v1427_v20, %v1424_v53  ;;  %v4452_v35 = vadd.f32 %v4222_v16, %v3714_v11  ;;  %v1220_v9 = vmul.f32 1.442695, %v1054_v30  ;;  %v3344_v30 = vpop.eup %3343 }
 0x182   : > { %3353 = vpow2.f32 %v1214_v41  ;;  %v1067_v27 = vmin.f32 %v4430_v10, 0.0  ;;  %v4457_v56 = vadd.f32 %v4225_v40, %v3707_v7  ;;  %v4459_v39 = vadd.f32 -1.0, %v3338_v36 }
 0x183   : > { %v4461_v18 = vadd.f32 -1.0, %v3340_v22  ;;  %3355 = vpow2.f32 %v1218_v26  ;;  %v1061_v25 = vmin.f32 %v4437_v33, 0.0  ;;  %3119 = vmatmul.mubr.bf16.gmra.mrb[80].mxu0 %v1496_v3  ;;  %v4464_v14 = vadd.f32 -1.0, %v3342_v13 }
 0x184   : > { %v1240_v16 = vmul.f32 1.442695, %v1064_v1  ;;  %v1228_v47 = vmul.f32 1.442695, %v1058_v49  ;;  %v1056_v41 = vmin.f32 %v4446_v8, 0.0  ;;  %v1057_v59 = vmin.f32 %v4452_v35, 0.0 }
 0x185   : > { %v1423_v40 = vsel %vm943_vm8, %v4260_v19, %v2617_v31  ;;  %v1426_v36 = vsel %vm946_vm9, %v4297_v34, %v2620_v23  ;;  %v4476_v53 = vadd.f32 %v4236_v52, %v3714_v11  ;;  %3357 = vpow2.f32 %v1220_v9  ;;  %v4935_v23 = vld [vmem:[#allocation9_spill] sm:$0xff] }
 0x186   : > { %v1246_v6 = vmul.f32 1.442695, %v1067_v27  ;;  %v1059_v22 = vmin.f32 %v4457_v56, 0.0  ;;  %v1495_v1 = vpack.c.bf16 %v1426_v36, %v1423_v40  ;;  %v1234_v20 = vmul.f32 1.442695, %v1061_v25 }
 0x187   : > { %v3346_v26 = vpop.eup %3345  ;;  %v1060_v13 = vmin.f32 %v4476_v53, 0.0  ;;  %v1422_v19 = vsel %vm942_vm10, %v4254_v61, %v4402_v44  ;;  %v1425_v52 = vsel %vm945_vm11, %v4285_v4, %v2619_v43  ;;  %3359 = vpow2.f32 %v1240_v16  ;;  %v4936_v61 = vld [vmem:[#allocation10_spill] sm:$0xff]  ;;  %v4937_v4 = vld [vmem:[#allocation11_spill] sm:$0xff] }
 0x188   : > { %v3348_v49 = vpop.eup %3347  ;;  %v1224_v34 = vmul.f32 1.442695, %v1056_v41  ;;  %1815 = vmatprep.mubr.bf16.mxu1 %v1495_v1  ;;  %v1494_v31 = vpack.c.bf16 %v1425_v52, %v1422_v19  ;;  %v4490_v3 = vadd.f32 %v4935_v23, %v3709_v2  ;;  %3361 = vpow2.f32 %v1228_v47  ;;  %v4938_v41 = vld [vmem:[#allocation12_spill] sm:$0xff] }
 0x189   : > { %v3350_v9 = vpop.eup %3349  ;;  %v1226_v27 = vmul.f32 1.442695, %v1057_v59  ;;  %v4495_v44 = vadd.f32 %v4936_v61, %v3709_v2  ;;  %v4499_v43 = vadd.f32 %v4937_v4, %v3709_v2  ;;  %3363 = vpow2.f32 %v1246_v6 }
 0x18a   : > { %v1230_v25 = vmul.f32 1.442695, %v1059_v22  ;;  %1816 = vmatmul.mubr.bf16.gmra.mrb[68].mxu1 %v1494_v31  ;;  %v1076_v16 = vmin.f32 %v4490_v3, 0.0  ;;  %v4505_v40 = vadd.f32 %v4938_v41, %v3709_v2  ;;  %v4510_v59 = vadd.f32 -1.0, %v3344_v30 }
 0x18b   : > { %v3352_v47 = vpop.eup %3351  ;;  %vm953_vm2 = vcmp.gt.f32.partialorder %v4364_v60, 0.0  ;;  %3365 = vpow2.f32 %v1234_v20  ;;  %v1232_v36 = vmul.f32 1.442695, %v1060_v13  ;;  %v1070_v6 = vmin.f32 %v4495_v44, 0.0 }
 0x18c   : > { %v3354_v22 = vpop.eup %3353  ;;  %vm959_vm3 = vcmp.gt.f32.partialorder %v4355_v0, 0.0  ;;  %3367 = vpow2.f32 %v1224_v34  ;;  %v1264_v2 = vmul.f32 1.442695, %v1076_v16  ;;  %v1079_v1 = vmin.f32 %v4499_v43, 0.0 }
 0x18d   : > { %v1073_v19 = vmin.f32 %v4505_v40, 0.0  ;;  %v3356_v52 = vpop.eup %3355  ;;  %3369 = vpow2.f32 %v1226_v27  ;;  %v1252_v31 = vmul.f32 1.442695, %v1070_v6  ;;  %v4519_v30 = vadd.f32 %v4269_v5, %v3707_v7 }
 0x18e   : > { %v4523_v20 = vadd.f32 %v4280_v38, %v3714_v11  ;;  %v2624_v13 = vadd.f32 -1.0, %v3346_v26  ;;  %v2633_v23 = vadd.f32 -1.0, %v3348_v49  ;;  %3371 = vpow2.f32 %v1230_v25 }
 0x18f   : > { %v1270_v34 = vmul.f32 1.442695, %v1079_v1  ;;  %v2627_v61 = vadd.f32 -1.0, %v3350_v9  ;;  %3373 = vpow2.f32 %v1232_v36  ;;  %v1258_v4 = vmul.f32 1.442695, %v1073_v19  ;;  %v3358_v41 = vpop.eup %3357 }
 0x190   : > { %v1062_v16 = vmin.f32 %v4519_v30, 0.0  ;;  %v4526_v27 = vadd.f32 -1.0, %v3352_v47  ;;  %3375 = vpow2.f32 %v1264_v2  ;;  %v1063_v5 = vmin.f32 %v4523_v20, 0.0 }
 0x191   : > { %v4531_v6 = vadd.f32 %v4290_v46, %v3707_v7  ;;  %v4533_v38 = vadd.f32 -1.0, %v3354_v22  ;;  %3377 = vpow2.f32 %v1252_v31  ;;  %v1432_v49 = vsel %vm952_vm12, %v4327_v50, %v4464_v14  ;;  %v3360_v9 = vpop.eup %3359 }
 0x192   : > { %v1236_v26 = vmul.f32 1.442695, %v1062_v16  ;;  %vm955_vm4 = vcmp.gt.f32.partialorder %v4382_v37, 0.0  ;;  %vm958_vm5 = vcmp.gt.f32.partialorder %v4406_v54, 0.0  ;;  %3379 = vpow2.f32 %v1270_v34  ;;  %v3362_v36 = vpop.eup %3361 }
 0x193   : > { %v1238_v25 = vmul.f32 1.442695, %v1063_v5  ;;  %v1065_v47 = vmin.f32 %v4531_v6, 0.0  ;;  %v1429_v46 = vsel %vm949_vm13, %v4312_v28, %v4459_v39  ;;  %v4546_v22 = vadd.f32 -1.0, %v3356_v52  ;;  %v3364_v14 = vpop.eup %3363 }
 0x194   : > { %3381 = vpow2.f32 %v1258_v4  ;;  %v1498_v2 = vpack.c.bf16 %v1432_v49, %v1429_v46  ;;  %v4550_v50 = vadd.f32 %v4293_v24, %v3714_v11  ;;  %vm957_vm6 = vcmp.gt.f32.partialorder %v4392_v48, 0.0 }
 0x195   : > { %vm962_vm7 = vcmp.gt.f32.partialorder %v4420_v57, 0.0  ;;  %3383 = vpow2.f32 %v1236_v26  ;;  %v1242_v1 = vmul.f32 1.442695, %v1065_v47  ;;  %v1428_v28 = vsel %vm948_vm15, %v4304_v17, %v4448_v63  ;;  %v3366_v19 = vpop.eup %3365 }
 0x196   : > { %v1431_v39 = vsel %vm951_vm0, %v4319_v21, %v4461_v18  ;;  %vm954_vm8 = vcmp.gt.f32.partialorder %v4378_v58, 0.0  ;;  %vm968_vm9 = vcmp.gt.f32.partialorder %v4416_v29, 0.0  ;;  %vm971_vm10 = vcmp.gt.f32.partialorder %v4430_v10, 0.0  ;;  %1823 = vmatprep.mubr.bf16.mxu1 %v1498_v2  ;;  %v3368_v63 = vpop.eup %3367 }
 0x197   : > { %vm965_vm11 = vcmp.gt.f32.partialorder %v4437_v33, 0.0  ;;  %3385 = vpow2.f32 %v1238_v25  ;;  %v1066_v24 = vmin.f32 %v4550_v50, 0.0  ;;  %v1497_v52 = vpack.c.bf16 %v1431_v39, %v1428_v28  ;;  %v3370_v34 = vpop.eup %3369 }
 0x198   : > { %v1430_v17 = vsel %vm950_vm14, %v4349_v55, %v2624_v13  ;;  %v2632_v21 = vadd.f32 -1.0, %v3358_v41  ;;  %3387 = vpow2.f32 %v1242_v1  ;;  %v1433_v18 = vsel %vm953_vm2, %v4364_v60, %v2627_v61  ;;  %v3372_v41 = vpop.eup %3371 }
 0x199   : > { %v1436_v31 = vsel %vm956_vm1, %v4345_v51, %v4510_v59  ;;  %v1244_v4 = vmul.f32 1.442695, %v1066_v24  ;;  %1824 = vmatmul.mubr.bf16.gmra.mrb[72].mxu1 %v1497_v52  ;;  %v1499_v16 = vpack.c.bf16 %v1433_v18, %v1430_v17  ;;  %v1439_v55 = vsel %vm959_vm3, %v4355_v0, %v2633_v23  ;;  %v3374_v59 = vpop.eup %3373 }
 0x19a   : > { %v4582_v13 = vadd.f32 %v4322_v32, %v3707_v7  ;;  %v2642_v5 = vadd.f32 -1.0, %v3360_v9  ;;  %v1502_v60 = vpack.c.bf16 %v1439_v55, %v1436_v31  ;;  %v4586_v61 = vadd.f32 %v4331_v42, %v3714_v11  ;;  %v3376_v32 = vpop.eup %3375 }
 0x19b   : > { %v4590_v51 = vadd.f32 %v4334_v62, %v3707_v7  ;;  %v2636_v26 = vadd.f32 -1.0, %v3362_v36  ;;  %v2645_v49 = vadd.f32 -1.0, %v3364_v14  ;;  %3389 = vpow2.f32 %v1244_v4  ;;  %3122 = vmatprep.mubr.bf16.mxu0 %v1499_v16  ;;  %v3378_v62 = vpop.eup %3377 }
 0x19c   : > { %v1068_v0 = vmin.f32 %v4582_v13, 0.0  ;;  %v2639_v23 = vadd.f32 -1.0, %v3366_v19  ;;  %v4593_v25 = vadd.f32 -1.0, %v3368_v63  ;;  %v4595_v9 = vadd.f32 -1.0, %v3370_v34  ;;  %3123 = vmatmul.mubr.bf16.gmra.mrb[84].mxu0 %v1502_v60  ;;  %v3380_v14 = vpop.eup %3379 }
 0x19d   : > { %vm964_vm12 = vcmp.gt.f32.partialorder %v4476_v53, 0.0  ;;  %v1069_v42 = vmin.f32 %v4586_v61, 0.0  ;;  %vm961_vm13 = vcmp.gt.f32.partialorder %v4452_v35, 0.0  ;;  %v1071_v46 = vmin.f32 %v4590_v51, 0.0 }
 0x19e   : > { %v1248_v47 = vmul.f32 1.442695, %v1068_v0  ;;  %v1435_v36 = vsel %vm955_vm4, %v4382_v37, %v4533_v38  ;;  %v1438_v2 = vsel %vm958_vm5, %v4406_v54, %v2632_v21  ;;  %v4608_v1 = vadd.f32 -1.0, %v3372_v41  ;;  %v3382_v24 = vpop.eup %3381 }
 0x19f   : > { %vm974_vm14 = vcmp.gt.f32.partialorder %v4495_v44, 0.0  ;;  %v1250_v28 = vmul.f32 1.442695, %v1069_v42  ;;  %v1501_v39 = vpack.c.bf16 %v1438_v2, %v1435_v36  ;;  %v4613_v19 = vadd.f32 %v4336_v15, %v3714_v11  ;;  %v3384_v52 = vpop.eup %3383 }
 0x1a0   : > { %vm960_vm15 = vcmp.gt.f32.partialorder %v4446_v8, 0.0  ;;  %vm963_vm0 = vcmp.gt.f32.partialorder %v4457_v56, 0.0  ;;  %v2638_v37 = vadd.f32 -1.0, %v3374_v59  ;;  %vm977_vm1 = vcmp.gt.f32.partialorder %v4505_v40, 0.0 }
 0x1a1   : > { %3391 = vpow2.f32 %v1248_v47  ;;  %v1254_v54 = vmul.f32 1.442695, %v1071_v46  ;;  %v1437_v38 = vsel %vm957_vm6, %v4392_v48, %v4546_v22  ;;  %vm980_vm2 = vcmp.gt.f32.partialorder %v4490_v3, 0.0  ;;  %1831 = vmatprep.mubr.bf16.mxu1 %v1501_v39  ;;  %v3386_v21 = vpop.eup %3385 }
 0x1a2   : > { %v4623_v15 = vadd.f32 -1.0, %v3376_v32  ;;  %3393 = vpow2.f32 %v1250_v28  ;;  %v1072_v17 = vmin.f32 %v4613_v19, 0.0  ;;  %v1434_v63 = vsel %vm954_vm8, %v4378_v58, %v4526_v27  ;;  %v3388_v31 = vpop.eup %3387 }
 0x1a3   : > { %v2648_v18 = vadd.f32 -1.0, %v3378_v62  ;;  %vm983_vm3 = vcmp.gt.f32.partialorder %v4499_v43, 0.0  ;;  %3395 = vpow2.f32 %v1254_v54  ;;  %v1500_v48 = vpack.c.bf16 %v1437_v38, %v1434_v63 }
 0x1a4   : > { %v1442_v22 = vsel %vm962_vm7, %v4420_v57, %v2636_v26  ;;  %v1256_v34 = vmul.f32 1.442695, %v1072_v17  ;;  %v1445_v4 = vsel %vm965_vm11, %v4437_v33, %v2639_v23  ;;  %v1448_v58 = vsel %vm968_vm9, %v4416_v29, %v2642_v5  ;;  %v4939_v29 = vld [vmem:[#allocation2_spill] sm:$0xff]  ;;  %v4940_v33 = vld [vmem:[#allocation3_spill] sm:$0xff] }
 0x1a5   : > { %v1451_v27 = vsel %vm971_vm10, %v4430_v10, %v2645_v49  ;;  %v2657_v16 = vadd.f32 -1.0, %v3380_v14  ;;  %vm967_vm4 = vcmp.gt.f32.partialorder %v4523_v20, 0.0  ;;  %1832 = vmatmul.mubr.bf16.gmra.mrb[76].mxu1 %v1500_v48  ;;  %v1505_v55 = vpack.c.bf16 %v1445_v4, %v1442_v22  ;;  %v3390_v59 = vpop.eup %3389 }
 0x1a6   : > { %v1508_v57 = vpack.c.bf16 %v1451_v27, %v1448_v58  ;;  %v4646_v41 = vadd.f32 %v4358_v45, %v3707_v7  ;;  %v2651_v60 = vadd.f32 -1.0, %v3382_v24  ;;  %vm966_vm5 = vcmp.gt.f32.partialorder %v4519_v30, 0.0 }
 0x1a7   : > { %vm969_vm6 = vcmp.gt.f32.partialorder %v4531_v6, 0.0  ;;  %vm970_vm7 = vcmp.gt.f32.partialorder %v4550_v50, 0.0  ;;  %3397 = vpow2.f32 %v1256_v34  ;;  %v4653_v10 = vadd.f32 %v4939_v29, %v3714_v11  ;;  %3126 = vmatprep.mubr.bf16.mxu0 %v1505_v55 }
 0x1a8   : > { %v4657_v5 = vadd.f32 %v4940_v33, %v3707_v7  ;;  %v2640_v26 = vadd.f32 -1.0, %v3384_v52  ;;  %v1074_v45 = vmin.f32 %v4646_v41, 0.0  ;;  %v1444_v49 = vsel %vm964_vm12, %v4476_v53, %v2638_v37  ;;  %3127 = vmatmul.mubr.bf16.gmra.mrb[88].mxu0 %v1508_v57 }
 0x1a9   : > { %v4665_v0 = vadd.f32 %v4387_v12, %v3714_v11  ;;  %v2641_v32 = vadd.f32 -1.0, %v3386_v21  ;;  %v2643_v23 = vadd.f32 -1.0, %v3388_v31  ;;  %v1075_v42 = vmin.f32 %v4653_v10, 0.0 }
 0x1aa   : > { %v1441_v7 = vsel %vm961_vm13, %v4452_v35, %v4595_v9  ;;  %v2644_v62 = vadd.f32 -1.0, %v3390_v59  ;;  %v1260_v47 = vmul.f32 1.442695, %v1074_v45  ;;  %v1077_v46 = vmin.f32 %v4657_v5, 0.0 }
 0x1ab   : > { %v1504_v36 = vpack.c.bf16 %v1444_v49, %v1441_v7  ;;  %v1262_v53 = vmul.f32 1.442695, %v1075_v42  ;;  %v1078_v2 = vmin.f32 %v4665_v0, 0.0  ;;  %v1440_v11 = vsel %vm960_vm15, %v4446_v8, %v4593_v25  ;;  %v3392_v14 = vpop.eup %3391 }
 0x1ac   : > { %v1443_v12 = vsel %vm963_vm0, %v4457_v56, %v4608_v1  ;;  %3399 = vpow2.f32 %v1260_v47  ;;  %v1266_v35 = vmul.f32 1.442695, %v1077_v46  ;;  %v1454_v28 = vsel %vm974_vm14, %v4495_v44, %v2648_v18  ;;  %v3394_v39 = vpop.eup %3393 }
 0x1ad   : > { %1839 = vmatprep.mubr.bf16.mxu1 %v1504_v36  ;;  %v1503_v9 = vpack.c.bf16 %v1443_v12, %v1440_v11  ;;  %v2646_v24 = vadd.f32 -1.0, %v3392_v14  ;;  %3401 = vpow2.f32 %v1262_v53  ;;  %v1268_v37 = vmul.f32 1.442695, %v1078_v2  ;;  %v3396_v25 = vpop.eup %3395 }
 0x1ae   : > { %v1457_v8 = vsel %vm977_vm1, %v4505_v40, %v2651_v60  ;;  %v2647_v54 = vadd.f32 -1.0, %v3394_v39  ;;  %3403 = vpow2.f32 %v1266_v35  ;;  %v1460_v1 = vsel %vm980_vm2, %v4490_v3, %v4623_v15 }
 0x1af   : > { %1840 = vmatmul.mubr.bf16.gmra.mrb[80].mxu1 %v1503_v9  ;;  %v1511_v56 = vpack.c.bf16 %v1457_v8, %v1454_v28  ;;  %v2649_v38 = vadd.f32 -1.0, %v3396_v25  ;;  %3405 = vpow2.f32 %v1268_v37  ;;  %v1463_v44 = vsel %vm983_vm3, %v4499_v43, %v2657_v16 }
 0x1b0   : > { %v1447_v40 = vsel %vm967_vm4, %v4523_v20, %v2641_v32  ;;  %v1514_v52 = vpack.c.bf16 %v1463_v44, %v1460_v1  ;;  %v1450_v17 = vsel %vm970_vm7, %v4550_v50, %v2644_v62  ;;  %v1446_v3 = vsel %vm966_vm5, %v4519_v30, %v2640_v26  ;;  %v4726_v26 = vld [vmem:[%s4913_s4] ss:$0 sm:$0xff] }
 0x1b1   : > { %3130 = vmatprep.mubr.bf16.mxu0 %v1511_v56  ;;  %v1449_v15 = vsel %vm969_vm6, %v4531_v6, %v2643_v23  ;;  %v3398_v63 = vpop.eup %3397  ;;  %vm972_vm8 = vcmp.gt.f32.partialorder %v4582_v13, 0.0  ;;  %vm975_vm9 = vcmp.gt.f32.partialorder %v4590_v51, 0.0  ;;  %v1507_v43 = vpack.c.bf16 %v1450_v17, %v1447_v40 }
 0x1b2   : > { %v1506_v20 = vpack.c.bf16 %v1449_v15, %v1446_v3  ;;  %v2650_v21 = vadd.f32 -1.0, %v3398_v63  ;;  %3131 = vmatmul.mubr.bf16.gmra.mrb[92].mxu0 %v1514_v52  ;;  %v1452_v18 = vsel %vm972_vm8, %v4582_v13, %v2646_v24  ;;  %v1455_v50 = vsel %vm975_vm9, %v4590_v51, %v2649_v38  ;;  %v4735_v38 = vld [vmem:[%s4913_s4 + $0x1] ss:$0 sm:$0xff] }
 0x1b3   : > { %vm973_vm10 = vcmp.gt.f32.partialorder %v4586_v61, 0.0  ;;  %vm976_vm11 = vcmp.gt.f32.partialorder %v4613_v19, 0.0  ;;  %1847 = vmatprep.mubr.bf16.mxu1 %v1507_v43  ;;  %v1509_v30 = vpack.c.bf16 %v1455_v50, %v1452_v18  ;;  %vm978_vm12 = vcmp.gt.f32.partialorder %v4646_v41, 0.0 }
 0x1b4   : > { %v1453_v6 = vsel %vm973_vm10, %v4586_v61, %v2647_v54  ;;  %v1456_v48 = vsel %vm976_vm11, %v4613_v19, %v2650_v21  ;;  %vm981_vm13 = vcmp.gt.f32.partialorder %v4657_v5, 0.0  ;;  %vm979_vm14 = vcmp.gt.f32.partialorder %v4653_v10, 0.0 }
 0x1b5   : > { %v1510_v22 = vpack.c.bf16 %v1456_v48, %v1453_v6  ;;  %vm982_vm15 = vcmp.gt.f32.partialorder %v4665_v0, 0.0 }
 0x1b6   : > { %v3400_v31 = vpop.eup %3399 }
 0x1b7   : > { %1848 = vmatmul.mubr.bf16.gmra.mrb[84].mxu1 %v1506_v20  ;;  %v3402_v34 = vpop.eup %3401  ;;  %v2652_v4 = vadd.f32 -1.0, %v3400_v31 }
 0x1b8   : > { %1855 = vmatprep.mubr.bf16.mxu1 %v1510_v22  ;;  %v3404_v58 = vpop.eup %3403  ;;  %v2653_v13 = vadd.f32 -1.0, %v3402_v34 }
 0x1b9   : > { %v3406_v27 = vpop.eup %3405  ;;  %v2655_v51 = vadd.f32 -1.0, %v3404_v58  ;;  %v1458_v61 = vsel %vm978_vm12, %v4646_v41, %v2652_v4 }
 0x1ba   : > { %v2656_v16 = vadd.f32 -1.0, %v3406_v27  ;;  %v1459_v55 = vsel %vm979_vm14, %v4653_v10, %v2653_v13 }
 0x1bb   : > { %v1461_v19 = vsel %vm981_vm13, %v4657_v5, %v2655_v51 }
 0x1bc   : > { %v1462_v57 = vsel %vm982_vm15, %v4665_v0, %v2656_v16  ;;  %v1512_v60 = vpack.c.bf16 %v1461_v19, %v1458_v61 }
 0x1bd   : > { %v1513_v29 = vpack.c.bf16 %v1462_v57, %v1459_v55 }
 0x1bf   : > { %1856 = vmatmul.mubr.bf16.gmra.mrb[88].mxu1 %v1509_v30  ;;  %v4741_v30 = vld [vmem:[%s4913_s4 + $0x2] ss:$0 sm:$0xff] }
 0x1c0   : > { %1863 = vmatprep.mubr.bf16.mxu1 %v1513_v29 }
 0x1c7   : > { %1864 = vmatmul.mubr.bf16.gmra.mrb[92].mxu1 %v1512_v60 }
 0x1f3   : > { %v2918_v33 = vpop.f32.mrb[32].mxu1 }
 0x1f4   : > { %v2919_v59 = vpop.f32.mrb[33].mxu1 }
 0x1f5   : > { %v2920_v45 = vadd.f32 %v2919_v59, %v2918_v33  ;;  %v2921_v41 = vpop.f32.mrb[34].mxu1 }
 0x1f6   : > { %v2922_v49 = vpop.f32.mrb[35].mxu1  ;;  %v3104_v5 = vpop.f32.mrb[64].mxu0 }
 0x1f7   : > { %v2923_v32 = vadd.f32 %v2922_v49, %v2921_v41  ;;  %v1746_v10 = vadd.f32 %v2920_v45, %v4726_v26  ;;  %v1906_v0 = vpop.f32.mrb[65].mxu0 }
 0x1f8   : > { %v3105_v23 = vpop.f32.mrb[66].mxu0 }
 0x1f9   : > { %v1907_v42 = vadd.f32 %v1906_v0, %v1746_v10  ;;  %v1749_v7 = vadd.f32 %v2923_v32, %v4726_v26  ;;  %v1909_v62 = vpop.f32.mrb[67].mxu0 }
 0x1fb   : > { %v2065_v47 = vmin.f32 %v1907_v42, 0.0  ;;  %v1910_v46 = vadd.f32 %v1909_v62, %v1749_v7  ;;  %vm2033_vm0 = vcmp.gt.f32.partialorder %v1907_v42, 0.0 }
 0x1fc   : > { %v2924_v2 = vpop.f32.mrb[36].mxu1 }
 0x1fd   : > { %v2097_v36 = vmul.f32 1.442695, %v2065_v47  ;;  %v2066_v53 = vmin.f32 %v1910_v46, 0.0  ;;  %v2925_v12 = vpop.f32.mrb[37].mxu1  ;;  %vm2034_vm1 = vcmp.gt.f32.partialorder %v1910_v46, 0.0 }
 0x1fe   : > { %v2926_v14 = vadd.f32 %v2925_v12, %v2924_v2  ;;  %v2927_v35 = vpop.f32.mrb[38].mxu1 }
 0x1ff   : > { %3407 = vpow2.f32 %v2097_v36  ;;  %v2099_v11 = vmul.f32 1.442695, %v2066_v53  ;;  %v2928_v9 = vpop.f32.mrb[39].mxu1 }
 0x200   : > { %v1754_v28 = vadd.f32 %v2926_v14, %v4726_v26  ;;  %v2929_v39 = vadd.f32 %v2928_v9, %v2927_v35 }
 0x201   : > { %3409 = vpow2.f32 %v2099_v11 }
 0x202   : > { %v1915_v24 = vadd.f32 %v3104_v5, %v1754_v28  ;;  %v1757_v37 = vadd.f32 %v2929_v39, %v4726_v26 }
 0x204   : > { %v2067_v8 = vmin.f32 %v1915_v24, 0.0  ;;  %v1918_v25 = vadd.f32 %v3105_v23, %v1757_v37  ;;  %vm2035_vm2 = vcmp.gt.f32.partialorder %v1915_v24, 0.0 }
 0x206   : > { %v2101_v54 = vmul.f32 1.442695, %v2067_v8  ;;  %v2068_v56 = vmin.f32 %v1918_v25, 0.0  ;;  %vm2036_vm3 = vcmp.gt.f32.partialorder %v1918_v25, 0.0 }
 0x208   : > { %3411 = vpow2.f32 %v2101_v54  ;;  %v2103_v40 = vmul.f32 1.442695, %v2068_v56 }
 0x209   : > { %v3408_v1 = vpop.eup %3407 }
 0x20a   : > { %v2683_v44 = vadd.f32 -1.0, %v3408_v1  ;;  %3413 = vpow2.f32 %v2103_v40 }
 0x20b   : > { %v2930_v52 = vpop.f32.mrb[40].mxu1  ;;  %v3410_v17 = vpop.eup %3409 }
 0x20c   : > { %v2931_v3 = vpop.f32.mrb[41].mxu1  ;;  %v2193_v15 = vsel %vm2033_vm0, %v1907_v42, %v2683_v44  ;;  %v2684_v63 = vadd.f32 -1.0, %v3410_v17 }
 0x20d   : > { %v2932_v43 = vadd.f32 %v2931_v3, %v2930_v52  ;;  %v2933_v20 = vpop.f32.mrb[42].mxu1  ;;  %v2229_v21 = vmul.f32 %v4735_v38, %v2193_v15 }
 0x20e   : > { %v2934_v18 = vpop.f32.mrb[43].mxu1  ;;  %v3108_v50 = vpop.f32.mrb[68].mxu0  ;;  %v2194_v6 = vsel %vm2034_vm1, %v1910_v46, %v2684_v63 }
 0x20f   : > { %v2935_v48 = vadd.f32 %v2934_v18, %v2933_v20  ;;  %v1762_v22 = vadd.f32 %v2932_v43, %v4726_v26  ;;  %v1922_v31 = vpop.f32.mrb[69].mxu0  ;;  %v2230_v34 = vmul.f32 %v4735_v38, %v2194_v6  ;;  %v2265_v51 = vadd.f32 %v4741_v30, %v2229_v21 }
 0x210   : > { %v3109_v4 = vpop.f32.mrb[70].mxu0 }
 0x211   : > { %v1923_v58 = vadd.f32 %v1922_v31, %v1762_v22  ;;  %v1765_v13 = vadd.f32 %v2935_v48, %v4726_v26  ;;  %v1925_v27 = vpop.f32.mrb[71].mxu0  ;;  %v2266_v16 = vadd.f32 %v4741_v30, %v2230_v34 }
 0x212   : > { %v3412_v60 = vpop.eup %3411 }
 0x213   : > { %v2069_v61 = vmin.f32 %v1923_v58, 0.0  ;;  %v1926_v19 = vadd.f32 %v1925_v27, %v1765_v13  ;;  %v2786_v55 = vpack.c.bf16 %v2266_v16, %v2265_v51  ;;  %v2936_v57 = vpop.f32.mrb[44].mxu1  ;;  %v2685_v45 = vadd.f32 -1.0, %v3412_v60 }
 0x214   : > { %v2937_v59 = vpop.f32.mrb[45].mxu1  ;;  %v3414_v5 = vpop.eup %3413  ;;  %vm2037_vm4 = vcmp.gt.f32.partialorder %v1923_v58, 0.0 }
 0x215   : > { %v2105_v29 = vmul.f32 1.442695, %v2069_v61  ;;  %v2070_v33 = vmin.f32 %v1926_v19, 0.0  ;;  %2787 = vst [vmem:[%s4753_s19] sm:$0xff] %v2786_v55   ;;  %v2938_v41 = vadd.f32 %v2937_v59, %v2936_v57  ;;  %v2939_v49 = vpop.f32.mrb[46].mxu1  ;;  %v2195_v0 = vsel %vm2035_vm2, %v1915_v24, %v2685_v45 }
 0x216   : > { %v2940_v10 = vpop.f32.mrb[47].mxu1  ;;  %v2686_v23 = vadd.f32 -1.0, %v3414_v5  ;;  %v2231_v62 = vmul.f32 %v4735_v38, %v2195_v0  ;;  %vm2038_vm5 = vcmp.gt.f32.partialorder %v1926_v19, 0.0 }
 0x217   : > { %3415 = vpow2.f32 %v2105_v29  ;;  %v2107_v32 = vmul.f32 1.442695, %v2070_v33  ;;  %v1770_v42 = vadd.f32 %v2938_v41, %v4726_v26  ;;  %v2941_v7 = vadd.f32 %v2940_v10, %v2939_v49 }
 0x218   : > { %v2196_v47 = vsel %vm2036_vm3, %v1918_v25, %v2686_v23  ;;  %v2267_v12 = vadd.f32 %v4741_v30, %v2231_v62 }
 0x219   : > { %3417 = vpow2.f32 %v2107_v32  ;;  %v1931_v46 = vadd.f32 %v3108_v50, %v1770_v42  ;;  %v1773_v36 = vadd.f32 %v2941_v7, %v4726_v26  ;;  %v2232_v53 = vmul.f32 %v4735_v38, %v2196_v47 }
 0x21b   : > { %v2071_v2 = vmin.f32 %v1931_v46, 0.0  ;;  %v1934_v11 = vadd.f32 %v3109_v4, %v1773_v36  ;;  %v2268_v14 = vadd.f32 %v4741_v30, %v2232_v53  ;;  %vm2039_vm6 = vcmp.gt.f32.partialorder %v1931_v46, 0.0 }
 0x21d   : > { %v2109_v35 = vmul.f32 1.442695, %v2071_v2  ;;  %v2072_v9 = vmin.f32 %v1934_v11, 0.0  ;;  %v2791_v28 = vpack.c.bf16 %v2268_v14, %v2267_v12  ;;  %vm2040_vm7 = vcmp.gt.f32.partialorder %v1934_v11, 0.0 }
 0x21f   : > { %3419 = vpow2.f32 %v2109_v35  ;;  %v2111_v39 = vmul.f32 1.442695, %v2072_v9  ;;  %2863 = vst [vmem:[%s4753_s19 + $0x8] sm:$0xff] %v2791_v28  }
 0x220   : > { %v2942_v8 = vpop.f32.mrb[48].mxu1 }
 0x221   : > { %v3416_v24 = vpop.eup %3415  ;;  %3421 = vpow2.f32 %v2111_v39  ;;  %v2943_v54 = vpop.f32.mrb[49].mxu1 }
 0x222   : > { %v2687_v37 = vadd.f32 -1.0, %v3416_v24  ;;  %v2944_v44 = vadd.f32 %v2943_v54, %v2942_v8  ;;  %v2945_v40 = vpop.f32.mrb[50].mxu1  ;;  %v3112_v52 = vpop.f32.mrb[72].mxu0 }
 0x223   : > { %v3418_v25 = vpop.eup %3417  ;;  %v2946_v3 = vpop.f32.mrb[51].mxu1 }
 0x224   : > { %v2197_v56 = vsel %vm2037_vm4, %v1923_v58, %v2687_v37  ;;  %v2688_v1 = vadd.f32 -1.0, %v3418_v25  ;;  %v1938_v15 = vpop.f32.mrb[73].mxu0  ;;  %v2947_v43 = vadd.f32 %v2946_v3, %v2945_v40  ;;  %v1778_v20 = vadd.f32 %v2944_v44, %v4726_v26 }
 0x225   : > { %v2233_v17 = vmul.f32 %v4735_v38, %v2197_v56  ;;  %v3113_v21 = vpop.f32.mrb[74].mxu0 }
 0x226   : > { %v2198_v63 = vsel %vm2038_vm5, %v1926_v19, %v2688_v1  ;;  %v1941_v50 = vpop.f32.mrb[75].mxu0  ;;  %v1939_v6 = vadd.f32 %v1938_v15, %v1778_v20  ;;  %v1781_v48 = vadd.f32 %v2947_v43, %v4726_v26 }
 0x227   : > { %v2234_v18 = vmul.f32 %v4735_v38, %v2198_v63  ;;  %v2269_v22 = vadd.f32 %v4741_v30, %v2233_v17 }
 0x228   : > { %v2073_v4 = vmin.f32 %v1939_v6, 0.0  ;;  %v1942_v58 = vadd.f32 %v1941_v50, %v1781_v48  ;;  %vm2041_vm8 = vcmp.gt.f32.partialorder %v1939_v6, 0.0 }
 0x229   : > { %v2270_v31 = vadd.f32 %v4741_v30, %v2234_v18  ;;  %v3420_v34 = vpop.eup %3419  ;;  %v2948_v19 = vpop.f32.mrb[52].mxu1 }
 0x22a   : > { %v2689_v27 = vadd.f32 -1.0, %v3420_v34  ;;  %v2113_v16 = vmul.f32 1.442695, %v2073_v4  ;;  %v2074_v61 = vmin.f32 %v1942_v58, 0.0  ;;  %v2949_v60 = vpop.f32.mrb[53].mxu1  ;;  %vm2042_vm9 = vcmp.gt.f32.partialorder %v1942_v58, 0.0 }
 0x22b   : > { %v2796_v13 = vpack.c.bf16 %v2270_v31, %v2269_v22  ;;  %v3422_v51 = vpop.eup %3421  ;;  %v2950_v59 = vadd.f32 %v2949_v60, %v2948_v19  ;;  %v2951_v45 = vpop.f32.mrb[54].mxu1 }
 0x22c   : > { %v2199_v55 = vsel %vm2039_vm6, %v1931_v46, %v2689_v27  ;;  %v2690_v57 = vadd.f32 -1.0, %v3422_v51  ;;  %3423 = vpow2.f32 %v2113_v16  ;;  %v2115_v33 = vmul.f32 1.442695, %v2074_v61  ;;  %v2952_v49 = vpop.f32.mrb[55].mxu1 }
 0x22d   : > { %2864 = vst [vmem:[%s4753_s19 + $0x10] sm:$0xff] %v2796_v13   ;;  %v2235_v29 = vmul.f32 %v4735_v38, %v2199_v55  ;;  %v1786_v32 = vadd.f32 %v2950_v59, %v4726_v26  ;;  %v2953_v10 = vadd.f32 %v2952_v49, %v2951_v45 }
 0x22e   : > { %v2200_v41 = vsel %vm2040_vm7, %v1934_v11, %v2690_v57  ;;  %3425 = vpow2.f32 %v2115_v33 }
 0x22f   : > { %v2236_v5 = vmul.f32 %v4735_v38, %v2200_v41  ;;  %v2271_v0 = vadd.f32 %v4741_v30, %v2235_v29  ;;  %v1947_v42 = vadd.f32 %v3112_v52, %v1786_v32  ;;  %v1789_v7 = vadd.f32 %v2953_v10, %v4726_v26 }
 0x231   : > { %v2272_v23 = vadd.f32 %v4741_v30, %v2236_v5  ;;  %v2075_v47 = vmin.f32 %v1947_v42, 0.0  ;;  %v1950_v46 = vadd.f32 %v3113_v21, %v1789_v7  ;;  %vm2043_vm10 = vcmp.gt.f32.partialorder %v1947_v42, 0.0 }
 0x233   : > { %v2801_v62 = vpack.c.bf16 %v2272_v23, %v2271_v0  ;;  %v2117_v36 = vmul.f32 1.442695, %v2075_v47  ;;  %v2076_v53 = vmin.f32 %v1950_v46, 0.0  ;;  %vm2044_vm11 = vcmp.gt.f32.partialorder %v1950_v46, 0.0 }
 0x235   : > { %2865 = vst [vmem:[%s4753_s19 + $0x18] sm:$0xff] %v2801_v62   ;;  %3427 = vpow2.f32 %v2117_v36  ;;  %v2119_v12 = vmul.f32 1.442695, %v2076_v53 }
 0x236   : > { %v3424_v2 = vpop.eup %3423  ;;  %v2954_v14 = vpop.f32.mrb[56].mxu1 }
 0x237   : > { %v2691_v11 = vadd.f32 -1.0, %v3424_v2  ;;  %v2955_v9 = vpop.f32.mrb[57].mxu1  ;;  %3429 = vpow2.f32 %v2119_v12 }
 0x238   : > { %v3426_v35 = vpop.eup %3425  ;;  %v2956_v24 = vadd.f32 %v2955_v9, %v2954_v14  ;;  %v2957_v37 = vpop.f32.mrb[58].mxu1 }
 0x239   : > { %v2201_v28 = vsel %vm2041_vm8, %v1939_v6, %v2691_v11  ;;  %v2692_v39 = vadd.f32 -1.0, %v3426_v35  ;;  %v3116_v8 = vpop.f32.mrb[76].mxu0  ;;  %v2958_v54 = vpop.f32.mrb[59].mxu1 }
 0x23a   : > { %v2237_v25 = vmul.f32 %v4735_v38, %v2201_v28  ;;  %v1954_v56 = vpop.f32.mrb[77].mxu0  ;;  %v2959_v44 = vadd.f32 %v2958_v54, %v2957_v37  ;;  %v1794_v40 = vadd.f32 %v2956_v24, %v4726_v26 }
 0x23b   : > { %v2202_v1 = vsel %vm2042_vm9, %v1942_v58, %v2692_v39  ;;  %v3117_v52 = vpop.f32.mrb[78].mxu0 }
 0x23c   : > { %v2238_v17 = vmul.f32 %v4735_v38, %v2202_v1  ;;  %v1957_v3 = vpop.f32.mrb[79].mxu0  ;;  %v1955_v15 = vadd.f32 %v1954_v56, %v1794_v40  ;;  %v1797_v63 = vadd.f32 %v2959_v44, %v4726_v26  ;;  %v2273_v43 = vadd.f32 %v4741_v30, %v2237_v25 }
 0x23e   : > { %v2274_v20 = vadd.f32 %v4741_v30, %v2238_v17  ;;  %v2077_v21 = vmin.f32 %v1955_v15, 0.0  ;;  %v1958_v18 = vadd.f32 %v1957_v3, %v1797_v63  ;;  %vm2045_vm12 = vcmp.gt.f32.partialorder %v1955_v15, 0.0 }
 0x23f   : > { %v3428_v50 = vpop.eup %3427  ;;  %v2960_v48 = vpop.f32.mrb[60].mxu1 }
 0x240   : > { %v2806_v6 = vpack.c.bf16 %v2274_v20, %v2273_v43  ;;  %v2693_v22 = vadd.f32 -1.0, %v3428_v50  ;;  %v2121_v31 = vmul.f32 1.442695, %v2077_v21  ;;  %v2078_v34 = vmin.f32 %v1958_v18, 0.0  ;;  %v2961_v4 = vpop.f32.mrb[61].mxu1 }
 0x241   : > { %v2962_v58 = vadd.f32 %v2961_v4, %v2960_v48  ;;  %v2963_v13 = vpop.f32.mrb[62].mxu1  ;;  %v3430_v27 = vpop.eup %3429  ;;  %vm2046_vm13 = vcmp.gt.f32.partialorder %v1958_v18, 0.0 }
 0x242   : > { %2866 = vst [vmem:[%s4753_s19 + $0x20] sm:$0xff] %v2806_v6   ;;  %v2203_v51 = vsel %vm2043_vm10, %v1947_v42, %v2693_v22  ;;  %3431 = vpow2.f32 %v2121_v31  ;;  %v2123_v16 = vmul.f32 1.442695, %v2078_v34  ;;  %v2964_v61 = vpop.f32.mrb[63].mxu1  ;;  %v2694_v19 = vadd.f32 -1.0, %v3430_v27 }
 0x243   : > { %v1802_v55 = vadd.f32 %v2962_v58, %v4726_v26  ;;  %v2965_v57 = vadd.f32 %v2964_v61, %v2963_v13  ;;  %v2239_v60 = vmul.f32 %v4735_v38, %v2203_v51 }
 0x244   : > { %3433 = vpow2.f32 %v2123_v16  ;;  %v2204_v29 = vsel %vm2044_vm11, %v1950_v46, %v2694_v19 }
 0x245   : > { %v1963_v33 = vadd.f32 %v3116_v8, %v1802_v55  ;;  %v1805_v59 = vadd.f32 %v2965_v57, %v4726_v26  ;;  %v2240_v45 = vmul.f32 %v4735_v38, %v2204_v29  ;;  %v2275_v5 = vadd.f32 %v4741_v30, %v2239_v60 }
 0x247   : > { %v2079_v41 = vmin.f32 %v1963_v33, 0.0  ;;  %v1966_v49 = vadd.f32 %v3117_v52, %v1805_v59  ;;  %v2276_v32 = vadd.f32 %v4741_v30, %v2240_v45  ;;  %vm2047_vm14 = vcmp.gt.f32.partialorder %v1963_v33, 0.0 }
 0x249   : > { %v2125_v10 = vmul.f32 1.442695, %v2079_v41  ;;  %v2080_v0 = vmin.f32 %v1966_v49, 0.0  ;;  %v2811_v23 = vpack.c.bf16 %v2276_v32, %v2275_v5  ;;  %vm2048_vm15 = vcmp.gt.f32.partialorder %v1966_v49, 0.0 }
 0x24b   : > { %3435 = vpow2.f32 %v2125_v10  ;;  %v2127_v42 = vmul.f32 1.442695, %v2080_v0  ;;  %2867 = vst [vmem:[%s4753_s19 + $0x28] sm:$0xff] %v2811_v23   ;;  %v2966_v62 = vpop.f32.mrb[64].mxu1 }
 0x24c   : > { %v3432_v7 = vpop.eup %3431  ;;  %v2967_v46 = vpop.f32.mrb[65].mxu1 }
 0x24d   : > { %v2695_v47 = vadd.f32 -1.0, %v3432_v7  ;;  %3437 = vpow2.f32 %v2127_v42  ;;  %v2968_v53 = vadd.f32 %v2967_v46, %v2966_v62  ;;  %v2969_v2 = vpop.f32.mrb[66].mxu1 }
 0x24e   : > { %v3434_v36 = vpop.eup %3433  ;;  %v2970_v14 = vpop.f32.mrb[67].mxu1 }
 0x24f   : > { %v2205_v11 = vsel %vm2045_vm12, %v1955_v15, %v2695_v47  ;;  %v2696_v12 = vadd.f32 -1.0, %v3434_v36  ;;  %v2971_v9 = vadd.f32 %v2970_v14, %v2969_v2  ;;  %v1810_v24 = vadd.f32 %v2968_v53, %v4726_v26 }
 0x250   : > { %v2241_v35 = vmul.f32 %v4735_v38, %v2205_v11 }
 0x251   : > { %v2206_v28 = vsel %vm2046_vm13, %v1958_v18, %v2696_v12  ;;  %v1813_v1 = vadd.f32 %v2971_v9, %v4726_v26 }
 0x252   : > { %v2242_v39 = vmul.f32 %v4735_v38, %v2206_v28  ;;  %v2277_v37 = vadd.f32 %v4741_v30, %v2241_v35 }
 0x254   : > { %v2278_v8 = vadd.f32 %v4741_v30, %v2242_v39 }
 0x255   : > { %v3436_v54 = vpop.eup %3435 }
 0x256   : > { %v3120_v25 = vpop.f32.mrb[80].mxu0  ;;  %v2816_v44 = vpack.c.bf16 %v2278_v8, %v2277_v37  ;;  %v2697_v40 = vadd.f32 -1.0, %v3436_v54 }
 0x257   : > { %v1970_v56 = vpop.f32.mrb[81].mxu0  ;;  %v3438_v3 = vpop.eup %3437 }
 0x258   : > { %v1971_v52 = vadd.f32 %v1970_v56, %v1810_v24  ;;  %v3121_v17 = vpop.f32.mrb[82].mxu0  ;;  %2868 = vst [vmem:[%s4753_s19 + $0x30] sm:$0xff] %v2816_v44   ;;  %v2207_v63 = vsel %vm2047_vm14, %v1963_v33, %v2697_v40  ;;  %v2698_v43 = vadd.f32 -1.0, %v3438_v3 }
 0x259   : > { %v1973_v15 = vpop.f32.mrb[83].mxu0  ;;  %v2243_v21 = vmul.f32 %v4735_v38, %v2207_v63 }
 0x25a   : > { %v2081_v20 = vmin.f32 %v1971_v52, 0.0  ;;  %v1974_v18 = vadd.f32 %v1973_v15, %v1813_v1  ;;  %v2208_v50 = vsel %vm2048_vm15, %v1966_v49, %v2698_v43  ;;  %vm2049_vm0 = vcmp.gt.f32.partialorder %v1971_v52, 0.0 }
 0x25b   : > { %v2244_v48 = vmul.f32 %v4735_v38, %v2208_v50  ;;  %v2279_v4 = vadd.f32 %v4741_v30, %v2243_v21 }
 0x25c   : > { %v2129_v6 = vmul.f32 1.442695, %v2081_v20  ;;  %v2082_v22 = vmin.f32 %v1974_v18, 0.0  ;;  %vm2050_vm1 = vcmp.gt.f32.partialorder %v1974_v18, 0.0 }
 0x25d   : > { %v2972_v31 = vpop.f32.mrb[68].mxu1  ;;  %v2280_v58 = vadd.f32 %v4741_v30, %v2244_v48 }
 0x25e   : > { %3439 = vpow2.f32 %v2129_v6  ;;  %v2973_v34 = vpop.f32.mrb[69].mxu1  ;;  %v2131_v13 = vmul.f32 1.442695, %v2082_v22 }
 0x25f   : > { %v2974_v27 = vadd.f32 %v2973_v34, %v2972_v31  ;;  %v2975_v51 = vpop.f32.mrb[70].mxu1  ;;  %v2821_v61 = vpack.c.bf16 %v2280_v58, %v2279_v4 }
 0x260   : > { %v2976_v16 = vpop.f32.mrb[71].mxu1  ;;  %3441 = vpow2.f32 %v2131_v13 }
 0x261   : > { %v1818_v19 = vadd.f32 %v2974_v27, %v4726_v26  ;;  %v2977_v55 = vadd.f32 %v2976_v16, %v2975_v51  ;;  %2869 = vst [vmem:[%s4753_s19 + $0x38] sm:$0xff] %v2821_v61  }
 0x263   : > { %v1979_v57 = vadd.f32 %v3120_v25, %v1818_v19  ;;  %v1821_v60 = vadd.f32 %v2977_v55, %v4726_v26 }
 0x265   : > { %v2083_v29 = vmin.f32 %v1979_v57, 0.0  ;;  %v1982_v33 = vadd.f32 %v3121_v17, %v1821_v60  ;;  %vm2051_vm2 = vcmp.gt.f32.partialorder %v1979_v57, 0.0 }
 0x267   : > { %v2133_v59 = vmul.f32 1.442695, %v2083_v29  ;;  %v2084_v45 = vmin.f32 %v1982_v33, 0.0  ;;  %vm2052_vm3 = vcmp.gt.f32.partialorder %v1982_v33, 0.0 }
 0x268   : > { %v3440_v41 = vpop.eup %3439 }
 0x269   : > { %v2699_v49 = vadd.f32 -1.0, %v3440_v41  ;;  %3443 = vpow2.f32 %v2133_v59  ;;  %v2135_v5 = vmul.f32 1.442695, %v2084_v45 }
 0x26a   : > { %v3442_v10 = vpop.eup %3441 }
 0x26b   : > { %v2209_v0 = vsel %vm2049_vm0, %v1971_v52, %v2699_v49  ;;  %3445 = vpow2.f32 %v2135_v5  ;;  %v2700_v42 = vadd.f32 -1.0, %v3442_v10 }
 0x26c   : > { %v2978_v32 = vpop.f32.mrb[72].mxu1  ;;  %v2245_v47 = vmul.f32 %v4735_v38, %v2209_v0 }
 0x26d   : > { %v2979_v23 = vpop.f32.mrb[73].mxu1  ;;  %v2210_v53 = vsel %vm2050_vm1, %v1974_v18, %v2700_v42 }
 0x26e   : > { %v2980_v7 = vadd.f32 %v2979_v23, %v2978_v32  ;;  %v2981_v62 = vpop.f32.mrb[74].mxu1  ;;  %v2246_v14 = vmul.f32 %v4735_v38, %v2210_v53  ;;  %v2281_v24 = vadd.f32 %v4741_v30, %v2245_v47 }
 0x26f   : > { %v2982_v46 = vpop.f32.mrb[75].mxu1  ;;  %v3124_v36 = vpop.f32.mrb[84].mxu0 }
 0x270   : > { %v2983_v2 = vadd.f32 %v2982_v46, %v2981_v62  ;;  %v1826_v11 = vadd.f32 %v2980_v7, %v4726_v26  ;;  %v1986_v12 = vpop.f32.mrb[85].mxu0  ;;  %v2282_v37 = vadd.f32 %v4741_v30, %v2246_v14 }
 0x271   : > { %v3125_v35 = vpop.f32.mrb[86].mxu0 }
 0x272   : > { %v4808_v9 = vadd.f32 %v1986_v12, %v1826_v11  ;;  %v1829_v28 = vadd.f32 %v2983_v2, %v4726_v26  ;;  %v1989_v39 = vpop.f32.mrb[87].mxu0  ;;  %v2826_v56 = vpack.c.bf16 %v2282_v37, %v2281_v24 }
 0x273   : > { %v3444_v54 = vpop.eup %3443 }
 0x274   : > { %v2085_v8 = vmin.f32 %v4808_v9, 0.0  ;;  %v4814_v25 = vadd.f32 %v1989_v39, %v1829_v28  ;;  %v2701_v1 = vadd.f32 -1.0, %v3444_v54  ;;  %2870 = vst [vmem:[%s4753_s19 + $0x40] sm:$0xff] %v2826_v56   ;;  %vm2053_vm4 = vcmp.gt.f32.partialorder %v4808_v9, 0.0 }
 0x275   : > { %v3446_v17 = vpop.eup %3445 }
 0x276   : > { %v2137_v44 = vmul.f32 1.442695, %v2085_v8  ;;  %v2086_v40 = vmin.f32 %v4814_v25, 0.0  ;;  %v2211_v15 = vsel %vm2051_vm2, %v1979_v57, %v2701_v1  ;;  %v2702_v63 = vadd.f32 -1.0, %v3446_v17 }
 0x277   : > { %v2247_v21 = vmul.f32 %v4735_v38, %v2211_v15  ;;  %vm2054_vm5 = vcmp.gt.f32.partialorder %v4814_v25, 0.0 }
 0x278   : > { %v2984_v52 = vpop.f32.mrb[76].mxu1  ;;  %3447 = vpow2.f32 %v2137_v44  ;;  %v2139_v43 = vmul.f32 1.442695, %v2086_v40  ;;  %v2212_v48 = vsel %vm2052_vm3, %v1982_v33, %v2702_v63 }
 0x279   : > { %v2985_v3 = vpop.f32.mrb[77].mxu1  ;;  %v2248_v34 = vmul.f32 %v4735_v38, %v2212_v48  ;;  %v2283_v51 = vadd.f32 %v4741_v30, %v2247_v21 }
 0x27a   : > { %v2987_v20 = vpop.f32.mrb[78].mxu1  ;;  %v2986_v18 = vadd.f32 %v2985_v3, %v2984_v52  ;;  %3449 = vpow2.f32 %v2139_v43 }
 0x27b   : > { %v2988_v50 = vpop.f32.mrb[79].mxu1  ;;  %v4819_v6 = vpop.f32.mrb[88].mxu0  ;;  %v2284_v16 = vadd.f32 %v4741_v30, %v2248_v34 }
 0x27c   : > { %v2989_v22 = vadd.f32 %v2988_v50, %v2987_v20  ;;  %v2002_v31 = vpop.f32.mrb[89].mxu0  ;;  %v1834_v4 = vadd.f32 %v2986_v18, %v4726_v26 }
 0x27d   : > { %v3129_v58 = vpop.f32.mrb[90].mxu0  ;;  %v2831_v57 = vpack.c.bf16 %v2284_v16, %v2283_v51 }
 0x27e   : > { %v1837_v13 = vadd.f32 %v2989_v22, %v4726_v26  ;;  %v2005_v27 = vpop.f32.mrb[91].mxu0  ;;  %v4826_v61 = vadd.f32 %v3124_v36, %v1834_v4 }
 0x27f   : > { %2871 = vst [vmem:[%s4753_s19 + $0x48] sm:$0xff] %v2831_v57  }
 0x280   : > { %v4828_v19 = vadd.f32 %v3125_v35, %v1837_v13  ;;  %v2087_v60 = vmin.f32 %v4826_v61, 0.0  ;;  %vm2055_vm6 = vcmp.gt.f32.partialorder %v4826_v61, 0.0 }
 0x282   : > { %v2990_v55 = vpop.f32.mrb[80].mxu1  ;;  %v2088_v33 = vmin.f32 %v4828_v19, 0.0  ;;  %v2141_v41 = vmul.f32 1.442695, %v2087_v60  ;;  %v3448_v5 = vpop.eup %3447  ;;  %vm2056_vm7 = vcmp.gt.f32.partialorder %v4828_v19, 0.0 }
 0x283   : > { %v2991_v29 = vpop.f32.mrb[81].mxu1  ;;  %v2703_v42 = vadd.f32 -1.0, %v3448_v5 }
 0x284   : > { %v2992_v59 = vadd.f32 %v2991_v29, %v2990_v55  ;;  %v2993_v45 = vpop.f32.mrb[82].mxu1  ;;  %v2143_v32 = vmul.f32 1.442695, %v2088_v33  ;;  %3451 = vpow2.f32 %v2141_v41  ;;  %v3450_v62 = vpop.eup %3449 }
 0x285   : > { %v2994_v49 = vpop.f32.mrb[83].mxu1  ;;  %v4834_v23 = vpop.f32.mrb[92].mxu0  ;;  %v2213_v53 = vsel %vm2053_vm4, %v4808_v9, %v2703_v42  ;;  %v2704_v2 = vadd.f32 -1.0, %v3450_v62 }
 0x286   : > { %v1842_v10 = vadd.f32 %v2992_v59, %v4726_v26  ;;  %v2995_v0 = vadd.f32 %v2994_v49, %v2993_v45  ;;  %v2018_v7 = vpop.f32.mrb[93].mxu0  ;;  %3453 = vpow2.f32 %v2143_v32  ;;  %v2249_v12 = vmul.f32 %v4735_v38, %v2213_v53 }
 0x287   : > { %v4840_v36 = vpop.f32.mrb[94].mxu0  ;;  %v2214_v39 = vsel %vm2054_vm5, %v4814_v25, %v2704_v2 }
 0x288   : > { %v4837_v47 = vadd.f32 %v2002_v31, %v1842_v10  ;;  %v1845_v46 = vadd.f32 %v2995_v0, %v4726_v26  ;;  %v2021_v11 = vpop.f32.mrb[95].mxu0  ;;  %v2250_v37 = vmul.f32 %v4735_v38, %v2214_v39  ;;  %v2285_v44 = vadd.f32 %v4741_v30, %v2249_v12 }
 0x28a   : > { %v2089_v14 = vmin.f32 %v4837_v47, 0.0  ;;  %v4846_v35 = vadd.f32 %v2005_v27, %v1845_v46  ;;  %v2996_v28 = vpop.f32.mrb[84].mxu1  ;;  %v2286_v40 = vadd.f32 %v4741_v30, %v2250_v37  ;;  %vm2057_vm8 = vcmp.gt.f32.partialorder %v4837_v47, 0.0 }
 0x28b   : > { %v2997_v24 = vpop.f32.mrb[85].mxu1 }
 0x28c   : > { %v2145_v8 = vmul.f32 1.442695, %v2089_v14  ;;  %v2999_v54 = vpop.f32.mrb[86].mxu1  ;;  %v2090_v9 = vmin.f32 %v4846_v35, 0.0  ;;  %v2998_v56 = vadd.f32 %v2997_v24, %v2996_v28  ;;  %v2836_v25 = vpack.c.bf16 %v2286_v40, %v2285_v44 }
 0x28d   : > { %v3000_v1 = vpop.f32.mrb[87].mxu1  ;;  %vm2058_vm9 = vcmp.gt.f32.partialorder %v4846_v35, 0.0 }
 0x28e   : > { %3455 = vpow2.f32 %v2145_v8  ;;  %v3001_v52 = vadd.f32 %v3000_v1, %v2999_v54  ;;  %v2147_v17 = vmul.f32 1.442695, %v2090_v9  ;;  %v1850_v3 = vadd.f32 %v2998_v56, %v4726_v26  ;;  %v3452_v63 = vpop.eup %3451  ;;  %2872 = vst [vmem:[%s4753_s19 + $0x50] sm:$0xff] %v2836_v25  }
 0x28f   : > { %v2705_v21 = vadd.f32 -1.0, %v3452_v63 }
 0x290   : > { %v1853_v15 = vadd.f32 %v3001_v52, %v4726_v26  ;;  %3457 = vpow2.f32 %v2147_v17  ;;  %v4856_v43 = vadd.f32 %v4819_v6, %v1850_v3  ;;  %v3454_v20 = vpop.eup %3453 }
 0x291   : > { %v2706_v48 = vadd.f32 -1.0, %v3454_v20  ;;  %v2215_v34 = vsel %vm2055_vm6, %v4826_v61, %v2705_v21 }
 0x292   : > { %v4859_v18 = vadd.f32 %v3129_v58, %v1853_v15  ;;  %v3002_v50 = vpop.f32.mrb[88].mxu1  ;;  %v2091_v22 = vmin.f32 %v4856_v43, 0.0  ;;  %v2251_v27 = vmul.f32 %v4735_v38, %v2215_v34  ;;  %vm2059_vm10 = vcmp.gt.f32.partialorder %v4856_v43, 0.0 }
 0x293   : > { %v3003_v31 = vpop.f32.mrb[89].mxu1  ;;  %v2216_v58 = vsel %vm2056_vm7, %v4828_v19, %v2706_v48 }
 0x294   : > { %v2092_v4 = vmin.f32 %v4859_v18, 0.0  ;;  %v3004_v6 = vadd.f32 %v3003_v31, %v3002_v50  ;;  %v3005_v13 = vpop.f32.mrb[90].mxu1  ;;  %v2149_v51 = vmul.f32 1.442695, %v2091_v22  ;;  %v2252_v55 = vmul.f32 %v4735_v38, %v2216_v58 }
 0x295   : > { %v3006_v16 = vpop.f32.mrb[91].mxu1  ;;  %v2287_v61 = vadd.f32 %v4741_v30, %v2251_v27  ;;  %vm2060_vm11 = vcmp.gt.f32.partialorder %v4859_v18, 0.0 }
 0x296   : > { %v2151_v57 = vmul.f32 1.442695, %v2092_v4  ;;  %v1858_v60 = vadd.f32 %v3004_v6, %v4726_v26  ;;  %v3007_v29 = vadd.f32 %v3006_v16, %v3005_v13  ;;  %3459 = vpow2.f32 %v2149_v51 }
 0x297   : > { %v2288_v59 = vadd.f32 %v4741_v30, %v2252_v55 }
 0x298   : > { %v3456_v33 = vpop.eup %3455  ;;  %3461 = vpow2.f32 %v2151_v57  ;;  %v2019_v45 = vadd.f32 %v2018_v7, %v1858_v60  ;;  %v1861_v41 = vadd.f32 %v3007_v29, %v4726_v26 }
 0x299   : > { %v2707_v19 = vadd.f32 -1.0, %v3456_v33  ;;  %v2841_v49 = vpack.c.bf16 %v2288_v59, %v2287_v61 }
 0x29a   : > { %v2093_v5 = vmin.f32 %v2019_v45, 0.0  ;;  %v2022_v32 = vadd.f32 %v2021_v11, %v1861_v41  ;;  %v3008_v10 = vpop.f32.mrb[92].mxu1  ;;  %v3458_v0 = vpop.eup %3457  ;;  %vm2061_vm12 = vcmp.gt.f32.partialorder %v2019_v45, 0.0 }
 0x29b   : > { %v2217_v42 = vsel %vm2057_vm8, %v4837_v47, %v2707_v19  ;;  %v3009_v62 = vpop.f32.mrb[93].mxu1  ;;  %2873 = vst [vmem:[%s4753_s19 + $0x58] sm:$0xff] %v2841_v49   ;;  %v2708_v46 = vadd.f32 -1.0, %v3458_v0 }
 0x29c   : > { %v2153_v53 = vmul.f32 1.442695, %v2093_v5  ;;  %v3011_v2 = vpop.f32.mrb[94].mxu1  ;;  %v2253_v12 = vmul.f32 %v4735_v38, %v2217_v42  ;;  %v2094_v7 = vmin.f32 %v2022_v32, 0.0  ;;  %v3010_v14 = vadd.f32 %v3009_v62, %v3008_v10 }
 0x29d   : > { %v3012_v28 = vpop.f32.mrb[95].mxu1  ;;  %v2218_v39 = vsel %vm2058_vm9, %v4846_v35, %v2708_v46  ;;  %vm2062_vm13 = vcmp.gt.f32.partialorder %v2022_v32, 0.0 }
 0x29e   : > { %3463 = vpow2.f32 %v2153_v53  ;;  %v3013_v11 = vadd.f32 %v3012_v28, %v3011_v2  ;;  %v2254_v24 = vmul.f32 %v4735_v38, %v2218_v39  ;;  %v2155_v37 = vmul.f32 1.442695, %v2094_v7 }
 0x29f   : > { %v1866_v47 = vadd.f32 %v3010_v14, %v4726_v26  ;;  %v2289_v9 = vadd.f32 %v4741_v30, %v2253_v12 }
 0x2a0   : > { %v1869_v8 = vadd.f32 %v3013_v11, %v4726_v26  ;;  %v3460_v54 = vpop.eup %3459  ;;  %v2290_v56 = vadd.f32 %v4741_v30, %v2254_v24  ;;  %3465 = vpow2.f32 %v2155_v37 }
 0x2a1   : > { %v2027_v1 = vadd.f32 %v4834_v23, %v1866_v47  ;;  %v2709_v35 = vadd.f32 -1.0, %v3460_v54 }
 0x2a2   : > { %v3462_v44 = vpop.eup %3461  ;;  %v2030_v40 = vadd.f32 %v4840_v36, %v1869_v8  ;;  %v2846_v52 = vpack.c.bf16 %v2290_v56, %v2289_v9 }
 0x2a3   : > { %v2710_v17 = vadd.f32 -1.0, %v3462_v44  ;;  %v2095_v3 = vmin.f32 %v2027_v1, 0.0  ;;  %v2219_v26 = vsel %vm2059_vm10, %v4856_v43, %v2709_v35  ;;  %vm2063_vm14 = vcmp.gt.f32.partialorder %v2027_v1, 0.0 }
 0x2a4   : > { %v2096_v25 = vmin.f32 %v2030_v40, 0.0  ;;  %2874 = vst [vmem:[%s4753_s19 + $0x60] sm:$0xff] %v2846_v52   ;;  %v2255_v15 = vmul.f32 %v4735_v38, %v2219_v26  ;;  %vm2064_vm15 = vcmp.gt.f32.partialorder %v2030_v40, 0.0 }
 0x2a5   : > { %v2220_v23 = vsel %vm2060_vm11, %v4859_v18, %v2710_v17  ;;  %v2157_v63 = vmul.f32 1.442695, %v2095_v3 }
 0x2a6   : > { %v2256_v20 = vmul.f32 %v4735_v38, %v2220_v23  ;;  %v2159_v36 = vmul.f32 1.442695, %v2096_v25  ;;  %v2291_v50 = vadd.f32 %v4741_v30, %v2255_v15 }
 0x2a7   : > { %3467 = vpow2.f32 %v2157_v63 }
 0x2a8   : > { %v3464_v21 = vpop.eup %3463  ;;  %v2292_v48 = vadd.f32 %v4741_v30, %v2256_v20  ;;  %3469 = vpow2.f32 %v2159_v36 }
 0x2a9   : > { %v2711_v43 = vadd.f32 -1.0, %v3464_v21 }
 0x2aa   : > { %v2851_v22 = vpack.c.bf16 %v2292_v48, %v2291_v50  ;;  %v3466_v31 = vpop.eup %3465 }
 0x2ab   : > { %v2221_v34 = vsel %vm2061_vm12, %v2019_v45, %v2711_v43  ;;  %v2712_v4 = vadd.f32 -1.0, %v3466_v31 }
 0x2ac   : > { %2875 = vst [vmem:[%s4753_s19 + $0x68] sm:$0xff] %v2851_v22   ;;  %v2257_v18 = vmul.f32 %v4735_v38, %v2221_v34 }
 0x2ad   : > { %v2222_v6 = vsel %vm2062_vm13, %v2022_v32, %v2712_v4 }
 0x2ae   : > { %v2258_v13 = vmul.f32 %v4735_v38, %v2222_v6  ;;  %v2293_v58 = vadd.f32 %v4741_v30, %v2257_v18 }
 0x2b0   : > { %v2294_v51 = vadd.f32 %v4741_v30, %v2258_v13 }
 0x2b1   : > { %v3468_v27 = vpop.eup %3467 }
 0x2b2   : > { %v3470_v16 = vpop.eup %3469  ;;  %v2713_v55 = vadd.f32 -1.0, %v3468_v27  ;;  %v2856_v57 = vpack.c.bf16 %v2294_v51, %v2293_v58 }
 0x2b3   : > { %v2714_v60 = vadd.f32 -1.0, %v3470_v16 }
 0x2b4   : > { %v2223_v29 = vsel %vm2063_vm14, %v2027_v1, %v2713_v55  ;;  %2876 = vst [vmem:[%s4753_s19 + $0x70] sm:$0xff] %v2856_v57  }
 0x2b5   : > { %v2259_v61 = vmul.f32 %v4735_v38, %v2223_v29  ;;  %v2224_v33 = vsel %vm2064_vm15, %v2030_v40, %v2714_v60 }
 0x2b6   : > { %v2260_v59 = vmul.f32 %v4735_v38, %v2224_v33 }
 0x2b7   : > { %v2295_v45 = vadd.f32 %v4741_v30, %v2259_v61 }
 0x2b8   : > { %v2296_v41 = vadd.f32 %v4741_v30, %v2260_v59 }
 0x2ba   : > { %v2861_v19 = vpack.c.bf16 %v2296_v41, %v2295_v45 }
 0x2bc   : > { %2877 = vst [vmem:[%s4753_s19 + $0x78] sm:$0xff] %v2861_v19  }
 0x2bd PF: > { %s15_s18 = sadd.s32 1, %s3477_s18  }
 0x2be   : > { %p12_p4 = scmp.ge.s32.totalorder %s15_s18, 4  }
 0x2c0   :  { %14 = sbr.rel (!%p12_p4) target bundleno = 1 (0x1), region = 70 }

// kernel: min2net_forward.3
= control target key start
LH: loop header
LB: loop body
LE: loop exit
PB: predicated region body
PF: predicated region fallthrough
CT: control target
= control target key end

     0   :  { %s1757_s1 = inlined_call_operand.vmem [shape: bf16[1280,128], index: 1, kind: input, shape index: {}]   ;;  %s1758_s0 = inlined_call_operand.vmem [shape: bf16[8,1280], index: 0, kind: input, shape index: {}]   ;;  %s1759_s3 = inlined_call_operand.vmem [shape: bf16[128,256], index: 3, kind: input, shape index: {}]   ;;  %s1760_s2 = inlined_call_operand.vmem [shape: f32[1,128], index: 2, kind: input, shape index: {}]   ;;  %s1761_s5 = inlined_call_operand.vmem [shape: f32[8,128], index: 5, kind: output, shape index: {0}]   ;;  %s1762_s4 = inlined_call_operand.vmem [shape: f32[1,256], index: 4, kind: input, shape index: {}]   ;;  %s1763_s6 = inlined_call_operand.vmem [shape: f32[8,256], index: 6, kind: output, shape index: {1}]  }
   0x1   :  { %v1289_v0 = vld [vmem:[%s1757_s1 + $0x40] sm:$0xff]   ;;  %v1293_v4 = vld [vmem:[%s1757_s1 + $0x48] sm:$0xff]   ;;  %v1297_v8 = vld [vmem:[%s1757_s1 + $0x50] sm:$0xff]  }
   0x2   :  { %v1290_v1 = vld [vmem:[%s1757_s1] sm:$0xff]   ;;  %1178 = vmatprep.subr.bf16.mxu0 %v1289_v0  ;;  %v1294_v5 = vld [vmem:[%s1757_s1 + $0x8] sm:$0xff]   ;;  %v1298_v9 = vld [vmem:[%s1757_s1 + $0x10] sm:$0xff]  }
   0x3   :  { %v1291_v2 = vld [vmem:[%s1757_s1 + $0xc0] sm:$0xff]   ;;  %1179 = vmatpush3.bf16.msra.mxu0 %v1290_v1  ;;  %v1295_v6 = vld [vmem:[%s1757_s1 + $0xc8] sm:$0xff]   ;;  %v1299_v10 = vld [vmem:[%s1757_s1 + $0xd0] sm:$0xff]  }
   0x4   :  { %v1292_v3 = vld [vmem:[%s1757_s1 + $0x80] sm:$0xff]   ;;  %1200 = vmatprep.subr.bf16.mxu1 %v1291_v2  ;;  %1180 = vmatprep.subr.bf16.mxu0 %v1293_v4  ;;  %v1296_v7 = vld [vmem:[%s1757_s1 + $0x88] sm:$0xff]   ;;  %v1300_v11 = vld [vmem:[%s1757_s1 + $0x90] sm:$0xff]  }
   0x5   :  { %1201 = vmatpush3.bf16.msra.mxu1 %v1292_v3  ;;  %v1301_v12 = vld [vmem:[%s1757_s1 + $0x58] sm:$0xff]   ;;  %v1305_v16 = vld [vmem:[%s1757_s1 + $0x60] sm:$0xff]   ;;  %v1309_v20 = vld [vmem:[%s1757_s1 + $0x68] sm:$0xff]  }
   0x6   :  { %1202 = vmatprep.subr.bf16.mxu1 %v1295_v6  ;;  %v1302_v13 = vld [vmem:[%s1757_s1 + $0x18] sm:$0xff]   ;;  %v1306_v17 = vld [vmem:[%s1757_s1 + $0x20] sm:$0xff]   ;;  %v1310_v21 = vld [vmem:[%s1757_s1 + $0x28] sm:$0xff]  }
   0x7   :  { %1181 = vmatpush3.bf16.msra.mxu0 %v1294_v5  ;;  %v1303_v14 = vld [vmem:[%s1757_s1 + $0xd8] sm:$0xff]   ;;  %v1307_v18 = vld [vmem:[%s1757_s1 + $0xe0] sm:$0xff]   ;;  %v1311_v22 = vld [vmem:[%s1757_s1 + $0xe8] sm:$0xff]  }
   0x8   :  { %1182 = vmatprep.subr.bf16.mxu0 %v1297_v8  ;;  %v1304_v15 = vld [vmem:[%s1757_s1 + $0x98] sm:$0xff]   ;;  %v1308_v19 = vld [vmem:[%s1757_s1 + $0xa0] sm:$0xff]   ;;  %v1312_v23 = vld [vmem:[%s1757_s1 + $0xa8] sm:$0xff]  }
   0x9   :  { %1203 = vmatpush3.bf16.msra.mxu1 %v1296_v7  ;;  %v1313_v24 = vld [vmem:[%s1757_s1 + $0x70] sm:$0xff]   ;;  %v1317_v28 = vld [vmem:[%s1757_s1 + $0x78] sm:$0xff]   ;;  %v23_v31 = vld [vmem:[%s1758_s0] sm:$0xff] }
   0xa   :  { %1204 = vmatprep.subr.bf16.mxu1 %v1299_v10  ;;  %v1314_v25 = vld [vmem:[%s1757_s1 + $0x30] sm:$0xff]   ;;  %v1318_v29 = vld [vmem:[%s1757_s1 + $0x38] sm:$0xff]   ;;  %v1072_v32 = vcombine.low %v23_v31, %v23_v31  ;;  %v1073_v33 = vcombine.high %v23_v31, %v23_v31  ;;  %v1323_v35 = vld [vmem:[%s1757_s1 + $0x140] sm:$0xff]  }
   0xb   :  { %1183 = vmatpush3.bf16.msra.mxu0 %v1298_v9  ;;  %v1315_v26 = vld [vmem:[%s1757_s1 + $0xf0] sm:$0xff]   ;;  %v1319_v30 = vld [vmem:[%s1757_s1 + $0xf8] sm:$0xff]   ;;  %v24_v36 = vld [vmem:[%s1758_s0 + $0x8] sm:$0xff] }
   0xc   :  { %1184 = vmatprep.subr.bf16.mxu0 %v1301_v12  ;;  %v1316_v27 = vld [vmem:[%s1757_s1 + $0xb0] sm:$0xff]   ;;  %v1322_v34 = vld [vmem:[%s1757_s1 + $0xb8] sm:$0xff]   ;;  %742 = vmatprep.mubr.bf16.mxu0 %v1073_v33  ;;  %v1074_v37 = vcombine.low %v24_v36, %v24_v36  ;;  %v1075_v38 = vcombine.high %v24_v36, %v24_v36  ;;  %v1326_v39 = vld [vmem:[%s1757_s1 + $0x100] sm:$0xff]  }
   0xd   :  { %1205 = vmatpush3.bf16.msra.mxu1 %v1300_v11  ;;  %v1327_v40 = vld [vmem:[%s1757_s1 + $0x1c0] sm:$0xff]   ;;  %v1329_v42 = vld [vmem:[%s1757_s1 + $0x148] sm:$0xff]   ;;  %v1333_v46 = vld [vmem:[%s1757_s1 + $0x150] sm:$0xff]  }
   0xe   :  { %1206 = vmatprep.subr.bf16.mxu1 %v1303_v14  ;;  %782 = vmatprep.mubr.bf16.mxu1 %v1075_v38  ;;  %v1328_v41 = vld [vmem:[%s1757_s1 + $0x180] sm:$0xff]   ;;  %v1330_v43 = vld [vmem:[%s1757_s1 + $0x108] sm:$0xff]   ;;  %v1334_v47 = vld [vmem:[%s1757_s1 + $0x110] sm:$0xff]  }
   0xf   :  { %1185 = vmatpush3.bf16.msra.mxu0 %v1302_v13  ;;  %v1331_v44 = vld [vmem:[%s1757_s1 + $0x1c8] sm:$0xff]   ;;  %v1335_v48 = vld [vmem:[%s1757_s1 + $0x1d0] sm:$0xff]   ;;  %v1337_v50 = vld [vmem:[%s1757_s1 + $0x158] sm:$0xff]  }
  0x10   :  { %1186 = vmatprep.subr.bf16.mxu0 %v1305_v16  ;;  %v1332_v45 = vld [vmem:[%s1757_s1 + $0x188] sm:$0xff]   ;;  %v1336_v49 = vld [vmem:[%s1757_s1 + $0x190] sm:$0xff]   ;;  %v1338_v51 = vld [vmem:[%s1757_s1 + $0x118] sm:$0xff]  }
  0x11   :  { %1207 = vmatpush3.bf16.msra.mxu1 %v1304_v15  ;;  %v1339_v52 = vld [vmem:[%s1757_s1 + $0x1d8] sm:$0xff]   ;;  %v1341_v54 = vld [vmem:[%s1757_s1 + $0x160] sm:$0xff]   ;;  %v1345_v58 = vld [vmem:[%s1757_s1 + $0x168] sm:$0xff]  }
  0x12   :  { %1208 = vmatprep.subr.bf16.mxu1 %v1307_v18  ;;  %v1340_v53 = vld [vmem:[%s1757_s1 + $0x198] sm:$0xff]   ;;  %v1342_v55 = vld [vmem:[%s1757_s1 + $0x120] sm:$0xff]   ;;  %v1346_v59 = vld [vmem:[%s1757_s1 + $0x128] sm:$0xff]  }
  0x13   :  { %1187 = vmatpush3.bf16.msra.mxu0 %v1306_v17  ;;  %v1343_v56 = vld [vmem:[%s1757_s1 + $0x1e0] sm:$0xff]   ;;  %v1347_v60 = vld [vmem:[%s1757_s1 + $0x1e8] sm:$0xff]   ;;  %v1349_v62 = vld [vmem:[%s1757_s1 + $0x170] sm:$0xff]  }
  0x14   :  { %1188 = vmatprep.subr.bf16.mxu0 %v1309_v20  ;;  %v1344_v57 = vld [vmem:[%s1757_s1 + $0x1a0] sm:$0xff]   ;;  %v1348_v61 = vld [vmem:[%s1757_s1 + $0x1a8] sm:$0xff]   ;;  %v1350_v63 = vld [vmem:[%s1757_s1 + $0x130] sm:$0xff]  }
  0x15   :  { %1209 = vmatpush3.bf16.msra.mxu1 %v1308_v19  ;;  %v1351_v0 = vld [vmem:[%s1757_s1 + $0x1f0] sm:$0xff]   ;;  %v1353_v2 = vld [vmem:[%s1757_s1 + $0x178] sm:$0xff]   ;;  %v1359_v9 = vld [vmem:[%s1757_s1 + $0x240] sm:$0xff]  }
  0x16   :  { %1210 = vmatprep.subr.bf16.mxu1 %v1311_v22  ;;  %v1352_v1 = vld [vmem:[%s1757_s1 + $0x1b0] sm:$0xff]   ;;  %v1354_v3 = vld [vmem:[%s1757_s1 + $0x138] sm:$0xff]   ;;  %v1362_v13 = vld [vmem:[%s1757_s1 + $0x200] sm:$0xff]  }
  0x17   :  { %1189 = vmatpush3.bf16.msra.mxu0 %v1310_v21  ;;  %v1355_v4 = vld [vmem:[%s1757_s1 + $0x1f8] sm:$0xff]   ;;  %v25_v5 = vld [vmem:[%s1758_s0 + $0x10] sm:$0xff]  ;;  %v1363_v14 = vld [vmem:[%s1757_s1 + $0x248] sm:$0xff]  }
  0x18   :  { %1190 = vmatprep.subr.bf16.mxu0 %v1313_v24  ;;  %v1076_v6 = vcombine.low %v25_v5, %v25_v5  ;;  %v1077_v7 = vcombine.high %v25_v5, %v25_v5  ;;  %v1358_v8 = vld [vmem:[%s1757_s1 + $0x1b8] sm:$0xff]   ;;  %v1364_v15 = vld [vmem:[%s1757_s1 + $0x208] sm:$0xff]   ;;  %v1365_v16 = vld [vmem:[%s1757_s1 + $0x250] sm:$0xff]  }
  0x19   :  { %1211 = vmatpush3.bf16.msra.mxu1 %v1312_v23  ;;  %v26_v10 = vld [vmem:[%s1758_s0 + $0x18] sm:$0xff]  ;;  %v1366_v17 = vld [vmem:[%s1757_s1 + $0x210] sm:$0xff]   ;;  %v1369_v20 = vld [vmem:[%s1757_s1 + $0x260] sm:$0xff]  }
  0x1a   :  { %1212 = vmatprep.subr.bf16.mxu1 %v1315_v26  ;;  %v1078_v11 = vcombine.low %v26_v10, %v26_v10  ;;  %v1079_v12 = vcombine.high %v26_v10, %v26_v10  ;;  %v1367_v18 = vld [vmem:[%s1757_s1 + $0x258] sm:$0xff]   ;;  %v1370_v21 = vld [vmem:[%s1757_s1 + $0x220] sm:$0xff]   ;;  %v1371_v23 = vld [vmem:[%s1757_s1 + $0x268] sm:$0xff]  }
  0x1b   :  { %1191 = vmatpush3.bf16.msra.mxu0 %v1314_v25  ;;  %v1368_v19 = vld [vmem:[%s1757_s1 + $0x218] sm:$0xff]   ;;  %v27_v22 = vld [vmem:[%s1758_s0 + $0x20] sm:$0xff]  ;;  %v1372_v25 = vld [vmem:[%s1757_s1 + $0x228] sm:$0xff]  }
  0x1c   :  { %1192 = vmatprep.subr.bf16.mxu0 %v1317_v28  ;;  %v1081_v24 = vcombine.high %v27_v22, %v27_v22  ;;  %v1373_v26 = vld [vmem:[%s1757_s1 + $0x270] sm:$0xff]   ;;  %v1375_v28 = vld [vmem:[%s1757_s1 + $0x278] sm:$0xff]   ;;  %v1379_v31 = vld [vmem:[%s1759_s3] ss:$8 sps:$4 sm:$0xff]  }
  0x1d   :  { %1213 = vmatpush3.bf16.msra.mxu1 %v1316_v27  ;;  %v1374_v27 = vld [vmem:[%s1757_s1 + $0x230] sm:$0xff]   ;;  %v1385_v36 = vld [vmem:[%s1759_s3 + $0x20] ss:$8 sps:$4 sm:$0xff]  }
  0x1e   :  { %1214 = vmatprep.subr.bf16.mxu1 %v1319_v30  ;;  %v1080_v30 = vcombine.low %v27_v22, %v27_v22  ;;  %v1384_v33 = vld [vmem:[%s1759_s3 + $0x14] ss:$8 sps:$4 sm:$0xff]   ;;  %v1388_v38 = vld [vmem:[%s1759_s3 + $0x30] ss:$8 sps:$4 sm:$0xff]  }
  0x1f   :  { %1193 = vmatpush3.bf16.msra.mxu0 %v1318_v29  ;;  %v1376_v29 = vld [vmem:[%s1757_s1 + $0x238] sm:$0xff]  }
  0x20   :  { %1222 = vmatprep.subr.bf16.mxu0 %v1323_v35  ;;  %v1387_v35 = vld [vmem:[%s1759_s3 + $0x24] ss:$8 sps:$4 sm:$0xff]  }
  0x21   :  { %1215 = vmatpush3.bf16.msra.mxu1 %v1322_v34  ;;  %v1382_v34 = vld [vmem:[%s1759_s3 + $0x10] ss:$8 sps:$4 sm:$0xff]  }
  0x22   :  { %743 = vmatmul.mubr.bf16.vlgmr.msra.gmra.mrb[0].mxu0 %v1072_v32  ;;  %1244 = vmatprep.subr.bf16.mxu1 %v1327_v40  ;;  %v1381_v32 = vld [vmem:[%s1759_s3 + $0x4] ss:$8 sps:$4 sm:$0xff]   ;;  %v1391_v40 = vld [vmem:[%s1759_s3 + $0x40] ss:$8 sps:$4 sm:$0xff]  }
  0x23   :  { %1223 = vmatpush3.bf16.msra.mxu0 %v1326_v39  ;;  %822 = vmatprep.mubr.bf16.mxu0 %v1077_v7  ;;  %v1393_v39 = vld [vmem:[%s1759_s3 + $0x44] ss:$8 sps:$4 sm:$0xff]  }
  0x24   :  { %783 = vmatmul.mubr.bf16.vlgmr.msra.gmra.mrb[0].mxu1 %v1074_v37  ;;  %1224 = vmatprep.subr.bf16.mxu0 %v1329_v42  ;;  %v1390_v37 = vld [vmem:[%s1759_s3 + $0x34] ss:$8 sps:$4 sm:$0xff]   ;;  %v1394_v42 = vld [vmem:[%s1759_s3 + $0x50] ss:$8 sps:$4 sm:$0xff]  }
  0x25   :  { %1245 = vmatpush3.bf16.msra.mxu1 %v1328_v41  ;;  %862 = vmatprep.mubr.bf16.mxu1 %v1079_v12  ;;  %v1396_v41 = vld [vmem:[%s1759_s3 + $0x54] ss:$8 sps:$4 sm:$0xff]  }
  0x26   :  { %1246 = vmatprep.subr.bf16.mxu1 %v1331_v44  ;;  %v1397_v44 = vld [vmem:[%s1759_s3 + $0x60] ss:$8 sps:$4 sm:$0xff]  }
  0x27   :  { %1225 = vmatpush3.bf16.msra.mxu0 %v1330_v43  ;;  %v1399_v43 = vld [vmem:[%s1759_s3 + $0x64] ss:$8 sps:$4 sm:$0xff]  }
  0x28   :  { %1226 = vmatprep.subr.bf16.mxu0 %v1333_v46  ;;  %v1400_v46 = vld [vmem:[%s1759_s3 + $0x70] ss:$8 sps:$4 sm:$0xff]  }
  0x29   :  { %1247 = vmatpush3.bf16.msra.mxu1 %v1332_v45  ;;  %v1402_v45 = vld [vmem:[%s1759_s3 + $0x74] ss:$8 sps:$4 sm:$0xff]  }
  0x2a   :  { %1248 = vmatprep.subr.bf16.mxu1 %v1335_v48 }
  0x2b   :  { %1227 = vmatpush3.bf16.msra.mxu0 %v1334_v47  ;;  %v1403_v47 = vmov 0  }
  0x2c   :  { %1228 = vmatprep.subr.bf16.mxu0 %v1337_v50 }
  0x2d   :  { %1249 = vmatpush3.bf16.msra.mxu1 %v1336_v49  ;;  %v1071_v49 = vld [vmem:[%s1760_s2] ss:$0 sm:$0xff] }
  0x2e   :  { %1250 = vmatprep.subr.bf16.mxu1 %v1339_v52 }
  0x2f   :  { %1229 = vmatpush3.bf16.msra.mxu0 %v1338_v51 }
  0x30   :  { %1230 = vmatprep.subr.bf16.mxu0 %v1341_v54 }
  0x31   :  { %1251 = vmatpush3.bf16.msra.mxu1 %v1340_v53 }
  0x32   :  { %1252 = vmatprep.subr.bf16.mxu1 %v1343_v56 }
  0x33   :  { %1231 = vmatpush3.bf16.msra.mxu0 %v1342_v55 }
  0x34   :  { %1232 = vmatprep.subr.bf16.mxu0 %v1345_v58 }
  0x35   :  { %1253 = vmatpush3.bf16.msra.mxu1 %v1344_v57 }
  0x36   :  { %1254 = vmatprep.subr.bf16.mxu1 %v1347_v60 }
  0x37   :  { %1233 = vmatpush3.bf16.msra.mxu0 %v1346_v59 }
  0x38   :  { %1234 = vmatprep.subr.bf16.mxu0 %v1349_v62 }
  0x39   :  { %1255 = vmatpush3.bf16.msra.mxu1 %v1348_v61 }
  0x3a   :  { %1256 = vmatprep.subr.bf16.mxu1 %v1351_v0 }
  0x3b   :  { %1235 = vmatpush3.bf16.msra.mxu0 %v1350_v63 }
  0x3c   :  { %1236 = vmatprep.subr.bf16.mxu0 %v1353_v2 }
  0x3d   :  { %1257 = vmatpush3.bf16.msra.mxu1 %v1352_v1 }
  0x3e   :  { %1258 = vmatprep.subr.bf16.mxu1 %v1355_v4 }
  0x3f   :  { %1237 = vmatpush3.bf16.msra.mxu0 %v1354_v3 }
  0x40   :  { %1266 = vmatprep.subr.bf16.mxu0 %v1359_v9 }
  0x41   :  { %1259 = vmatpush3.bf16.msra.mxu1 %v1358_v8 }
  0x42   :  { %823 = vmatmul.mubr.bf16.vlgmr.msra.gmra.mrb[4].mxu0 %v1076_v6  ;;  %1020 = vmatprep.subr.bf16.mxu1 %v1381_v32 }
  0x43   :  { %1267 = vmatpush3.bf16.msra.mxu0 %v1362_v13  ;;  %902 = vmatprep.mubr.bf16.mxu0 %v1081_v24 }
  0x44   :  { %863 = vmatmul.mubr.bf16.vlgmr.msra.gmra.mrb[4].mxu1 %v1078_v11  ;;  %1268 = vmatprep.subr.bf16.mxu0 %v1363_v14 }
  0x45   :  { %1021 = vmatpush1.bf16.msra.mxu1 %v1379_v31  ;;  %1052 = vmatprep.mubr.bf16.mxu1 %v1403_v47 }
  0x46   :  { %1022 = vmatprep.subr.bf16.mxu1 %v1384_v33 }
  0x47   :  { %1269 = vmatpush3.bf16.msra.mxu0 %v1364_v15 }
  0x48   :  { %1270 = vmatprep.subr.bf16.mxu0 %v1365_v16  ;;  %v930_v16 = vlaneseq }
  0x49   :  { %1023 = vmatpush1.bf16.msra.mxu1 %v1382_v34 }
  0x4a   :  { %1024 = vmatprep.subr.bf16.mxu1 %v1387_v35 }
  0x4b   :  { %1271 = vmatpush3.bf16.msra.mxu0 %v1366_v17  ;;  %v931_v17 = vshrl.u32 %v930_v16, 7 }
  0x4c   :  { %1272 = vmatprep.subr.bf16.mxu0 %v1367_v18 }
  0x4d   :  { %1025 = vmatpush1.bf16.msra.mxu1 %v1385_v36  ;;  %v932_v18 = vsub.s32 0, %v931_v17 }
  0x4e   :  { %1026 = vmatprep.subr.bf16.mxu1 %v1390_v37 }
  0x4f   :  { %1273 = vmatpush3.bf16.msra.mxu0 %v1368_v19  ;;  %v928_v19 = vld [vmem:[%s1762_s4] sm:$0x3] }
  0x50   :  { %1274 = vmatprep.subr.bf16.mxu0 %v1369_v20  ;;  %v936_v20 = vsub.s32 1, %v931_v17 }
  0x51   :  { %1027 = vmatpush1.bf16.msra.mxu1 %v1388_v38 }
  0x52   :  { %1028 = vmatprep.subr.bf16.mxu1 %v1393_v39  ;;  %v937_v22 = vrot.slane %v928_v19, %v936_v20 }
  0x53   :  { %1275 = vmatpush3.bf16.msra.mxu0 %v1370_v21  ;;  %v933_v21 = vrot.slane %v928_v19, %v932_v18 }
  0x54   :  { %1276 = vmatprep.subr.bf16.mxu0 %v1371_v23 }
  0x55   :  { %1029 = vmatpush1.bf16.msra.mxu1 %v1391_v40 }
  0x56   :  { %1030 = vmatprep.subr.bf16.mxu1 %v1396_v41 }
  0x57   :  { %1277 = vmatpush3.bf16.msra.mxu0 %v1372_v25 }
  0x58   :  { %1278 = vmatprep.subr.bf16.mxu0 %v1373_v26 }
  0x59   :  { %1031 = vmatpush1.bf16.msra.mxu1 %v1394_v42 }
  0x5a   :  { %1032 = vmatprep.subr.bf16.mxu1 %v1399_v43 }
  0x5b   :  { %1279 = vmatpush3.bf16.msra.mxu0 %v1374_v27 }
  0x5c   :  { %1280 = vmatprep.subr.bf16.mxu0 %v1375_v28 }
  0x5d   :  { %1033 = vmatpush1.bf16.msra.mxu1 %v1397_v44 }
  0x5e   :  { %1034 = vmatprep.subr.bf16.mxu1 %v1402_v45 }
  0x5f   :  { %1281 = vmatpush3.bf16.msra.mxu0 %v1376_v29 }
  0x61   :  { %1035 = vmatpush1.bf16.msra.mxu1 %v1400_v46 }
  0x62   :  { %903 = vmatmul.mubr.bf16.vlgmr.msra.gmra.mrb[8].mxu0 %v1080_v30 }
  0xf5   :  { %v1194_v48 = vpop.f32.mrb[0].mxu0 }
  0xf6   :  { %v1195_v50 = vpop.f32.mrb[1].mxu0 }
  0xf7   :  { %v1196_v51 = vadd.f32 %v1195_v50, %v1194_v48  ;;  %v1197_v52 = vpop.f32.mrb[2].mxu0  ;;  %v1216_v53 = vpop.f32.mrb[0].mxu1 }
  0xf8   :  { %v1198_v54 = vpop.f32.mrb[3].mxu0  ;;  %v1217_v55 = vpop.f32.mrb[1].mxu1 }
  0xf9   :  { %v745_v56 = vadd.f32 %v1196_v51, %v1071_v49  ;;  %v1218_v57 = vadd.f32 %v1217_v55, %v1216_v53  ;;  %v1219_v58 = vpop.f32.mrb[2].mxu1 }
  0xfa   :  { %v1220_v59 = vpop.f32.mrb[3].mxu1 }
  0xfb   :  { %v785_v60 = vadd.f32 %v1218_v57, %v745_v56 }
 0x115   :  { %v1238_v61 = vpop.f32.mrb[4].mxu0 }
 0x116   :  { %v1239_v62 = vpop.f32.mrb[5].mxu0 }
 0x117   :  { %v1240_v63 = vadd.f32 %v1239_v62, %v1238_v61  ;;  %v1241_v0 = vpop.f32.mrb[6].mxu0  ;;  %v1260_v1 = vpop.f32.mrb[4].mxu1 }
 0x118   :  { %v1242_v2 = vpop.f32.mrb[7].mxu0  ;;  %v1261_v4 = vpop.f32.mrb[5].mxu1 }
 0x119   :  { %v825_v3 = vadd.f32 %v1240_v63, %v785_v60  ;;  %v1262_v5 = vadd.f32 %v1261_v4, %v1260_v1  ;;  %v1263_v6 = vpop.f32.mrb[6].mxu1 }
 0x11a   :  { %v1264_v7 = vpop.f32.mrb[7].mxu1 }
 0x11b   :  { %v865_v8 = vadd.f32 %v1262_v5, %v825_v3 }
 0x135   :  { %v1282_v9 = vpop.f32.mrb[8].mxu0 }
 0x136   :  { %v1283_v10 = vpop.f32.mrb[9].mxu0 }
 0x137   :  { %v1284_v11 = vadd.f32 %v1283_v10, %v1282_v9  ;;  %v1285_v12 = vpop.f32.mrb[10].mxu0 }
 0x138   :  { %v1286_v13 = vpop.f32.mrb[11].mxu0 }
 0x139   :  { %v905_v14 = vadd.f32 %v1284_v11, %v865_v8 }
 0x13b   :  { %910 = vst [vmem:[%s1761_s5] sm:$0xff] %v905_v14  ;;  %v911_v15 = vpack.c.bf16 %v905_v14, %v905_v14 }
 0x13d   :  { %1053 = vmatmul.mubr.bf16.vlgmr.msra.gmra.mrb[8].mxu1 %v911_v15 }
 0x210   :  { %v1054_v23 = vpop.f32.mrb[8].mxu1 }
 0x211   :  { %v1055_v24 = vadd.f32 %v1054_v23, %v933_v21  ;;  %v1056_v25 = vpop.f32.mrb[9].mxu1 }
 0x212   :  { %v1057_v26 = vadd.f32 %v1056_v25, %v937_v22  ;;  %v1058_v27 = vpop.f32.mrb[10].mxu1 }
 0x213   :  { %1061 = vst [vmem:[%s1763_s6] sm:$0xff] %v1055_v24  ;;  %v1059_v28 = vpop.f32.mrb[11].mxu1 }
 0x214   :  { %1062 = vst [vmem:[%s1763_s6 + $0x8] sm:$0xff] %v1057_v26 }

</bundles_post_ra>
